<compile_context>
chip_gen: v7x
topology: tpu7x:2x2x1
jax: 0.10.0
libtpu: 0.0.40
codegen_flags: <defaults>
</compile_context>

<pallas_src>
import functools
import numpy as np
import jax
import jax.numpy as jnp
from jax import lax
from jax.experimental import pallas as pl
from jax.experimental.pallas import tpu as pltpu


# ----------------------------------------------------------------------------
# One-time host-side weight repack (pure indexing of PyTorch-format params)
# ----------------------------------------------------------------------------
def pack_params(params):
    c1w, c1b, c2w, c2b, f1w, f1b, f2w, f2b, f3w, f3b = [
        np.asarray(p, np.float32) for p in params]

    # conv1 (3->6, 5x5) acting on the packed input (row h, lane c*32 + w).
    # For kernel row ki, w1[ki] maps input lane c*32+iw to output lane
    # co*14+pw (even output column ow=2*pw, "A" half, lanes 0..127) and
    # 128+co*14+pw (odd column ow=2*pw+1, "B" half).  max(A,B) is the
    # W-direction half of the 2x2 pool.
    w1 = np.zeros((5, 128, 256), np.float32)
    co, c, ki, kj, pw = np.meshgrid(np.arange(6), np.arange(3), np.arange(5),
                                    np.arange(5), np.arange(14), indexing="ij")
    w1[ki, c * 32 + 2 * pw + kj, co * 14 + pw] = c1w[co, c, ki, kj]
    w1[ki, c * 32 + 2 * pw + 1 + kj, 128 + co * 14 + pw] = c1w[co, c, ki, kj]
    b1 = np.zeros((1, 128), np.float32)
    b1[0, :84] = np.repeat(c1b, 14)

    # conv2 (6->16, 5x5) on pooled1 (lane ci*14 + pw, doubled row grid).
    w2 = np.zeros((5, 128, 256), np.float32)
    co, ci, ki, kj, pw = np.meshgrid(np.arange(16), np.arange(6), np.arange(5),
                                     np.arange(5), np.arange(5), indexing="ij")
    w2[ki, ci * 14 + 2 * pw + kj, co * 5 + pw] = c2w[co, ci, ki, kj]
    w2[ki, ci * 14 + 2 * pw + 1 + kj, 128 + co * 5 + pw] = c2w[co, ci, ki, kj]
    b2 = np.zeros((1, 128), np.float32)
    b2[0, :80] = np.repeat(c2b, 5)

    # fc1 with the PyTorch NCHW flatten (flat = c*25 + h*5 + w) folded in.
    # The kernel stages pooled2 of image b at fc_in[b, 128*h + c*5 + w].
    wf1 = np.zeros((640, 128), np.float32)
    j, c, h, w = np.meshgrid(np.arange(120), np.arange(16), np.arange(5),
                             np.arange(5), indexing="ij")
    wf1[h * 128 + c * 5 + w, j] = f1w[j, c * 25 + h * 5 + w]
    bf1 = np.zeros((1, 128), np.float32)
    bf1[0, :120] = f1b
    wf2 = np.zeros((128, 128), np.float32)
    wf2[:120, :84] = f2w.T
    bf2 = np.zeros((1, 128), np.float32)
    bf2[0, :84] = f2b
    wf3 = np.zeros((128, 128), np.float32)
    wf3[:84, :10] = f3w.T
    bf3 = np.zeros((1, 128), np.float32)
    bf3[0, :10] = f3b

    as_bf = lambda a: jnp.asarray(a, dtype=jnp.bfloat16)
    as_f32 = lambda a: jnp.asarray(a, dtype=jnp.float32)
    return (as_bf(w1), as_f32(b1), as_bf(w2), as_f32(b2),
            as_bf(wf1), as_f32(bf1), as_bf(wf2), as_f32(bf2),
            as_bf(wf3), as_f32(bf3))


# ----------------------------------------------------------------------------
# Fused Pallas kernel: one grid step == `imgs` images, end to end
# ----------------------------------------------------------------------------
def mynet_kernel(x_ref, w1_ref, b1_ref, w2_ref, b2_ref, wf1_ref, bf1_ref,
                 wf2_ref, bf2_ref, wf3_ref, bf3_ref, o_ref, fc_in_ref, *,
                 imgs):
    f32, bf16 = jnp.float32, jnp.bfloat16

    # fc staging buffer: row b = image b's flattened pooled2 features
    # (spatial-row-major along the 5 lane tiles).  Fully re-initialised every
    # grid step so downstream dots never read stale VMEM.
    fc_in_ref[...] = jnp.zeros_like(fc_in_ref)

    for b in range(imgs):
        # ---- conv1 (3->6, 5x5, VALID) + ReLU + 2x2 max-pool (registers) ----
        acc1 = jnp.zeros((28, 256), f32)
        for ki in range(5):
            slab = x_ref[b, ki:ki + 28, :].astype(bf16)            # (28, 128)
            acc1 = acc1 + jnp.dot(slab, w1_ref[ki],
                                  preferred_element_type=f32)
        # W-pool = max of the even/odd-column halves; then bias + ReLU (f32).
        t1 = jnp.maximum(
            jnp.maximum(acc1[:, :128], acc1[:, 128:]) + b1_ref[...], 0.0)
        # H-pool on the doubled row grid: row 2*ph holds pooled1[ph].
        t1p = jnp.maximum(t1[0:27, :], t1[1:28, :])                # (27, 128)

        # ---- conv2 (6->16, 5x5) + ReLU + 2x2 max-pool (registers) ----------
        acc2 = jnp.zeros((19, 256), f32)
        for ki in range(5):
            slab = t1p[2 * ki:2 * ki + 19, :].astype(bf16)         # (19, 128)
            acc2 = acc2 + jnp.dot(slab, w2_ref[ki],
                                  preferred_element_type=f32)
        t2 = jnp.maximum(
            jnp.maximum(acc2[:, :128], acc2[:, 128:]) + b2_ref[...], 0.0)
        # H-pool on the doubled grid: row 4*ph2 holds pooled2[ph2].
        p2 = jnp.maximum(t2[0:17, :], t2[2:19, :])                 # (17, 128)

        # Stage the 5 pooled2 rows of this image for the batch-stacked MLP.
        for h in range(5):
            fc_in_ref[b:b + 1, 128 * h:128 * (h + 1)] = p2[4 * h:4 * h + 1, :]

    # ---- MLP head, batch-stacked: fc1(ReLU) -> fc2(ReLU) -> fc3 ------------
    z = fc_in_ref[...].astype(bf16)                                # (8, 640)
    z = jnp.maximum(jnp.dot(z, wf1_ref[...], preferred_element_type=f32)
                    + bf1_ref[...], 0.0)
    z = jnp.maximum(jnp.dot(z.astype(bf16), wf2_ref[...],
                            preferred_element_type=f32) + bf2_ref[...], 0.0)
    logits = (jnp.dot(z.astype(bf16), wf3_ref[...],
                      preferred_element_type=f32) + bf3_ref[...])  # (8, 128)
    # Lane/sublane-dense unmasked (8, 128) output store.
    o_ref[0] = logits


# ----------------------------------------------------------------------------
# Full forward pass (MyNet.forward semantics)
# ----------------------------------------------------------------------------
def _images_per_step(batch):
    # 2 images/step on dual-TensorCore chips (v7x) so both cores are busy; a
    # single monolithic step on single-TC chips (v5e/v6e) minimises grid
    # overhead.  Fallback: single step (always correct).
    try:
        kind = jax.devices()[0].device_kind.lower()
        if ("v7" in kind) or ("7x" in kind):
            return min(2, batch)
    except Exception:
        pass
    return batch


def mynet_forward(x_nchw, packed):
    n = x_nchw.shape[0]
    imgs = _images_per_step(n)
    assert n % imgs == 0
    steps = n // imgs

    # NCHW -> lane-dense (N, H=32, C*W=96 -> pad 128) packing for conv1.
    xp = jnp.transpose(x_nchw, (0, 2, 1, 3)).reshape(n, 32, 96)
    xp = jnp.pad(xp, ((0, 0), (0, 0), (0, 32)))

    def whole(a):  # grid-invariant, fully resident weight block
        return pl.BlockSpec(a.shape, lambda i, nd=a.ndim: (0,) * nd)

    out = pl.pallas_call(
        functools.partial(mynet_kernel, imgs=imgs),
        out_shape=jax.ShapeDtypeStruct((steps, 8, 128), jnp.float32),
        grid=(steps,),
        in_specs=[pl.BlockSpec((imgs, 32, 128), lambda i: (i, 0, 0))]
                 + [whole(a) for a in packed],
        out_specs=pl.BlockSpec((1, 8, 128), lambda i: (i, 0, 0)),
        scratch_shapes=[pltpu.VMEM((8, 640), jnp.float32)],
        compiler_params=pltpu.CompilerParams(
            dimension_semantics=("parallel",)),
    )(xp, *packed)
    return out[:, :imgs, :10].reshape(n, 10)


# ----------------------------------------------------------------------------
# Pure-JAX reference (mirrors the PyTorch module) for verification
# ----------------------------------------------------------------------------
def mynet_reference(x_nchw, params, *, bf16_operands=False):
    # With bf16_operands=True the conv/matmul operands are rounded to bfloat16
    # exactly where the kernel rounds them, so kernel-vs-reference differences
    # reduce to f32 summation order.
    c1w, c1b, c2w, c2b, f1w, f1b, f2w, f2b, f3w, f3b = params
    r = ((lambda a: a.astype(jnp.bfloat16).astype(jnp.float32))
         if bf16_operands else (lambda a: a))
    dn = ("NCHW", "OIHW", "NCHW")
    y = lax.conv_general_dilated(r(x_nchw), r(c1w), (1, 1), "VALID",
                                 dimension_numbers=dn)
    y = jnp.maximum(y + c1b[None, :, None, None], 0.0)
    y = lax.reduce_window(y, -jnp.inf, lax.max, (1, 1, 2, 2), (1, 1, 2, 2),
                          "VALID")
    y = lax.conv_general_dilated(r(y), r(c2w), (1, 1), "VALID",
                                 dimension_numbers=dn)
    y = jnp.maximum(y + c2b[None, :, None, None], 0.0)
    y = lax.reduce_window(y, -jnp.inf, lax.max, (1, 1, 2, 2), (1, 1, 2, 2),
                          "VALID")
    y = y.reshape(x_nchw.shape[0], -1)
    y = jnp.maximum(r(y) @ r(f1w).T + f1b, 0.0)
    y = jnp.maximum(r(y) @ r(f2w).T + f2b, 0.0)
    return r(y) @ r(f3w).T + f3b


# ----------------------------------------------------------------------------
def make_params(key):
    ks = jax.random.split(key, 10)
    f32 = jnp.float32
    c1w = 0.1 * jax.random.normal(ks[0], (6, 3, 5, 5), f32)
    c1b = 0.01 * jax.random.normal(ks[1], (6,), f32)
    c2w = 0.1 * jax.random.normal(ks[2], (16, 6, 5, 5), f32)
    c2b = 0.01 * jax.random.normal(ks[3], (16,), f32)
    f1w = 0.1 * jax.random.normal(ks[4], (120, 400), f32)
    f1b = 0.01 * jax.random.normal(ks[5], (120,), f32)
    f2w = 0.1 * jax.random.normal(ks[6], (84, 120), f32)
    f2b = 0.01 * jax.random.normal(ks[7], (84,), f32)
    f3w = 0.1 * jax.random.normal(ks[8], (10, 84), f32)
    f3b = 0.01 * jax.random.normal(ks[9], (10,), f32)
    return (c1w, c1b, c2w, c2b, f1w, f1b, f2w, f2b, f3w, f3b)


if __name__ == "__main__":
    key = jax.random.PRNGKey(0)
    kx, kp = jax.random.split(key)
    # Batch must be 4 and input 3x32x32: the module hard-codes out.view(4, -1)
    # and fc1(in_features=400) == 16*5*5, which forces CIFAR-10 geometry.
    x = jax.random.normal(kx, (4, 3, 32, 32), jnp.float32)
    params = make_params(kp)

    packed = pack_params(params)          # one-time repack, outside the jit
    fwd = jax.jit(mynet_forward)
    out = jax.block_until_ready(fwd(x, packed))
    assert out.shape == (4, 10), out.shape

    ref = mynet_reference(x, params, bf16_operands=True)
    if not jnp.allclose(out, ref, rtol=2e-2, atol=2e-2):
        err = float(jnp.max(jnp.abs(out - ref)))
        raise AssertionError(f"Pallas output mismatch vs. JAX reference "
                             f"(max|diff|={err})")
    print("KERNEL_OK")
</pallas_src>

<mosaic_0001>
module attributes {stable_mosaic.version = 11 : i64} {
  func.func @mynet_kernel(%arg0: i32, %arg1: memref<4x32x128xf32, #tpu.memory_space<vmem>>, %arg2: memref<5x128x256xbf16, #tpu.memory_space<vmem>>, %arg3: memref<1x128xf32, #tpu.memory_space<vmem>>, %arg4: memref<5x128x256xbf16, #tpu.memory_space<vmem>>, %arg5: memref<1x128xf32, #tpu.memory_space<vmem>>, %arg6: memref<640x128xbf16, #tpu.memory_space<vmem>>, %arg7: memref<1x128xf32, #tpu.memory_space<vmem>>, %arg8: memref<128x128xbf16, #tpu.memory_space<vmem>>, %arg9: memref<1x128xf32, #tpu.memory_space<vmem>>, %arg10: memref<128x128xbf16, #tpu.memory_space<vmem>>, %arg11: memref<1x128xf32, #tpu.memory_space<vmem>>, %arg12: memref<1x8x128xf32, #tpu.memory_space<vmem>>, %arg13: memref<8x640xf32, #tpu.memory_space<vmem>>) attributes {dimension_semantics = [#tpu.dimension_semantics<parallel>], iteration_bounds = array<i64: 1>, scalar_prefetch = 0 : i64, scratch_operands = 1 : i64, tpu.core_type = #tpu.core_type<tc>, window_params = [{transform_indices = @transform_0, window_bounds = array<i64: 4, 32, 128>}, {pipeline_mode = #tpu.pipeline_mode<synchronous>, transform_indices = @transform_1, window_bounds = array<i64: 5, 128, 256>}, {pipeline_mode = #tpu.pipeline_mode<synchronous>, transform_indices = @transform_2, window_bounds = array<i64: 1, 128>}, {pipeline_mode = #tpu.pipeline_mode<synchronous>, transform_indices = @transform_3, window_bounds = array<i64: 5, 128, 256>}, {pipeline_mode = #tpu.pipeline_mode<synchronous>, transform_indices = @transform_4, window_bounds = array<i64: 1, 128>}, {pipeline_mode = #tpu.pipeline_mode<synchronous>, transform_indices = @transform_5, window_bounds = array<i64: 640, 128>}, {pipeline_mode = #tpu.pipeline_mode<synchronous>, transform_indices = @transform_6, window_bounds = array<i64: 1, 128>}, {pipeline_mode = #tpu.pipeline_mode<synchronous>, transform_indices = @transform_7, window_bounds = array<i64: 128, 128>}, {pipeline_mode = #tpu.pipeline_mode<synchronous>, transform_indices = @transform_8, window_bounds = array<i64: 1, 128>}, {pipeline_mode = #tpu.pipeline_mode<synchronous>, transform_indices = @transform_9, window_bounds = array<i64: 128, 128>}, {pipeline_mode = #tpu.pipeline_mode<synchronous>, transform_indices = @transform_10, window_bounds = array<i64: 1, 128>}, {transform_indices = @transform_11, window_bounds = array<i64: 1, 8, 128>}]} {
    %cst = arith.constant 0.000000e+00 : f32
    %0 = vector.broadcast %cst : f32 to vector<8x640xf32>
    %c0 = arith.constant 0 : index
    %c0_0 = arith.constant 0 : index
    %1 = vector.load %arg13[%c0, %c0_0] : memref<8x640xf32, #tpu.memory_space<vmem>>, vector<8x640xf32>
    tpu.vector_store %arg13[%c0, %c0_0], %0 {strides = array<i32>} : memref<8x640xf32, #tpu.memory_space<vmem>>, vector<8x640xf32>,
    %cst_1 = arith.constant 0.000000e+00 : f32
    %2 = vector.broadcast %cst_1 : f32 to vector<28x256xf32>
    %c0_2 = arith.constant 0 : index
    %c0_3 = arith.constant 0 : index
    %c0_4 = arith.constant 0 : index
    %3 = vector.load %arg1[%c0_2, %c0_3, %c0_4] : memref<4x32x128xf32, #tpu.memory_space<vmem>>, vector<1x28x128xf32>
    %4 = vector.shape_cast %3 : vector<1x28x128xf32> to vector<28x128xf32>
    %5 = arith.truncf %4 : vector<28x128xf32> to vector<28x128xbf16>
    %c0_5 = arith.constant 0 : index
    %c0_6 = arith.constant 0 : index
    %c0_7 = arith.constant 0 : index
    %6 = vector.load %arg2[%c0_5, %c0_6, %c0_7] : memref<5x128x256xbf16, #tpu.memory_space<vmem>>, vector<1x128x256xbf16>
    %7 = vector.shape_cast %6 : vector<1x128x256xbf16> to vector<128x256xbf16>
    %cst_8 = arith.constant dense<0.000000e+00> : vector<28x256xf32>
    %8 = tpu.matmul %5, %7, %cst_8 {dimension_numbers = #tpu.dot_dimension_numbers<[1], [0], [0], [1], [0, 0, 1, 1], [], []>} : vector<28x128xbf16>, vector<128x256xbf16>, vector<28x256xf32> -> vector<28x256xf32>
    %9 = arith.addf %2, %8 : vector<28x256xf32>
    %c0_9 = arith.constant 0 : index
    %c1 = arith.constant 1 : index
    %c0_10 = arith.constant 0 : index
    %10 = vector.load %arg1[%c0_9, %c1, %c0_10] : memref<4x32x128xf32, #tpu.memory_space<vmem>>, vector<1x28x128xf32>
    %11 = vector.shape_cast %10 : vector<1x28x128xf32> to vector<28x128xf32>
    %12 = arith.truncf %11 : vector<28x128xf32> to vector<28x128xbf16>
    %c1_11 = arith.constant 1 : index
    %c0_12 = arith.constant 0 : index
    %c0_13 = arith.constant 0 : index
    %13 = vector.load %arg2[%c1_11, %c0_12, %c0_13] : memref<5x128x256xbf16, #tpu.memory_space<vmem>>, vector<1x128x256xbf16>
    %14 = vector.shape_cast %13 : vector<1x128x256xbf16> to vector<128x256xbf16>
    %cst_14 = arith.constant dense<0.000000e+00> : vector<28x256xf32>
    %15 = tpu.matmul %12, %14, %cst_14 {dimension_numbers = #tpu.dot_dimension_numbers<[1], [0], [0], [1], [0, 0, 1, 1], [], []>} : vector<28x128xbf16>, vector<128x256xbf16>, vector<28x256xf32> -> vector<28x256xf32>
    %16 = arith.addf %9, %15 : vector<28x256xf32>
    %c0_15 = arith.constant 0 : index
    %c2 = arith.constant 2 : index
    %c0_16 = arith.constant 0 : index
    %17 = vector.load %arg1[%c0_15, %c2, %c0_16] : memref<4x32x128xf32, #tpu.memory_space<vmem>>, vector<1x28x128xf32>
    %18 = vector.shape_cast %17 : vector<1x28x128xf32> to vector<28x128xf32>
    %19 = arith.truncf %18 : vector<28x128xf32> to vector<28x128xbf16>
    %c2_17 = arith.constant 2 : index
    %c0_18 = arith.constant 0 : index
    %c0_19 = arith.constant 0 : index
    %20 = vector.load %arg2[%c2_17, %c0_18, %c0_19] : memref<5x128x256xbf16, #tpu.memory_space<vmem>>, vector<1x128x256xbf16>
    %21 = vector.shape_cast %20 : vector<1x128x256xbf16> to vector<128x256xbf16>
    %cst_20 = arith.constant dense<0.000000e+00> : vector<28x256xf32>
    %22 = tpu.matmul %19, %21, %cst_20 {dimension_numbers = #tpu.dot_dimension_numbers<[1], [0], [0], [1], [0, 0, 1, 1], [], []>} : vector<28x128xbf16>, vector<128x256xbf16>, vector<28x256xf32> -> vector<28x256xf32>
    %23 = arith.addf %16, %22 : vector<28x256xf32>
    %c0_21 = arith.constant 0 : index
    %c3 = arith.constant 3 : index
    %c0_22 = arith.constant 0 : index
    %24 = vector.load %arg1[%c0_21, %c3, %c0_22] : memref<4x32x128xf32, #tpu.memory_space<vmem>>, vector<1x28x128xf32>
    %25 = vector.shape_cast %24 : vector<1x28x128xf32> to vector<28x128xf32>
    %26 = arith.truncf %25 : vector<28x128xf32> to vector<28x128xbf16>
    %c3_23 = arith.constant 3 : index
    %c0_24 = arith.constant 0 : index
    %c0_25 = arith.constant 0 : index
    %27 = vector.load %arg2[%c3_23, %c0_24, %c0_25] : memref<5x128x256xbf16, #tpu.memory_space<vmem>>, vector<1x128x256xbf16>
    %28 = vector.shape_cast %27 : vector<1x128x256xbf16> to vector<128x256xbf16>
    %cst_26 = arith.constant dense<0.000000e+00> : vector<28x256xf32>
    %29 = tpu.matmul %26, %28, %cst_26 {dimension_numbers = #tpu.dot_dimension_numbers<[1], [0], [0], [1], [0, 0, 1, 1], [], []>} : vector<28x128xbf16>, vector<128x256xbf16>, vector<28x256xf32> -> vector<28x256xf32>
    %30 = arith.addf %23, %29 : vector<28x256xf32>
    %c0_27 = arith.constant 0 : index
    %c4 = arith.constant 4 : index
    %c0_28 = arith.constant 0 : index
    %31 = vector.load %arg1[%c0_27, %c4, %c0_28] : memref<4x32x128xf32, #tpu.memory_space<vmem>>, vector<1x28x128xf32>
    %32 = vector.shape_cast %31 : vector<1x28x128xf32> to vector<28x128xf32>
    %33 = arith.truncf %32 : vector<28x128xf32> to vector<28x128xbf16>
    %c4_29 = arith.constant 4 : index
    %c0_30 = arith.constant 0 : index
    %c0_31 = arith.constant 0 : index
    %34 = vector.load %arg2[%c4_29, %c0_30, %c0_31] : memref<5x128x256xbf16, #tpu.memory_space<vmem>>, vector<1x128x256xbf16>
    %35 = vector.shape_cast %34 : vector<1x128x256xbf16> to vector<128x256xbf16>
    %cst_32 = arith.constant dense<0.000000e+00> : vector<28x256xf32>
    %36 = tpu.matmul %33, %35, %cst_32 {dimension_numbers = #tpu.dot_dimension_numbers<[1], [0], [0], [1], [0, 0, 1, 1], [], []>} : vector<28x128xbf16>, vector<128x256xbf16>, vector<28x256xf32> -> vector<28x256xf32>
    %37 = arith.addf %30, %36 : vector<28x256xf32>
    %38 = vector.extract_strided_slice %37 {offsets = [0, 0], sizes = [28, 128], strides = [1, 1]} : vector<28x256xf32> to vector<28x128xf32>
    %39 = vector.extract_strided_slice %37 {offsets = [0, 128], sizes = [28, 128], strides = [1, 1]} : vector<28x256xf32> to vector<28x128xf32>
    %40 = arith.maximumf %38, %39 : vector<28x128xf32>
    %c0_33 = arith.constant 0 : index
    %c0_34 = arith.constant 0 : index
    %41 = vector.load %arg3[%c0_33, %c0_34] : memref<1x128xf32, #tpu.memory_space<vmem>>, vector<1x128xf32>
    %42 = vector.broadcast %41 : vector<1x128xf32> to vector<28x128xf32>
    %43 = arith.addf %40, %42 : vector<28x128xf32>
    %cst_35 = arith.constant 0.000000e+00 : f32
    %44 = vector.broadcast %cst_35 : f32 to vector<28x128xf32>
    %45 = arith.maximumf %43, %44 : vector<28x128xf32>
    %46 = vector.extract_strided_slice %45 {offsets = [0, 0], sizes = [27, 128], strides = [1, 1]} : vector<28x128xf32> to vector<27x128xf32>
    %47 = vector.extract_strided_slice %45 {offsets = [1, 0], sizes = [27, 128], strides = [1, 1]} : vector<28x128xf32> to vector<27x128xf32>
    %48 = arith.maximumf %46, %47 : vector<27x128xf32>
    %cst_36 = arith.constant 0.000000e+00 : f32
    %49 = vector.broadcast %cst_36 : f32 to vector<19x256xf32>
    %50 = vector.extract_strided_slice %48 {offsets = [0, 0], sizes = [19, 128], strides = [1, 1]} : vector<27x128xf32> to vector<19x128xf32>
    %51 = arith.truncf %50 : vector<19x128xf32> to vector<19x128xbf16>
    %c0_37 = arith.constant 0 : index
    %c0_38 = arith.constant 0 : index
    %c0_39 = arith.constant 0 : index
    %52 = vector.load %arg4[%c0_37, %c0_38, %c0_39] : memref<5x128x256xbf16, #tpu.memory_space<vmem>>, vector<1x128x256xbf16>
    %53 = vector.shape_cast %52 : vector<1x128x256xbf16> to vector<128x256xbf16>
    %cst_40 = arith.constant dense<0.000000e+00> : vector<19x256xf32>
    %54 = tpu.matmul %51, %53, %cst_40 {dimension_numbers = #tpu.dot_dimension_numbers<[1], [0], [0], [1], [0, 0, 1, 1], [], []>} : vector<19x128xbf16>, vector<128x256xbf16>, vector<19x256xf32> -> vector<19x256xf32>
    %55 = arith.addf %49, %54 : vector<19x256xf32>
    %56 = vector.extract_strided_slice %48 {offsets = [2, 0], sizes = [19, 128], strides = [1, 1]} : vector<27x128xf32> to vector<19x128xf32>
    %57 = arith.truncf %56 : vector<19x128xf32> to vector<19x128xbf16>
    %c1_41 = arith.constant 1 : index
    %c0_42 = arith.constant 0 : index
    %c0_43 = arith.constant 0 : index
    %58 = vector.load %arg4[%c1_41, %c0_42, %c0_43] : memref<5x128x256xbf16, #tpu.memory_space<vmem>>, vector<1x128x256xbf16>
    %59 = vector.shape_cast %58 : vector<1x128x256xbf16> to vector<128x256xbf16>
    %cst_44 = arith.constant dense<0.000000e+00> : vector<19x256xf32>
    %60 = tpu.matmul %57, %59, %cst_44 {dimension_numbers = #tpu.dot_dimension_numbers<[1], [0], [0], [1], [0, 0, 1, 1], [], []>} : vector<19x128xbf16>, vector<128x256xbf16>, vector<19x256xf32> -> vector<19x256xf32>
    %61 = arith.addf %55, %60 : vector<19x256xf32>
    %62 = vector.extract_strided_slice %48 {offsets = [4, 0], sizes = [19, 128], strides = [1, 1]} : vector<27x128xf32> to vector<19x128xf32>
    %63 = arith.truncf %62 : vector<19x128xf32> to vector<19x128xbf16>
    %c2_45 = arith.constant 2 : index
    %c0_46 = arith.constant 0 : index
    %c0_47 = arith.constant 0 : index
    %64 = vector.load %arg4[%c2_45, %c0_46, %c0_47] : memref<5x128x256xbf16, #tpu.memory_space<vmem>>, vector<1x128x256xbf16>
    %65 = vector.shape_cast %64 : vector<1x128x256xbf16> to vector<128x256xbf16>
    %cst_48 = arith.constant dense<0.000000e+00> : vector<19x256xf32>
    %66 = tpu.matmul %63, %65, %cst_48 {dimension_numbers = #tpu.dot_dimension_numbers<[1], [0], [0], [1], [0, 0, 1, 1], [], []>} : vector<19x128xbf16>, vector<128x256xbf16>, vector<19x256xf32> -> vector<19x256xf32>
    %67 = arith.addf %61, %66 : vector<19x256xf32>
    %68 = vector.extract_strided_slice %48 {offsets = [6, 0], sizes = [19, 128], strides = [1, 1]} : vector<27x128xf32> to vector<19x128xf32>
    %69 = arith.truncf %68 : vector<19x128xf32> to vector<19x128xbf16>
    %c3_49 = arith.constant 3 : index
    %c0_50 = arith.constant 0 : index
    %c0_51 = arith.constant 0 : index
    %70 = vector.load %arg4[%c3_49, %c0_50, %c0_51] : memref<5x128x256xbf16, #tpu.memory_space<vmem>>, vector<1x128x256xbf16>
    %71 = vector.shape_cast %70 : vector<1x128x256xbf16> to vector<128x256xbf16>
    %cst_52 = arith.constant dense<0.000000e+00> : vector<19x256xf32>
    %72 = tpu.matmul %69, %71, %cst_52 {dimension_numbers = #tpu.dot_dimension_numbers<[1], [0], [0], [1], [0, 0, 1, 1], [], []>} : vector<19x128xbf16>, vector<128x256xbf16>, vector<19x256xf32> -> vector<19x256xf32>
    %73 = arith.addf %67, %72 : vector<19x256xf32>
    %74 = vector.extract_strided_slice %48 {offsets = [8, 0], sizes = [19, 128], strides = [1, 1]} : vector<27x128xf32> to vector<19x128xf32>
    %75 = arith.truncf %74 : vector<19x128xf32> to vector<19x128xbf16>
    %c4_53 = arith.constant 4 : index
    %c0_54 = arith.constant 0 : index
    %c0_55 = arith.constant 0 : index
    %76 = vector.load %arg4[%c4_53, %c0_54, %c0_55] : memref<5x128x256xbf16, #tpu.memory_space<vmem>>, vector<1x128x256xbf16>
    %77 = vector.shape_cast %76 : vector<1x128x256xbf16> to vector<128x256xbf16>
    %cst_56 = arith.constant dense<0.000000e+00> : vector<19x256xf32>
    %78 = tpu.matmul %75, %77, %cst_56 {dimension_numbers = #tpu.dot_dimension_numbers<[1], [0], [0], [1], [0, 0, 1, 1], [], []>} : vector<19x128xbf16>, vector<128x256xbf16>, vector<19x256xf32> -> vector<19x256xf32>
    %79 = arith.addf %73, %78 : vector<19x256xf32>
    %80 = vector.extract_strided_slice %79 {offsets = [0, 0], sizes = [19, 128], strides = [1, 1]} : vector<19x256xf32> to vector<19x128xf32>
    %81 = vector.extract_strided_slice %79 {offsets = [0, 128], sizes = [19, 128], strides = [1, 1]} : vector<19x256xf32> to vector<19x128xf32>
    %82 = arith.maximumf %80, %81 : vector<19x128xf32>
    %c0_57 = arith.constant 0 : index
    %c0_58 = arith.constant 0 : index
    %83 = vector.load %arg5[%c0_57, %c0_58] : memref<1x128xf32, #tpu.memory_space<vmem>>, vector<1x128xf32>
    %84 = vector.broadcast %83 : vector<1x128xf32> to vector<19x128xf32>
    %85 = arith.addf %82, %84 : vector<19x128xf32>
    %cst_59 = arith.constant 0.000000e+00 : f32
    %86 = vector.broadcast %cst_59 : f32 to vector<19x128xf32>
    %87 = arith.maximumf %85, %86 : vector<19x128xf32>
    %88 = vector.extract_strided_slice %87 {offsets = [0, 0], sizes = [17, 128], strides = [1, 1]} : vector<19x128xf32> to vector<17x128xf32>
    %89 = vector.extract_strided_slice %87 {offsets = [2, 0], sizes = [17, 128], strides = [1, 1]} : vector<19x128xf32> to vector<17x128xf32>
    %90 = arith.maximumf %88, %89 : vector<17x128xf32>
    %91 = vector.extract_strided_slice %90 {offsets = [0, 0], sizes = [1, 128], strides = [1, 1]} : vector<17x128xf32> to vector<1x128xf32>
    %c0_60 = arith.constant 0 : index
    %c0_61 = arith.constant 0 : index
    %92 = vector.load %arg13[%c0_60, %c0_61] : memref<8x640xf32, #tpu.memory_space<vmem>>, vector<1x128xf32>
    tpu.vector_store %arg13[%c0_60, %c0_61], %91 {strides = array<i32>} : memref<8x640xf32, #tpu.memory_space<vmem>>, vector<1x128xf32>,
    %93 = vector.extract_strided_slice %90 {offsets = [4, 0], sizes = [1, 128], strides = [1, 1]} : vector<17x128xf32> to vector<1x128xf32>
    %c0_62 = arith.constant 0 : index
    %c128 = arith.constant 128 : index
    %94 = vector.load %arg13[%c0_62, %c128] : memref<8x640xf32, #tpu.memory_space<vmem>>, vector<1x128xf32>
    tpu.vector_store %arg13[%c0_62, %c128], %93 {strides = array<i32>} : memref<8x640xf32, #tpu.memory_space<vmem>>, vector<1x128xf32>,
    %95 = vector.extract_strided_slice %90 {offsets = [8, 0], sizes = [1, 128], strides = [1, 1]} : vector<17x128xf32> to vector<1x128xf32>
    %c0_63 = arith.constant 0 : index
    %c256 = arith.constant 256 : index
    %96 = vector.load %arg13[%c0_63, %c256] : memref<8x640xf32, #tpu.memory_space<vmem>>, vector<1x128xf32>
    tpu.vector_store %arg13[%c0_63, %c256], %95 {strides = array<i32>} : memref<8x640xf32, #tpu.memory_space<vmem>>, vector<1x128xf32>,
    %97 = vector.extract_strided_slice %90 {offsets = [12, 0], sizes = [1, 128], strides = [1, 1]} : vector<17x128xf32> to vector<1x128xf32>
    %c0_64 = arith.constant 0 : index
    %c384 = arith.constant 384 : index
    %98 = vector.load %arg13[%c0_64, %c384] : memref<8x640xf32, #tpu.memory_space<vmem>>, vector<1x128xf32>
    tpu.vector_store %arg13[%c0_64, %c384], %97 {strides = array<i32>} : memref<8x640xf32, #tpu.memory_space<vmem>>, vector<1x128xf32>,
    %99 = vector.extract_strided_slice %90 {offsets = [16, 0], sizes = [1, 128], strides = [1, 1]} : vector<17x128xf32> to vector<1x128xf32>
    %c0_65 = arith.constant 0 : index
    %c512 = arith.constant 512 : index
    %100 = vector.load %arg13[%c0_65, %c512] : memref<8x640xf32, #tpu.memory_space<vmem>>, vector<1x128xf32>
    tpu.vector_store %arg13[%c0_65, %c512], %99 {strides = array<i32>} : memref<8x640xf32, #tpu.memory_space<vmem>>, vector<1x128xf32>,
    %cst_66 = arith.constant 0.000000e+00 : f32
    %101 = vector.broadcast %cst_66 : f32 to vector<28x256xf32>
    %c1_67 = arith.constant 1 : index
    %c0_68 = arith.constant 0 : index
    %c0_69 = arith.constant 0 : index
    %102 = vector.load %arg1[%c1_67, %c0_68, %c0_69] : memref<4x32x128xf32, #tpu.memory_space<vmem>>, vector<1x28x128xf32>
    %103 = vector.shape_cast %102 : vector<1x28x128xf32> to vector<28x128xf32>
    %104 = arith.truncf %103 : vector<28x128xf32> to vector<28x128xbf16>
    %c0_70 = arith.constant 0 : index
    %c0_71 = arith.constant 0 : index
    %c0_72 = arith.constant 0 : index
    %105 = vector.load %arg2[%c0_70, %c0_71, %c0_72] : memref<5x128x256xbf16, #tpu.memory_space<vmem>>, vector<1x128x256xbf16>
    %106 = vector.shape_cast %105 : vector<1x128x256xbf16> to vector<128x256xbf16>
    %cst_73 = arith.constant dense<0.000000e+00> : vector<28x256xf32>
    %107 = tpu.matmul %104, %106, %cst_73 {dimension_numbers = #tpu.dot_dimension_numbers<[1], [0], [0], [1], [0, 0, 1, 1], [], []>} : vector<28x128xbf16>, vector<128x256xbf16>, vector<28x256xf32> -> vector<28x256xf32>
    %108 = arith.addf %101, %107 : vector<28x256xf32>
    %c1_74 = arith.constant 1 : index
    %c1_75 = arith.constant 1 : index
    %c0_76 = arith.constant 0 : index
    %109 = vector.load %arg1[%c1_74, %c1_75, %c0_76] : memref<4x32x128xf32, #tpu.memory_space<vmem>>, vector<1x28x128xf32>
    %110 = vector.shape_cast %109 : vector<1x28x128xf32> to vector<28x128xf32>
    %111 = arith.truncf %110 : vector<28x128xf32> to vector<28x128xbf16>
    %c1_77 = arith.constant 1 : index
    %c0_78 = arith.constant 0 : index
    %c0_79 = arith.constant 0 : index
    %112 = vector.load %arg2[%c1_77, %c0_78, %c0_79] : memref<5x128x256xbf16, #tpu.memory_space<vmem>>, vector<1x128x256xbf16>
    %113 = vector.shape_cast %112 : vector<1x128x256xbf16> to vector<128x256xbf16>
    %cst_80 = arith.constant dense<0.000000e+00> : vector<28x256xf32>
    %114 = tpu.matmul %111, %113, %cst_80 {dimension_numbers = #tpu.dot_dimension_numbers<[1], [0], [0], [1], [0, 0, 1, 1], [], []>} : vector<28x128xbf16>, vector<128x256xbf16>, vector<28x256xf32> -> vector<28x256xf32>
    %115 = arith.addf %108, %114 : vector<28x256xf32>
    %c1_81 = arith.constant 1 : index
    %c2_82 = arith.constant 2 : index
    %c0_83 = arith.constant 0 : index
    %116 = vector.load %arg1[%c1_81, %c2_82, %c0_83] : memref<4x32x128xf32, #tpu.memory_space<vmem>>, vector<1x28x128xf32>
    %117 = vector.shape_cast %116 : vector<1x28x128xf32> to vector<28x128xf32>
    %118 = arith.truncf %117 : vector<28x128xf32> to vector<28x128xbf16>
    %c2_84 = arith.constant 2 : index
    %c0_85 = arith.constant 0 : index
    %c0_86 = arith.constant 0 : index
    %119 = vector.load %arg2[%c2_84, %c0_85, %c0_86] : memref<5x128x256xbf16, #tpu.memory_space<vmem>>, vector<1x128x256xbf16>
    %120 = vector.shape_cast %119 : vector<1x128x256xbf16> to vector<128x256xbf16>
    %cst_87 = arith.constant dense<0.000000e+00> : vector<28x256xf32>
    %121 = tpu.matmul %118, %120, %cst_87 {dimension_numbers = #tpu.dot_dimension_numbers<[1], [0], [0], [1], [0, 0, 1, 1], [], []>} : vector<28x128xbf16>, vector<128x256xbf16>, vector<28x256xf32> -> vector<28x256xf32>
    %122 = arith.addf %115, %121 : vector<28x256xf32>
    %c1_88 = arith.constant 1 : index
    %c3_89 = arith.constant 3 : index
    %c0_90 = arith.constant 0 : index
    %123 = vector.load %arg1[%c1_88, %c3_89, %c0_90] : memref<4x32x128xf32, #tpu.memory_space<vmem>>, vector<1x28x128xf32>
    %124 = vector.shape_cast %123 : vector<1x28x128xf32> to vector<28x128xf32>
    %125 = arith.truncf %124 : vector<28x128xf32> to vector<28x128xbf16>
    %c3_91 = arith.constant 3 : index
    %c0_92 = arith.constant 0 : index
    %c0_93 = arith.constant 0 : index
    %126 = vector.load %arg2[%c3_91, %c0_92, %c0_93] : memref<5x128x256xbf16, #tpu.memory_space<vmem>>, vector<1x128x256xbf16>
    %127 = vector.shape_cast %126 : vector<1x128x256xbf16> to vector<128x256xbf16>
    %cst_94 = arith.constant dense<0.000000e+00> : vector<28x256xf32>
    %128 = tpu.matmul %125, %127, %cst_94 {dimension_numbers = #tpu.dot_dimension_numbers<[1], [0], [0], [1], [0, 0, 1, 1], [], []>} : vector<28x128xbf16>, vector<128x256xbf16>, vector<28x256xf32> -> vector<28x256xf32>
    %129 = arith.addf %122, %128 : vector<28x256xf32>
    %c1_95 = arith.constant 1 : index
    %c4_96 = arith.constant 4 : index
    %c0_97 = arith.constant 0 : index
    %130 = vector.load %arg1[%c1_95, %c4_96, %c0_97] : memref<4x32x128xf32, #tpu.memory_space<vmem>>, vector<1x28x128xf32>
    %131 = vector.shape_cast %130 : vector<1x28x128xf32> to vector<28x128xf32>
    %132 = arith.truncf %131 : vector<28x128xf32> to vector<28x128xbf16>
    %c4_98 = arith.constant 4 : index
    %c0_99 = arith.constant 0 : index
    %c0_100 = arith.constant 0 : index
    %133 = vector.load %arg2[%c4_98, %c0_99, %c0_100] : memref<5x128x256xbf16, #tpu.memory_space<vmem>>, vector<1x128x256xbf16>
    %134 = vector.shape_cast %133 : vector<1x128x256xbf16> to vector<128x256xbf16>
    %cst_101 = arith.constant dense<0.000000e+00> : vector<28x256xf32>
    %135 = tpu.matmul %132, %134, %cst_101 {dimension_numbers = #tpu.dot_dimension_numbers<[1], [0], [0], [1], [0, 0, 1, 1], [], []>} : vector<28x128xbf16>, vector<128x256xbf16>, vector<28x256xf32> -> vector<28x256xf32>
    %136 = arith.addf %129, %135 : vector<28x256xf32>
    %137 = vector.extract_strided_slice %136 {offsets = [0, 0], sizes = [28, 128], strides = [1, 1]} : vector<28x256xf32> to vector<28x128xf32>
    %138 = vector.extract_strided_slice %136 {offsets = [0, 128], sizes = [28, 128], strides = [1, 1]} : vector<28x256xf32> to vector<28x128xf32>
    %139 = arith.maximumf %137, %138 : vector<28x128xf32>
    %c0_102 = arith.constant 0 : index
    %c0_103 = arith.constant 0 : index
    %140 = vector.load %arg3[%c0_102, %c0_103] : memref<1x128xf32, #tpu.memory_space<vmem>>, vector<1x128xf32>
    %141 = vector.broadcast %140 : vector<1x128xf32> to vector<28x128xf32>
    %142 = arith.addf %139, %141 : vector<28x128xf32>
    %cst_104 = arith.constant 0.000000e+00 : f32
    %143 = vector.broadcast %cst_104 : f32 to vector<28x128xf32>
    %144 = arith.maximumf %142, %143 : vector<28x128xf32>
    %145 = vector.extract_strided_slice %144 {offsets = [0, 0], sizes = [27, 128], strides = [1, 1]} : vector<28x128xf32> to vector<27x128xf32>
    %146 = vector.extract_strided_slice %144 {offsets = [1, 0], sizes = [27, 128], strides = [1, 1]} : vector<28x128xf32> to vector<27x128xf32>
    %147 = arith.maximumf %145, %146 : vector<27x128xf32>
    %cst_105 = arith.constant 0.000000e+00 : f32
    %148 = vector.broadcast %cst_105 : f32 to vector<19x256xf32>
    %149 = vector.extract_strided_slice %147 {offsets = [0, 0], sizes = [19, 128], strides = [1, 1]} : vector<27x128xf32> to vector<19x128xf32>
    %150 = arith.truncf %149 : vector<19x128xf32> to vector<19x128xbf16>
    %c0_106 = arith.constant 0 : index
    %c0_107 = arith.constant 0 : index
    %c0_108 = arith.constant 0 : index
    %151 = vector.load %arg4[%c0_106, %c0_107, %c0_108] : memref<5x128x256xbf16, #tpu.memory_space<vmem>>, vector<1x128x256xbf16>
    %152 = vector.shape_cast %151 : vector<1x128x256xbf16> to vector<128x256xbf16>
    %cst_109 = arith.constant dense<0.000000e+00> : vector<19x256xf32>
    %153 = tpu.matmul %150, %152, %cst_109 {dimension_numbers = #tpu.dot_dimension_numbers<[1], [0], [0], [1], [0, 0, 1, 1], [], []>} : vector<19x128xbf16>, vector<128x256xbf16>, vector<19x256xf32> -> vector<19x256xf32>
    %154 = arith.addf %148, %153 : vector<19x256xf32>
    %155 = vector.extract_strided_slice %147 {offsets = [2, 0], sizes = [19, 128], strides = [1, 1]} : vector<27x128xf32> to vector<19x128xf32>
    %156 = arith.truncf %155 : vector<19x128xf32> to vector<19x128xbf16>
    %c1_110 = arith.constant 1 : index
    %c0_111 = arith.constant 0 : index
    %c0_112 = arith.constant 0 : index
    %157 = vector.load %arg4[%c1_110, %c0_111, %c0_112] : memref<5x128x256xbf16, #tpu.memory_space<vmem>>, vector<1x128x256xbf16>
    %158 = vector.shape_cast %157 : vector<1x128x256xbf16> to vector<128x256xbf16>
    %cst_113 = arith.constant dense<0.000000e+00> : vector<19x256xf32>
    %159 = tpu.matmul %156, %158, %cst_113 {dimension_numbers = #tpu.dot_dimension_numbers<[1], [0], [0], [1], [0, 0, 1, 1], [], []>} : vector<19x128xbf16>, vector<128x256xbf16>, vector<19x256xf32> -> vector<19x256xf32>
    %160 = arith.addf %154, %159 : vector<19x256xf32>
    %161 = vector.extract_strided_slice %147 {offsets = [4, 0], sizes = [19, 128], strides = [1, 1]} : vector<27x128xf32> to vector<19x128xf32>
    %162 = arith.truncf %161 : vector<19x128xf32> to vector<19x128xbf16>
    %c2_114 = arith.constant 2 : index
    %c0_115 = arith.constant 0 : index
    %c0_116 = arith.constant 0 : index
    %163 = vector.load %arg4[%c2_114, %c0_115, %c0_116] : memref<5x128x256xbf16, #tpu.memory_space<vmem>>, vector<1x128x256xbf16>
    %164 = vector.shape_cast %163 : vector<1x128x256xbf16> to vector<128x256xbf16>
    %cst_117 = arith.constant dense<0.000000e+00> : vector<19x256xf32>
    %165 = tpu.matmul %162, %164, %cst_117 {dimension_numbers = #tpu.dot_dimension_numbers<[1], [0], [0], [1], [0, 0, 1, 1], [], []>} : vector<19x128xbf16>, vector<128x256xbf16>, vector<19x256xf32> -> vector<19x256xf32>
    %166 = arith.addf %160, %165 : vector<19x256xf32>
    %167 = vector.extract_strided_slice %147 {offsets = [6, 0], sizes = [19, 128], strides = [1, 1]} : vector<27x128xf32> to vector<19x128xf32>
    %168 = arith.truncf %167 : vector<19x128xf32> to vector<19x128xbf16>
    %c3_118 = arith.constant 3 : index
    %c0_119 = arith.constant 0 : index
    %c0_120 = arith.constant 0 : index
    %169 = vector.load %arg4[%c3_118, %c0_119, %c0_120] : memref<5x128x256xbf16, #tpu.memory_space<vmem>>, vector<1x128x256xbf16>
    %170 = vector.shape_cast %169 : vector<1x128x256xbf16> to vector<128x256xbf16>
    %cst_121 = arith.constant dense<0.000000e+00> : vector<19x256xf32>
    %171 = tpu.matmul %168, %170, %cst_121 {dimension_numbers = #tpu.dot_dimension_numbers<[1], [0], [0], [1], [0, 0, 1, 1], [], []>} : vector<19x128xbf16>, vector<128x256xbf16>, vector<19x256xf32> -> vector<19x256xf32>
    %172 = arith.addf %166, %171 : vector<19x256xf32>
    %173 = vector.extract_strided_slice %147 {offsets = [8, 0], sizes = [19, 128], strides = [1, 1]} : vector<27x128xf32> to vector<19x128xf32>
    %174 = arith.truncf %173 : vector<19x128xf32> to vector<19x128xbf16>
    %c4_122 = arith.constant 4 : index
    %c0_123 = arith.constant 0 : index
    %c0_124 = arith.constant 0 : index
    %175 = vector.load %arg4[%c4_122, %c0_123, %c0_124] : memref<5x128x256xbf16, #tpu.memory_space<vmem>>, vector<1x128x256xbf16>
    %176 = vector.shape_cast %175 : vector<1x128x256xbf16> to vector<128x256xbf16>
    %cst_125 = arith.constant dense<0.000000e+00> : vector<19x256xf32>
    %177 = tpu.matmul %174, %176, %cst_125 {dimension_numbers = #tpu.dot_dimension_numbers<[1], [0], [0], [1], [0, 0, 1, 1], [], []>} : vector<19x128xbf16>, vector<128x256xbf16>, vector<19x256xf32> -> vector<19x256xf32>
    %178 = arith.addf %172, %177 : vector<19x256xf32>
    %179 = vector.extract_strided_slice %178 {offsets = [0, 0], sizes = [19, 128], strides = [1, 1]} : vector<19x256xf32> to vector<19x128xf32>
    %180 = vector.extract_strided_slice %178 {offsets = [0, 128], sizes = [19, 128], strides = [1, 1]} : vector<19x256xf32> to vector<19x128xf32>
    %181 = arith.maximumf %179, %180 : vector<19x128xf32>
    %c0_126 = arith.constant 0 : index
    %c0_127 = arith.constant 0 : index
    %182 = vector.load %arg5[%c0_126, %c0_127] : memref<1x128xf32, #tpu.memory_space<vmem>>, vector<1x128xf32>
    %183 = vector.broadcast %182 : vector<1x128xf32> to vector<19x128xf32>
    %184 = arith.addf %181, %183 : vector<19x128xf32>
    %cst_128 = arith.constant 0.000000e+00 : f32
    %185 = vector.broadcast %cst_128 : f32 to vector<19x128xf32>
    %186 = arith.maximumf %184, %185 : vector<19x128xf32>
    %187 = vector.extract_strided_slice %186 {offsets = [0, 0], sizes = [17, 128], strides = [1, 1]} : vector<19x128xf32> to vector<17x128xf32>
    %188 = vector.extract_strided_slice %186 {offsets = [2, 0], sizes = [17, 128], strides = [1, 1]} : vector<19x128xf32> to vector<17x128xf32>
    %189 = arith.maximumf %187, %188 : vector<17x128xf32>
    %190 = vector.extract_strided_slice %189 {offsets = [0, 0], sizes = [1, 128], strides = [1, 1]} : vector<17x128xf32> to vector<1x128xf32>
    %c1_129 = arith.constant 1 : index
    %c0_130 = arith.constant 0 : index
    %191 = vector.load %arg13[%c1_129, %c0_130] : memref<8x640xf32, #tpu.memory_space<vmem>>, vector<1x128xf32>
    tpu.vector_store %arg13[%c1_129, %c0_130], %190 {strides = array<i32>} : memref<8x640xf32, #tpu.memory_space<vmem>>, vector<1x128xf32>,
    %192 = vector.extract_strided_slice %189 {offsets = [4, 0], sizes = [1, 128], strides = [1, 1]} : vector<17x128xf32> to vector<1x128xf32>
    %c1_131 = arith.constant 1 : index
    %c128_132 = arith.constant 128 : index
    %193 = vector.load %arg13[%c1_131, %c128_132] : memref<8x640xf32, #tpu.memory_space<vmem>>, vector<1x128xf32>
    tpu.vector_store %arg13[%c1_131, %c128_132], %192 {strides = array<i32>} : memref<8x640xf32, #tpu.memory_space<vmem>>, vector<1x128xf32>,
    %194 = vector.extract_strided_slice %189 {offsets = [8, 0], sizes = [1, 128], strides = [1, 1]} : vector<17x128xf32> to vector<1x128xf32>
    %c1_133 = arith.constant 1 : index
    %c256_134 = arith.constant 256 : index
    %195 = vector.load %arg13[%c1_133, %c256_134] : memref<8x640xf32, #tpu.memory_space<vmem>>, vector<1x128xf32>
    tpu.vector_store %arg13[%c1_133, %c256_134], %194 {strides = array<i32>} : memref<8x640xf32, #tpu.memory_space<vmem>>, vector<1x128xf32>,
    %196 = vector.extract_strided_slice %189 {offsets = [12, 0], sizes = [1, 128], strides = [1, 1]} : vector<17x128xf32> to vector<1x128xf32>
    %c1_135 = arith.constant 1 : index
    %c384_136 = arith.constant 384 : index
    %197 = vector.load %arg13[%c1_135, %c384_136] : memref<8x640xf32, #tpu.memory_space<vmem>>, vector<1x128xf32>
    tpu.vector_store %arg13[%c1_135, %c384_136], %196 {strides = array<i32>} : memref<8x640xf32, #tpu.memory_space<vmem>>, vector<1x128xf32>,
    %198 = vector.extract_strided_slice %189 {offsets = [16, 0], sizes = [1, 128], strides = [1, 1]} : vector<17x128xf32> to vector<1x128xf32>
    %c1_137 = arith.constant 1 : index
    %c512_138 = arith.constant 512 : index
    %199 = vector.load %arg13[%c1_137, %c512_138] : memref<8x640xf32, #tpu.memory_space<vmem>>, vector<1x128xf32>
    tpu.vector_store %arg13[%c1_137, %c512_138], %198 {strides = array<i32>} : memref<8x640xf32, #tpu.memory_space<vmem>>, vector<1x128xf32>,
    %cst_139 = arith.constant 0.000000e+00 : f32
    %200 = vector.broadcast %cst_139 : f32 to vector<28x256xf32>
    %c2_140 = arith.constant 2 : index
    %c0_141 = arith.constant 0 : index
    %c0_142 = arith.constant 0 : index
    %201 = vector.load %arg1[%c2_140, %c0_141, %c0_142] : memref<4x32x128xf32, #tpu.memory_space<vmem>>, vector<1x28x128xf32>
    %202 = vector.shape_cast %201 : vector<1x28x128xf32> to vector<28x128xf32>
    %203 = arith.truncf %202 : vector<28x128xf32> to vector<28x128xbf16>
    %c0_143 = arith.constant 0 : index
    %c0_144 = arith.constant 0 : index
    %c0_145 = arith.constant 0 : index
    %204 = vector.load %arg2[%c0_143, %c0_144, %c0_145] : memref<5x128x256xbf16, #tpu.memory_space<vmem>>, vector<1x128x256xbf16>
    %205 = vector.shape_cast %204 : vector<1x128x256xbf16> to vector<128x256xbf16>
    %cst_146 = arith.constant dense<0.000000e+00> : vector<28x256xf32>
    %206 = tpu.matmul %203, %205, %cst_146 {dimension_numbers = #tpu.dot_dimension_numbers<[1], [0], [0], [1], [0, 0, 1, 1], [], []>} : vector<28x128xbf16>, vector<128x256xbf16>, vector<28x256xf32> -> vector<28x256xf32>
    %207 = arith.addf %200, %206 : vector<28x256xf32>
    %c2_147 = arith.constant 2 : index
    %c1_148 = arith.constant 1 : index
    %c0_149 = arith.constant 0 : index
    %208 = vector.load %arg1[%c2_147, %c1_148, %c0_149] : memref<4x32x128xf32, #tpu.memory_space<vmem>>, vector<1x28x128xf32>
    %209 = vector.shape_cast %208 : vector<1x28x128xf32> to vector<28x128xf32>
    %210 = arith.truncf %209 : vector<28x128xf32> to vector<28x128xbf16>
    %c1_150 = arith.constant 1 : index
    %c0_151 = arith.constant 0 : index
    %c0_152 = arith.constant 0 : index
    %211 = vector.load %arg2[%c1_150, %c0_151, %c0_152] : memref<5x128x256xbf16, #tpu.memory_space<vmem>>, vector<1x128x256xbf16>
    %212 = vector.shape_cast %211 : vector<1x128x256xbf16> to vector<128x256xbf16>
    %cst_153 = arith.constant dense<0.000000e+00> : vector<28x256xf32>
    %213 = tpu.matmul %210, %212, %cst_153 {dimension_numbers = #tpu.dot_dimension_numbers<[1], [0], [0], [1], [0, 0, 1, 1], [], []>} : vector<28x128xbf16>, vector<128x256xbf16>, vector<28x256xf32> -> vector<28x256xf32>
    %214 = arith.addf %207, %213 : vector<28x256xf32>
    %c2_154 = arith.constant 2 : index
    %c2_155 = arith.constant 2 : index
    %c0_156 = arith.constant 0 : index
    %215 = vector.load %arg1[%c2_154, %c2_155, %c0_156] : memref<4x32x128xf32, #tpu.memory_space<vmem>>, vector<1x28x128xf32>
    %216 = vector.shape_cast %215 : vector<1x28x128xf32> to vector<28x128xf32>
    %217 = arith.truncf %216 : vector<28x128xf32> to vector<28x128xbf16>
    %c2_157 = arith.constant 2 : index
    %c0_158 = arith.constant 0 : index
    %c0_159 = arith.constant 0 : index
    %218 = vector.load %arg2[%c2_157, %c0_158, %c0_159] : memref<5x128x256xbf16, #tpu.memory_space<vmem>>, vector<1x128x256xbf16>
    %219 = vector.shape_cast %218 : vector<1x128x256xbf16> to vector<128x256xbf16>
    %cst_160 = arith.constant dense<0.000000e+00> : vector<28x256xf32>
    %220 = tpu.matmul %217, %219, %cst_160 {dimension_numbers = #tpu.dot_dimension_numbers<[1], [0], [0], [1], [0, 0, 1, 1], [], []>} : vector<28x128xbf16>, vector<128x256xbf16>, vector<28x256xf32> -> vector<28x256xf32>
    %221 = arith.addf %214, %220 : vector<28x256xf32>
    %c2_161 = arith.constant 2 : index
    %c3_162 = arith.constant 3 : index
    %c0_163 = arith.constant 0 : index
    %222 = vector.load %arg1[%c2_161, %c3_162, %c0_163] : memref<4x32x128xf32, #tpu.memory_space<vmem>>, vector<1x28x128xf32>
    %223 = vector.shape_cast %222 : vector<1x28x128xf32> to vector<28x128xf32>
    %224 = arith.truncf %223 : vector<28x128xf32> to vector<28x128xbf16>
    %c3_164 = arith.constant 3 : index
    %c0_165 = arith.constant 0 : index
    %c0_166 = arith.constant 0 : index
    %225 = vector.load %arg2[%c3_164, %c0_165, %c0_166] : memref<5x128x256xbf16, #tpu.memory_space<vmem>>, vector<1x128x256xbf16>
    %226 = vector.shape_cast %225 : vector<1x128x256xbf16> to vector<128x256xbf16>
    %cst_167 = arith.constant dense<0.000000e+00> : vector<28x256xf32>
    %227 = tpu.matmul %224, %226, %cst_167 {dimension_numbers = #tpu.dot_dimension_numbers<[1], [0], [0], [1], [0, 0, 1, 1], [], []>} : vector<28x128xbf16>, vector<128x256xbf16>, vector<28x256xf32> -> vector<28x256xf32>
    %228 = arith.addf %221, %227 : vector<28x256xf32>
    %c2_168 = arith.constant 2 : index
    %c4_169 = arith.constant 4 : index
    %c0_170 = arith.constant 0 : index
    %229 = vector.load %arg1[%c2_168, %c4_169, %c0_170] : memref<4x32x128xf32, #tpu.memory_space<vmem>>, vector<1x28x128xf32>
    %230 = vector.shape_cast %229 : vector<1x28x128xf32> to vector<28x128xf32>
    %231 = arith.truncf %230 : vector<28x128xf32> to vector<28x128xbf16>
    %c4_171 = arith.constant 4 : index
    %c0_172 = arith.constant 0 : index
    %c0_173 = arith.constant 0 : index
    %232 = vector.load %arg2[%c4_171, %c0_172, %c0_173] : memref<5x128x256xbf16, #tpu.memory_space<vmem>>, vector<1x128x256xbf16>
    %233 = vector.shape_cast %232 : vector<1x128x256xbf16> to vector<128x256xbf16>
    %cst_174 = arith.constant dense<0.000000e+00> : vector<28x256xf32>
    %234 = tpu.matmul %231, %233, %cst_174 {dimension_numbers = #tpu.dot_dimension_numbers<[1], [0], [0], [1], [0, 0, 1, 1], [], []>} : vector<28x128xbf16>, vector<128x256xbf16>, vector<28x256xf32> -> vector<28x256xf32>
    %235 = arith.addf %228, %234 : vector<28x256xf32>
    %236 = vector.extract_strided_slice %235 {offsets = [0, 0], sizes = [28, 128], strides = [1, 1]} : vector<28x256xf32> to vector<28x128xf32>
    %237 = vector.extract_strided_slice %235 {offsets = [0, 128], sizes = [28, 128], strides = [1, 1]} : vector<28x256xf32> to vector<28x128xf32>
    %238 = arith.maximumf %236, %237 : vector<28x128xf32>
    %c0_175 = arith.constant 0 : index
    %c0_176 = arith.constant 0 : index
    %239 = vector.load %arg3[%c0_175, %c0_176] : memref<1x128xf32, #tpu.memory_space<vmem>>, vector<1x128xf32>
    %240 = vector.broadcast %239 : vector<1x128xf32> to vector<28x128xf32>
    %241 = arith.addf %238, %240 : vector<28x128xf32>
    %cst_177 = arith.constant 0.000000e+00 : f32
    %242 = vector.broadcast %cst_177 : f32 to vector<28x128xf32>
    %243 = arith.maximumf %241, %242 : vector<28x128xf32>
    %244 = vector.extract_strided_slice %243 {offsets = [0, 0], sizes = [27, 128], strides = [1, 1]} : vector<28x128xf32> to vector<27x128xf32>
    %245 = vector.extract_strided_slice %243 {offsets = [1, 0], sizes = [27, 128], strides = [1, 1]} : vector<28x128xf32> to vector<27x128xf32>
    %246 = arith.maximumf %244, %245 : vector<27x128xf32>
    %cst_178 = arith.constant 0.000000e+00 : f32
    %247 = vector.broadcast %cst_178 : f32 to vector<19x256xf32>
    %248 = vector.extract_strided_slice %246 {offsets = [0, 0], sizes = [19, 128], strides = [1, 1]} : vector<27x128xf32> to vector<19x128xf32>
    %249 = arith.truncf %248 : vector<19x128xf32> to vector<19x128xbf16>
    %c0_179 = arith.constant 0 : index
    %c0_180 = arith.constant 0 : index
    %c0_181 = arith.constant 0 : index
    %250 = vector.load %arg4[%c0_179, %c0_180, %c0_181] : memref<5x128x256xbf16, #tpu.memory_space<vmem>>, vector<1x128x256xbf16>
    %251 = vector.shape_cast %250 : vector<1x128x256xbf16> to vector<128x256xbf16>
    %cst_182 = arith.constant dense<0.000000e+00> : vector<19x256xf32>
    %252 = tpu.matmul %249, %251, %cst_182 {dimension_numbers = #tpu.dot_dimension_numbers<[1], [0], [0], [1], [0, 0, 1, 1], [], []>} : vector<19x128xbf16>, vector<128x256xbf16>, vector<19x256xf32> -> vector<19x256xf32>
    %253 = arith.addf %247, %252 : vector<19x256xf32>
    %254 = vector.extract_strided_slice %246 {offsets = [2, 0], sizes = [19, 128], strides = [1, 1]} : vector<27x128xf32> to vector<19x128xf32>
    %255 = arith.truncf %254 : vector<19x128xf32> to vector<19x128xbf16>
    %c1_183 = arith.constant 1 : index
    %c0_184 = arith.constant 0 : index
    %c0_185 = arith.constant 0 : index
    %256 = vector.load %arg4[%c1_183, %c0_184, %c0_185] : memref<5x128x256xbf16, #tpu.memory_space<vmem>>, vector<1x128x256xbf16>
    %257 = vector.shape_cast %256 : vector<1x128x256xbf16> to vector<128x256xbf16>
    %cst_186 = arith.constant dense<0.000000e+00> : vector<19x256xf32>
    %258 = tpu.matmul %255, %257, %cst_186 {dimension_numbers = #tpu.dot_dimension_numbers<[1], [0], [0], [1], [0, 0, 1, 1], [], []>} : vector<19x128xbf16>, vector<128x256xbf16>, vector<19x256xf32> -> vector<19x256xf32>
    %259 = arith.addf %253, %258 : vector<19x256xf32>
    %260 = vector.extract_strided_slice %246 {offsets = [4, 0], sizes = [19, 128], strides = [1, 1]} : vector<27x128xf32> to vector<19x128xf32>
    %261 = arith.truncf %260 : vector<19x128xf32> to vector<19x128xbf16>
    %c2_187 = arith.constant 2 : index
    %c0_188 = arith.constant 0 : index
    %c0_189 = arith.constant 0 : index
    %262 = vector.load %arg4[%c2_187, %c0_188, %c0_189] : memref<5x128x256xbf16, #tpu.memory_space<vmem>>, vector<1x128x256xbf16>
    %263 = vector.shape_cast %262 : vector<1x128x256xbf16> to vector<128x256xbf16>
    %cst_190 = arith.constant dense<0.000000e+00> : vector<19x256xf32>
    %264 = tpu.matmul %261, %263, %cst_190 {dimension_numbers = #tpu.dot_dimension_numbers<[1], [0], [0], [1], [0, 0, 1, 1], [], []>} : vector<19x128xbf16>, vector<128x256xbf16>, vector<19x256xf32> -> vector<19x256xf32>
    %265 = arith.addf %259, %264 : vector<19x256xf32>
    %266 = vector.extract_strided_slice %246 {offsets = [6, 0], sizes = [19, 128], strides = [1, 1]} : vector<27x128xf32> to vector<19x128xf32>
    %267 = arith.truncf %266 : vector<19x128xf32> to vector<19x128xbf16>
    %c3_191 = arith.constant 3 : index
    %c0_192 = arith.constant 0 : index
    %c0_193 = arith.constant 0 : index
    %268 = vector.load %arg4[%c3_191, %c0_192, %c0_193] : memref<5x128x256xbf16, #tpu.memory_space<vmem>>, vector<1x128x256xbf16>
    %269 = vector.shape_cast %268 : vector<1x128x256xbf16> to vector<128x256xbf16>
    %cst_194 = arith.constant dense<0.000000e+00> : vector<19x256xf32>
    %270 = tpu.matmul %267, %269, %cst_194 {dimension_numbers = #tpu.dot_dimension_numbers<[1], [0], [0], [1], [0, 0, 1, 1], [], []>} : vector<19x128xbf16>, vector<128x256xbf16>, vector<19x256xf32> -> vector<19x256xf32>
    %271 = arith.addf %265, %270 : vector<19x256xf32>
    %272 = vector.extract_strided_slice %246 {offsets = [8, 0], sizes = [19, 128], strides = [1, 1]} : vector<27x128xf32> to vector<19x128xf32>
    %273 = arith.truncf %272 : vector<19x128xf32> to vector<19x128xbf16>
    %c4_195 = arith.constant 4 : index
    %c0_196 = arith.constant 0 : index
    %c0_197 = arith.constant 0 : index
    %274 = vector.load %arg4[%c4_195, %c0_196, %c0_197] : memref<5x128x256xbf16, #tpu.memory_space<vmem>>, vector<1x128x256xbf16>
    %275 = vector.shape_cast %274 : vector<1x128x256xbf16> to vector<128x256xbf16>
    %cst_198 = arith.constant dense<0.000000e+00> : vector<19x256xf32>
    %276 = tpu.matmul %273, %275, %cst_198 {dimension_numbers = #tpu.dot_dimension_numbers<[1], [0], [0], [1], [0, 0, 1, 1], [], []>} : vector<19x128xbf16>, vector<128x256xbf16>, vector<19x256xf32> -> vector<19x256xf32>
    %277 = arith.addf %271, %276 : vector<19x256xf32>
    %278 = vector.extract_strided_slice %277 {offsets = [0, 0], sizes = [19, 128], strides = [1, 1]} : vector<19x256xf32> to vector<19x128xf32>
    %279 = vector.extract_strided_slice %277 {offsets = [0, 128], sizes = [19, 128], strides = [1, 1]} : vector<19x256xf32> to vector<19x128xf32>
    %280 = arith.maximumf %278, %279 : vector<19x128xf32>
    %c0_199 = arith.constant 0 : index
    %c0_200 = arith.constant 0 : index
    %281 = vector.load %arg5[%c0_199, %c0_200] : memref<1x128xf32, #tpu.memory_space<vmem>>, vector<1x128xf32>
    %282 = vector.broadcast %281 : vector<1x128xf32> to vector<19x128xf32>
    %283 = arith.addf %280, %282 : vector<19x128xf32>
    %cst_201 = arith.constant 0.000000e+00 : f32
    %284 = vector.broadcast %cst_201 : f32 to vector<19x128xf32>
    %285 = arith.maximumf %283, %284 : vector<19x128xf32>
    %286 = vector.extract_strided_slice %285 {offsets = [0, 0], sizes = [17, 128], strides = [1, 1]} : vector<19x128xf32> to vector<17x128xf32>
    %287 = vector.extract_strided_slice %285 {offsets = [2, 0], sizes = [17, 128], strides = [1, 1]} : vector<19x128xf32> to vector<17x128xf32>
    %288 = arith.maximumf %286, %287 : vector<17x128xf32>
    %289 = vector.extract_strided_slice %288 {offsets = [0, 0], sizes = [1, 128], strides = [1, 1]} : vector<17x128xf32> to vector<1x128xf32>
    %c2_202 = arith.constant 2 : index
    %c0_203 = arith.constant 0 : index
    %290 = vector.load %arg13[%c2_202, %c0_203] : memref<8x640xf32, #tpu.memory_space<vmem>>, vector<1x128xf32>
    tpu.vector_store %arg13[%c2_202, %c0_203], %289 {strides = array<i32>} : memref<8x640xf32, #tpu.memory_space<vmem>>, vector<1x128xf32>,
    %291 = vector.extract_strided_slice %288 {offsets = [4, 0], sizes = [1, 128], strides = [1, 1]} : vector<17x128xf32> to vector<1x128xf32>
    %c2_204 = arith.constant 2 : index
    %c128_205 = arith.constant 128 : index
    %292 = vector.load %arg13[%c2_204, %c128_205] : memref<8x640xf32, #tpu.memory_space<vmem>>, vector<1x128xf32>
    tpu.vector_store %arg13[%c2_204, %c128_205], %291 {strides = array<i32>} : memref<8x640xf32, #tpu.memory_space<vmem>>, vector<1x128xf32>,
    %293 = vector.extract_strided_slice %288 {offsets = [8, 0], sizes = [1, 128], strides = [1, 1]} : vector<17x128xf32> to vector<1x128xf32>
    %c2_206 = arith.constant 2 : index
    %c256_207 = arith.constant 256 : index
    %294 = vector.load %arg13[%c2_206, %c256_207] : memref<8x640xf32, #tpu.memory_space<vmem>>, vector<1x128xf32>
    tpu.vector_store %arg13[%c2_206, %c256_207], %293 {strides = array<i32>} : memref<8x640xf32, #tpu.memory_space<vmem>>, vector<1x128xf32>,
    %295 = vector.extract_strided_slice %288 {offsets = [12, 0], sizes = [1, 128], strides = [1, 1]} : vector<17x128xf32> to vector<1x128xf32>
    %c2_208 = arith.constant 2 : index
    %c384_209 = arith.constant 384 : index
    %296 = vector.load %arg13[%c2_208, %c384_209] : memref<8x640xf32, #tpu.memory_space<vmem>>, vector<1x128xf32>
    tpu.vector_store %arg13[%c2_208, %c384_209], %295 {strides = array<i32>} : memref<8x640xf32, #tpu.memory_space<vmem>>, vector<1x128xf32>,
    %297 = vector.extract_strided_slice %288 {offsets = [16, 0], sizes = [1, 128], strides = [1, 1]} : vector<17x128xf32> to vector<1x128xf32>
    %c2_210 = arith.constant 2 : index
    %c512_211 = arith.constant 512 : index
    %298 = vector.load %arg13[%c2_210, %c512_211] : memref<8x640xf32, #tpu.memory_space<vmem>>, vector<1x128xf32>
    tpu.vector_store %arg13[%c2_210, %c512_211], %297 {strides = array<i32>} : memref<8x640xf32, #tpu.memory_space<vmem>>, vector<1x128xf32>,
    %cst_212 = arith.constant 0.000000e+00 : f32
    %299 = vector.broadcast %cst_212 : f32 to vector<28x256xf32>
    %c3_213 = arith.constant 3 : index
    %c0_214 = arith.constant 0 : index
    %c0_215 = arith.constant 0 : index
    %300 = vector.load %arg1[%c3_213, %c0_214, %c0_215] : memref<4x32x128xf32, #tpu.memory_space<vmem>>, vector<1x28x128xf32>
    %301 = vector.shape_cast %300 : vector<1x28x128xf32> to vector<28x128xf32>
    %302 = arith.truncf %301 : vector<28x128xf32> to vector<28x128xbf16>
    %c0_216 = arith.constant 0 : index
    %c0_217 = arith.constant 0 : index
    %c0_218 = arith.constant 0 : index
    %303 = vector.load %arg2[%c0_216, %c0_217, %c0_218] : memref<5x128x256xbf16, #tpu.memory_space<vmem>>, vector<1x128x256xbf16>
    %304 = vector.shape_cast %303 : vector<1x128x256xbf16> to vector<128x256xbf16>
    %cst_219 = arith.constant dense<0.000000e+00> : vector<28x256xf32>
    %305 = tpu.matmul %302, %304, %cst_219 {dimension_numbers = #tpu.dot_dimension_numbers<[1], [0], [0], [1], [0, 0, 1, 1], [], []>} : vector<28x128xbf16>, vector<128x256xbf16>, vector<28x256xf32> -> vector<28x256xf32>
    %306 = arith.addf %299, %305 : vector<28x256xf32>
    %c3_220 = arith.constant 3 : index
    %c1_221 = arith.constant 1 : index
    %c0_222 = arith.constant 0 : index
    %307 = vector.load %arg1[%c3_220, %c1_221, %c0_222] : memref<4x32x128xf32, #tpu.memory_space<vmem>>, vector<1x28x128xf32>
    %308 = vector.shape_cast %307 : vector<1x28x128xf32> to vector<28x128xf32>
    %309 = arith.truncf %308 : vector<28x128xf32> to vector<28x128xbf16>
    %c1_223 = arith.constant 1 : index
    %c0_224 = arith.constant 0 : index
    %c0_225 = arith.constant 0 : index
    %310 = vector.load %arg2[%c1_223, %c0_224, %c0_225] : memref<5x128x256xbf16, #tpu.memory_space<vmem>>, vector<1x128x256xbf16>
    %311 = vector.shape_cast %310 : vector<1x128x256xbf16> to vector<128x256xbf16>
    %cst_226 = arith.constant dense<0.000000e+00> : vector<28x256xf32>
    %312 = tpu.matmul %309, %311, %cst_226 {dimension_numbers = #tpu.dot_dimension_numbers<[1], [0], [0], [1], [0, 0, 1, 1], [], []>} : vector<28x128xbf16>, vector<128x256xbf16>, vector<28x256xf32> -> vector<28x256xf32>
    %313 = arith.addf %306, %312 : vector<28x256xf32>
    %c3_227 = arith.constant 3 : index
    %c2_228 = arith.constant 2 : index
    %c0_229 = arith.constant 0 : index
    %314 = vector.load %arg1[%c3_227, %c2_228, %c0_229] : memref<4x32x128xf32, #tpu.memory_space<vmem>>, vector<1x28x128xf32>
    %315 = vector.shape_cast %314 : vector<1x28x128xf32> to vector<28x128xf32>
    %316 = arith.truncf %315 : vector<28x128xf32> to vector<28x128xbf16>
    %c2_230 = arith.constant 2 : index
    %c0_231 = arith.constant 0 : index
    %c0_232 = arith.constant 0 : index
    %317 = vector.load %arg2[%c2_230, %c0_231, %c0_232] : memref<5x128x256xbf16, #tpu.memory_space<vmem>>, vector<1x128x256xbf16>
    %318 = vector.shape_cast %317 : vector<1x128x256xbf16> to vector<128x256xbf16>
    %cst_233 = arith.constant dense<0.000000e+00> : vector<28x256xf32>
    %319 = tpu.matmul %316, %318, %cst_233 {dimension_numbers = #tpu.dot_dimension_numbers<[1], [0], [0], [1], [0, 0, 1, 1], [], []>} : vector<28x128xbf16>, vector<128x256xbf16>, vector<28x256xf32> -> vector<28x256xf32>
    %320 = arith.addf %313, %319 : vector<28x256xf32>
    %c3_234 = arith.constant 3 : index
    %c3_235 = arith.constant 3 : index
    %c0_236 = arith.constant 0 : index
    %321 = vector.load %arg1[%c3_234, %c3_235, %c0_236] : memref<4x32x128xf32, #tpu.memory_space<vmem>>, vector<1x28x128xf32>
    %322 = vector.shape_cast %321 : vector<1x28x128xf32> to vector<28x128xf32>
    %323 = arith.truncf %322 : vector<28x128xf32> to vector<28x128xbf16>
    %c3_237 = arith.constant 3 : index
    %c0_238 = arith.constant 0 : index
    %c0_239 = arith.constant 0 : index
    %324 = vector.load %arg2[%c3_237, %c0_238, %c0_239] : memref<5x128x256xbf16, #tpu.memory_space<vmem>>, vector<1x128x256xbf16>
    %325 = vector.shape_cast %324 : vector<1x128x256xbf16> to vector<128x256xbf16>
    %cst_240 = arith.constant dense<0.000000e+00> : vector<28x256xf32>
    %326 = tpu.matmul %323, %325, %cst_240 {dimension_numbers = #tpu.dot_dimension_numbers<[1], [0], [0], [1], [0, 0, 1, 1], [], []>} : vector<28x128xbf16>, vector<128x256xbf16>, vector<28x256xf32> -> vector<28x256xf32>
    %327 = arith.addf %320, %326 : vector<28x256xf32>
    %c3_241 = arith.constant 3 : index
    %c4_242 = arith.constant 4 : index
    %c0_243 = arith.constant 0 : index
    %328 = vector.load %arg1[%c3_241, %c4_242, %c0_243] : memref<4x32x128xf32, #tpu.memory_space<vmem>>, vector<1x28x128xf32>
    %329 = vector.shape_cast %328 : vector<1x28x128xf32> to vector<28x128xf32>
    %330 = arith.truncf %329 : vector<28x128xf32> to vector<28x128xbf16>
    %c4_244 = arith.constant 4 : index
    %c0_245 = arith.constant 0 : index
    %c0_246 = arith.constant 0 : index
    %331 = vector.load %arg2[%c4_244, %c0_245, %c0_246] : memref<5x128x256xbf16, #tpu.memory_space<vmem>>, vector<1x128x256xbf16>
    %332 = vector.shape_cast %331 : vector<1x128x256xbf16> to vector<128x256xbf16>
    %cst_247 = arith.constant dense<0.000000e+00> : vector<28x256xf32>
    %333 = tpu.matmul %330, %332, %cst_247 {dimension_numbers = #tpu.dot_dimension_numbers<[1], [0], [0], [1], [0, 0, 1, 1], [], []>} : vector<28x128xbf16>, vector<128x256xbf16>, vector<28x256xf32> -> vector<28x256xf32>
    %334 = arith.addf %327, %333 : vector<28x256xf32>
    %335 = vector.extract_strided_slice %334 {offsets = [0, 0], sizes = [28, 128], strides = [1, 1]} : vector<28x256xf32> to vector<28x128xf32>
    %336 = vector.extract_strided_slice %334 {offsets = [0, 128], sizes = [28, 128], strides = [1, 1]} : vector<28x256xf32> to vector<28x128xf32>
    %337 = arith.maximumf %335, %336 : vector<28x128xf32>
    %c0_248 = arith.constant 0 : index
    %c0_249 = arith.constant 0 : index
    %338 = vector.load %arg3[%c0_248, %c0_249] : memref<1x128xf32, #tpu.memory_space<vmem>>, vector<1x128xf32>
    %339 = vector.broadcast %338 : vector<1x128xf32> to vector<28x128xf32>
    %340 = arith.addf %337, %339 : vector<28x128xf32>
    %cst_250 = arith.constant 0.000000e+00 : f32
    %341 = vector.broadcast %cst_250 : f32 to vector<28x128xf32>
    %342 = arith.maximumf %340, %341 : vector<28x128xf32>
    %343 = vector.extract_strided_slice %342 {offsets = [0, 0], sizes = [27, 128], strides = [1, 1]} : vector<28x128xf32> to vector<27x128xf32>
    %344 = vector.extract_strided_slice %342 {offsets = [1, 0], sizes = [27, 128], strides = [1, 1]} : vector<28x128xf32> to vector<27x128xf32>
    %345 = arith.maximumf %343, %344 : vector<27x128xf32>
    %cst_251 = arith.constant 0.000000e+00 : f32
    %346 = vector.broadcast %cst_251 : f32 to vector<19x256xf32>
    %347 = vector.extract_strided_slice %345 {offsets = [0, 0], sizes = [19, 128], strides = [1, 1]} : vector<27x128xf32> to vector<19x128xf32>
    %348 = arith.truncf %347 : vector<19x128xf32> to vector<19x128xbf16>
    %c0_252 = arith.constant 0 : index
    %c0_253 = arith.constant 0 : index
    %c0_254 = arith.constant 0 : index
    %349 = vector.load %arg4[%c0_252, %c0_253, %c0_254] : memref<5x128x256xbf16, #tpu.memory_space<vmem>>, vector<1x128x256xbf16>
    %350 = vector.shape_cast %349 : vector<1x128x256xbf16> to vector<128x256xbf16>
    %cst_255 = arith.constant dense<0.000000e+00> : vector<19x256xf32>
    %351 = tpu.matmul %348, %350, %cst_255 {dimension_numbers = #tpu.dot_dimension_numbers<[1], [0], [0], [1], [0, 0, 1, 1], [], []>} : vector<19x128xbf16>, vector<128x256xbf16>, vector<19x256xf32> -> vector<19x256xf32>
    %352 = arith.addf %346, %351 : vector<19x256xf32>
    %353 = vector.extract_strided_slice %345 {offsets = [2, 0], sizes = [19, 128], strides = [1, 1]} : vector<27x128xf32> to vector<19x128xf32>
    %354 = arith.truncf %353 : vector<19x128xf32> to vector<19x128xbf16>
    %c1_256 = arith.constant 1 : index
    %c0_257 = arith.constant 0 : index
    %c0_258 = arith.constant 0 : index
    %355 = vector.load %arg4[%c1_256, %c0_257, %c0_258] : memref<5x128x256xbf16, #tpu.memory_space<vmem>>, vector<1x128x256xbf16>
    %356 = vector.shape_cast %355 : vector<1x128x256xbf16> to vector<128x256xbf16>
    %cst_259 = arith.constant dense<0.000000e+00> : vector<19x256xf32>
    %357 = tpu.matmul %354, %356, %cst_259 {dimension_numbers = #tpu.dot_dimension_numbers<[1], [0], [0], [1], [0, 0, 1, 1], [], []>} : vector<19x128xbf16>, vector<128x256xbf16>, vector<19x256xf32> -> vector<19x256xf32>
    %358 = arith.addf %352, %357 : vector<19x256xf32>
    %359 = vector.extract_strided_slice %345 {offsets = [4, 0], sizes = [19, 128], strides = [1, 1]} : vector<27x128xf32> to vector<19x128xf32>
    %360 = arith.truncf %359 : vector<19x128xf32> to vector<19x128xbf16>
    %c2_260 = arith.constant 2 : index
    %c0_261 = arith.constant 0 : index
    %c0_262 = arith.constant 0 : index
    %361 = vector.load %arg4[%c2_260, %c0_261, %c0_262] : memref<5x128x256xbf16, #tpu.memory_space<vmem>>, vector<1x128x256xbf16>
    %362 = vector.shape_cast %361 : vector<1x128x256xbf16> to vector<128x256xbf16>
    %cst_263 = arith.constant dense<0.000000e+00> : vector<19x256xf32>
    %363 = tpu.matmul %360, %362, %cst_263 {dimension_numbers = #tpu.dot_dimension_numbers<[1], [0], [0], [1], [0, 0, 1, 1], [], []>} : vector<19x128xbf16>, vector<128x256xbf16>, vector<19x256xf32> -> vector<19x256xf32>
    %364 = arith.addf %358, %363 : vector<19x256xf32>
    %365 = vector.extract_strided_slice %345 {offsets = [6, 0], sizes = [19, 128], strides = [1, 1]} : vector<27x128xf32> to vector<19x128xf32>
    %366 = arith.truncf %365 : vector<19x128xf32> to vector<19x128xbf16>
    %c3_264 = arith.constant 3 : index
    %c0_265 = arith.constant 0 : index
    %c0_266 = arith.constant 0 : index
    %367 = vector.load %arg4[%c3_264, %c0_265, %c0_266] : memref<5x128x256xbf16, #tpu.memory_space<vmem>>, vector<1x128x256xbf16>
    %368 = vector.shape_cast %367 : vector<1x128x256xbf16> to vector<128x256xbf16>
    %cst_267 = arith.constant dense<0.000000e+00> : vector<19x256xf32>
    %369 = tpu.matmul %366, %368, %cst_267 {dimension_numbers = #tpu.dot_dimension_numbers<[1], [0], [0], [1], [0, 0, 1, 1], [], []>} : vector<19x128xbf16>, vector<128x256xbf16>, vector<19x256xf32> -> vector<19x256xf32>
    %370 = arith.addf %364, %369 : vector<19x256xf32>
    %371 = vector.extract_strided_slice %345 {offsets = [8, 0], sizes = [19, 128], strides = [1, 1]} : vector<27x128xf32> to vector<19x128xf32>
    %372 = arith.truncf %371 : vector<19x128xf32> to vector<19x128xbf16>
    %c4_268 = arith.constant 4 : index
    %c0_269 = arith.constant 0 : index
    %c0_270 = arith.constant 0 : index
    %373 = vector.load %arg4[%c4_268, %c0_269, %c0_270] : memref<5x128x256xbf16, #tpu.memory_space<vmem>>, vector<1x128x256xbf16>
    %374 = vector.shape_cast %373 : vector<1x128x256xbf16> to vector<128x256xbf16>
    %cst_271 = arith.constant dense<0.000000e+00> : vector<19x256xf32>
    %375 = tpu.matmul %372, %374, %cst_271 {dimension_numbers = #tpu.dot_dimension_numbers<[1], [0], [0], [1], [0, 0, 1, 1], [], []>} : vector<19x128xbf16>, vector<128x256xbf16>, vector<19x256xf32> -> vector<19x256xf32>
    %376 = arith.addf %370, %375 : vector<19x256xf32>
    %377 = vector.extract_strided_slice %376 {offsets = [0, 0], sizes = [19, 128], strides = [1, 1]} : vector<19x256xf32> to vector<19x128xf32>
    %378 = vector.extract_strided_slice %376 {offsets = [0, 128], sizes = [19, 128], strides = [1, 1]} : vector<19x256xf32> to vector<19x128xf32>
    %379 = arith.maximumf %377, %378 : vector<19x128xf32>
    %c0_272 = arith.constant 0 : index
    %c0_273 = arith.constant 0 : index
    %380 = vector.load %arg5[%c0_272, %c0_273] : memref<1x128xf32, #tpu.memory_space<vmem>>, vector<1x128xf32>
    %381 = vector.broadcast %380 : vector<1x128xf32> to vector<19x128xf32>
    %382 = arith.addf %379, %381 : vector<19x128xf32>
    %cst_274 = arith.constant 0.000000e+00 : f32
    %383 = vector.broadcast %cst_274 : f32 to vector<19x128xf32>
    %384 = arith.maximumf %382, %383 : vector<19x128xf32>
    %385 = vector.extract_strided_slice %384 {offsets = [0, 0], sizes = [17, 128], strides = [1, 1]} : vector<19x128xf32> to vector<17x128xf32>
    %386 = vector.extract_strided_slice %384 {offsets = [2, 0], sizes = [17, 128], strides = [1, 1]} : vector<19x128xf32> to vector<17x128xf32>
    %387 = arith.maximumf %385, %386 : vector<17x128xf32>
    %388 = vector.extract_strided_slice %387 {offsets = [0, 0], sizes = [1, 128], strides = [1, 1]} : vector<17x128xf32> to vector<1x128xf32>
    %c3_275 = arith.constant 3 : index
    %c0_276 = arith.constant 0 : index
    %389 = vector.load %arg13[%c3_275, %c0_276] : memref<8x640xf32, #tpu.memory_space<vmem>>, vector<1x128xf32>
    tpu.vector_store %arg13[%c3_275, %c0_276], %388 {strides = array<i32>} : memref<8x640xf32, #tpu.memory_space<vmem>>, vector<1x128xf32>,
    %390 = vector.extract_strided_slice %387 {offsets = [4, 0], sizes = [1, 128], strides = [1, 1]} : vector<17x128xf32> to vector<1x128xf32>
    %c3_277 = arith.constant 3 : index
    %c128_278 = arith.constant 128 : index
    %391 = vector.load %arg13[%c3_277, %c128_278] : memref<8x640xf32, #tpu.memory_space<vmem>>, vector<1x128xf32>
    tpu.vector_store %arg13[%c3_277, %c128_278], %390 {strides = array<i32>} : memref<8x640xf32, #tpu.memory_space<vmem>>, vector<1x128xf32>,
    %392 = vector.extract_strided_slice %387 {offsets = [8, 0], sizes = [1, 128], strides = [1, 1]} : vector<17x128xf32> to vector<1x128xf32>
    %c3_279 = arith.constant 3 : index
    %c256_280 = arith.constant 256 : index
    %393 = vector.load %arg13[%c3_279, %c256_280] : memref<8x640xf32, #tpu.memory_space<vmem>>, vector<1x128xf32>
    tpu.vector_store %arg13[%c3_279, %c256_280], %392 {strides = array<i32>} : memref<8x640xf32, #tpu.memory_space<vmem>>, vector<1x128xf32>,
    %394 = vector.extract_strided_slice %387 {offsets = [12, 0], sizes = [1, 128], strides = [1, 1]} : vector<17x128xf32> to vector<1x128xf32>
    %c3_281 = arith.constant 3 : index
    %c384_282 = arith.constant 384 : index
    %395 = vector.load %arg13[%c3_281, %c384_282] : memref<8x640xf32, #tpu.memory_space<vmem>>, vector<1x128xf32>
    tpu.vector_store %arg13[%c3_281, %c384_282], %394 {strides = array<i32>} : memref<8x640xf32, #tpu.memory_space<vmem>>, vector<1x128xf32>,
    %396 = vector.extract_strided_slice %387 {offsets = [16, 0], sizes = [1, 128], strides = [1, 1]} : vector<17x128xf32> to vector<1x128xf32>
    %c3_283 = arith.constant 3 : index
    %c512_284 = arith.constant 512 : index
    %397 = vector.load %arg13[%c3_283, %c512_284] : memref<8x640xf32, #tpu.memory_space<vmem>>, vector<1x128xf32>
    tpu.vector_store %arg13[%c3_283, %c512_284], %396 {strides = array<i32>} : memref<8x640xf32, #tpu.memory_space<vmem>>, vector<1x128xf32>,
    %c0_285 = arith.constant 0 : index
    %c0_286 = arith.constant 0 : index
    %398 = vector.load %arg13[%c0_285, %c0_286] : memref<8x640xf32, #tpu.memory_space<vmem>>, vector<8x640xf32>
    %399 = arith.truncf %398 : vector<8x640xf32> to vector<8x640xbf16>
    %c0_287 = arith.constant 0 : index
    %c0_288 = arith.constant 0 : index
    %400 = vector.load %arg6[%c0_287, %c0_288] : memref<640x128xbf16, #tpu.memory_space<vmem>>, vector<640x128xbf16>
    %cst_289 = arith.constant dense<0.000000e+00> : vector<8x128xf32>
    %401 = tpu.matmul %399, %400, %cst_289 {dimension_numbers = #tpu.dot_dimension_numbers<[1], [0], [0], [1], [0, 0, 1, 1], [], []>} : vector<8x640xbf16>, vector<640x128xbf16>, vector<8x128xf32> -> vector<8x128xf32>
    %c0_290 = arith.constant 0 : index
    %c0_291 = arith.constant 0 : index
    %402 = vector.load %arg7[%c0_290, %c0_291] : memref<1x128xf32, #tpu.memory_space<vmem>>, vector<1x128xf32>
    %403 = vector.broadcast %402 : vector<1x128xf32> to vector<8x128xf32>
    %404 = arith.addf %401, %403 : vector<8x128xf32>
    %cst_292 = arith.constant 0.000000e+00 : f32
    %405 = vector.broadcast %cst_292 : f32 to vector<8x128xf32>
    %406 = arith.maximumf %404, %405 : vector<8x128xf32>
    %407 = arith.truncf %406 : vector<8x128xf32> to vector<8x128xbf16>
    %c0_293 = arith.constant 0 : index
    %c0_294 = arith.constant 0 : index
    %408 = vector.load %arg8[%c0_293, %c0_294] : memref<128x128xbf16, #tpu.memory_space<vmem>>, vector<128x128xbf16>
    %cst_295 = arith.constant dense<0.000000e+00> : vector<8x128xf32>
    %409 = tpu.matmul %407, %408, %cst_295 {dimension_numbers = #tpu.dot_dimension_numbers<[1], [0], [0], [1], [0, 0, 1, 1], [], []>} : vector<8x128xbf16>, vector<128x128xbf16>, vector<8x128xf32> -> vector<8x128xf32>
    %c0_296 = arith.constant 0 : index
    %c0_297 = arith.constant 0 : index
    %410 = vector.load %arg9[%c0_296, %c0_297] : memref<1x128xf32, #tpu.memory_space<vmem>>, vector<1x128xf32>
    %411 = vector.broadcast %410 : vector<1x128xf32> to vector<8x128xf32>
    %412 = arith.addf %409, %411 : vector<8x128xf32>
    %cst_298 = arith.constant 0.000000e+00 : f32
    %413 = vector.broadcast %cst_298 : f32 to vector<8x128xf32>
    %414 = arith.maximumf %412, %413 : vector<8x128xf32>
    %415 = arith.truncf %414 : vector<8x128xf32> to vector<8x128xbf16>
    %c0_299 = arith.constant 0 : index
    %c0_300 = arith.constant 0 : index
    %416 = vector.load %arg10[%c0_299, %c0_300] : memref<128x128xbf16, #tpu.memory_space<vmem>>, vector<128x128xbf16>
    %cst_301 = arith.constant dense<0.000000e+00> : vector<8x128xf32>
    %417 = tpu.matmul %415, %416, %cst_301 {dimension_numbers = #tpu.dot_dimension_numbers<[1], [0], [0], [1], [0, 0, 1, 1], [], []>} : vector<8x128xbf16>, vector<128x128xbf16>, vector<8x128xf32> -> vector<8x128xf32>
    %c0_302 = arith.constant 0 : index
    %c0_303 = arith.constant 0 : index
    %418 = vector.load %arg11[%c0_302, %c0_303] : memref<1x128xf32, #tpu.memory_space<vmem>>, vector<1x128xf32>
    %419 = vector.broadcast %418 : vector<1x128xf32> to vector<8x128xf32>
    %420 = arith.addf %417, %419 : vector<8x128xf32>
    %c0_304 = arith.constant 0 : index
    %c0_305 = arith.constant 0 : index
    %c0_306 = arith.constant 0 : index
    %421 = vector.load %arg12[%c0_304, %c0_305, %c0_306] : memref<1x8x128xf32, #tpu.memory_space<vmem>>, vector<1x8x128xf32>
    %422 = vector.shape_cast %421 : vector<1x8x128xf32> to vector<8x128xf32>
    %423 = vector.shape_cast %420 : vector<8x128xf32> to vector<1x8x128xf32>
    tpu.vector_store %arg12[%c0_304, %c0_305, %c0_306], %423 {strides = array<i32>} : memref<1x8x128xf32, #tpu.memory_space<vmem>>, vector<1x8x128xf32>,
    return
  }
  func.func @transform_0(%arg0: i32) -> (i32, i32, i32) {
    %c0_i32 = arith.constant 0 : i32
    %c0_i32_0 = arith.constant 0 : i32
    %c0_i32_1 = arith.constant 0 : i32
    return %arg0, %c0_i32, %c0_i32_0 : i32, i32, i32
  }
  func.func @transform_1(%arg0: i32) -> (i32, i32, i32) {
    %c0_i32 = arith.constant 0 : i32
    %c0_i32_0 = arith.constant 0 : i32
    %c0_i32_1 = arith.constant 0 : i32
    %c0_i32_2 = arith.constant 0 : i32
    return %c0_i32, %c0_i32_0, %c0_i32_1 : i32, i32, i32
  }
  func.func @transform_2(%arg0: i32) -> (i32, i32) {
    %c0_i32 = arith.constant 0 : i32
    %c0_i32_0 = arith.constant 0 : i32
    %c0_i32_1 = arith.constant 0 : i32
    return %c0_i32, %c0_i32_0 : i32, i32
  }
  func.func @transform_3(%arg0: i32) -> (i32, i32, i32) {
    %c0_i32 = arith.constant 0 : i32
    %c0_i32_0 = arith.constant 0 : i32
    %c0_i32_1 = arith.constant 0 : i32
    %c0_i32_2 = arith.constant 0 : i32
    return %c0_i32, %c0_i32_0, %c0_i32_1 : i32, i32, i32
  }
  func.func @transform_4(%arg0: i32) -> (i32, i32) {
    %c0_i32 = arith.constant 0 : i32
    %c0_i32_0 = arith.constant 0 : i32
    %c0_i32_1 = arith.constant 0 : i32
    return %c0_i32, %c0_i32_0 : i32, i32
  }
  func.func @transform_5(%arg0: i32) -> (i32, i32) {
    %c0_i32 = arith.constant 0 : i32
    %c0_i32_0 = arith.constant 0 : i32
    %c0_i32_1 = arith.constant 0 : i32
    return %c0_i32, %c0_i32_0 : i32, i32
  }
  func.func @transform_6(%arg0: i32) -> (i32, i32) {
    %c0_i32 = arith.constant 0 : i32
    %c0_i32_0 = arith.constant 0 : i32
    %c0_i32_1 = arith.constant 0 : i32
    return %c0_i32, %c0_i32_0 : i32, i32
  }
  func.func @transform_7(%arg0: i32) -> (i32, i32) {
    %c0_i32 = arith.constant 0 : i32
    %c0_i32_0 = arith.constant 0 : i32
    %c0_i32_1 = arith.constant 0 : i32
    return %c0_i32, %c0_i32_0 : i32, i32
  }
  func.func @transform_8(%arg0: i32) -> (i32, i32) {
    %c0_i32 = arith.constant 0 : i32
    %c0_i32_0 = arith.constant 0 : i32
    %c0_i32_1 = arith.constant 0 : i32
    return %c0_i32, %c0_i32_0 : i32, i32
  }
  func.func @transform_9(%arg0: i32) -> (i32, i32) {
    %c0_i32 = arith.constant 0 : i32
    %c0_i32_0 = arith.constant 0 : i32
    %c0_i32_1 = arith.constant 0 : i32
    return %c0_i32, %c0_i32_0 : i32, i32
  }
  func.func @transform_10(%arg0: i32) -> (i32, i32) {
    %c0_i32 = arith.constant 0 : i32
    %c0_i32_0 = arith.constant 0 : i32
    %c0_i32_1 = arith.constant 0 : i32
    return %c0_i32, %c0_i32_0 : i32, i32
  }
  func.func @transform_11(%arg0: i32) -> (i32, i32, i32) {
    %c0_i32 = arith.constant 0 : i32
    %c0_i32_0 = arith.constant 0 : i32
    %c0_i32_1 = arith.constant 0 : i32
    return %arg0, %c0_i32, %c0_i32_0 : i32, i32, i32
  }
}

</mosaic_0001>

<bundles_post_ra>
// kernel: mynet_forward.1
= control target key start
LH: loop header
LB: loop body
LE: loop exit
PB: predicated region body
PF: predicated region fallthrough
CT: control target
= control target key end

     0   :  { %v12738_v1 = vmov 0   ;;  %vm870_vm0 = vcmask 1046528   ;;  %vm1208_vm1 = vcmask 1045504   ;;  %vm1370_vm2 = vcmask 1044480   ;;  %s12726_s1 = inlined_call_operand.vmem [shape: bf16[5,128,256], index: 1, kind: input, shape index: {}]   ;;  %s12727_s0 = inlined_call_operand.vmem [shape: f32[4,32,128], index: 0, kind: input, shape index: {}]   ;;  %s12728_s3 = inlined_call_operand.vmem [shape: bf16[5,128,256], index: 3, kind: input, shape index: {}]   ;;  %s12729_s2 = inlined_call_operand.vmem [shape: f32[1,128], index: 2, kind: input, shape index: {}]   ;;  %s12730_s4 = inlined_call_operand.vmem [shape: f32[1,128], index: 4, kind: input, shape index: {}]   ;;  %s12731_s5 = inlined_call_operand.vmem [shape: bf16[640,128], index: 5, kind: input, shape index: {}]   ;;  %s12732_s7 = inlined_call_operand.vmem [shape: bf16[128,128], index: 7, kind: input, shape index: {}]   ;;  %s12733_s9 = inlined_call_operand.vmem [shape: bf16[128,128], index: 9, kind: input, shape index: {}]   ;;  %s12734_s6 = inlined_call_operand.vmem [shape: f32[1,128], index: 6, kind: input, shape index: {}]   ;;  %s12735_s8 = inlined_call_operand.vmem [shape: f32[1,128], index: 8, kind: input, shape index: {}]   ;;  %s12736_s10 = inlined_call_operand.vmem [shape: f32[1,128], index: 10, kind: input, shape index: {}]   ;;  %s12737_s11 = inlined_call_operand.vmem [shape: f32[1,8,128], index: 11, kind: output, shape index: {}]  }
   0x1   :  { %v9875_v0 = vld [vmem:[%s12726_s1 + $0x84] ss:$8 sps:$4 sm:$0xff]   ;;  %201 = vmatprep.mubr.bf16.mxu0 %v12738_v1  ;;  %1041 = vmatprep.mubr.bf16.mxu1 %v12738_v1  ;;  %v9882_v2 = vld [vmem:[%s12726_s1 + $0x80] ss:$8 sps:$4 sm:$0xff]   ;;  %v9888_v3 = vld [vmem:[%s12726_s1 + $0x94] ss:$8 sps:$4 sm:$0xff]  }
   0x2   :  { %169 = vmatprep.subr.bf16.mxu0 %v9875_v0  ;;  %v9894_v4 = vld [vmem:[%s12726_s1 + $0x90] ss:$8 sps:$4 sm:$0xff]   ;;  %v9900_v5 = vld [vmem:[%s12726_s1 + $0xa4] ss:$8 sps:$4 sm:$0xff]   ;;  %v9906_v6 = vld [vmem:[%s12726_s1 + $0xa0] ss:$8 sps:$4 sm:$0xff]  }
   0x3   :  { %170 = vmatpush1.bf16.msra.mxu0 %v9882_v2  ;;  %v9912_v7 = vld [vmem:[%s12726_s1 + $0xb4] ss:$8 sps:$4 sm:$0xff]   ;;  %v9918_v8 = vld [vmem:[%s12726_s1 + $0xb0] ss:$8 sps:$4 sm:$0xff]   ;;  %v9924_v9 = vld [vmem:[%s12726_s1 + $0xc4] ss:$8 sps:$4 sm:$0xff]  }
   0x4   :  { %171 = vmatprep.subr.bf16.mxu0 %v9888_v3  ;;  %v9930_v10 = vld [vmem:[%s12726_s1 + $0xc0] ss:$8 sps:$4 sm:$0xff]   ;;  %v9936_v11 = vld [vmem:[%s12726_s1 + $0xd4] ss:$8 sps:$4 sm:$0xff]   ;;  %v9942_v12 = vld [vmem:[%s12726_s1 + $0xd0] ss:$8 sps:$4 sm:$0xff]  }
   0x5   :  { %v9948_v13 = vld [vmem:[%s12726_s1 + $0xe4] ss:$8 sps:$4 sm:$0xff]   ;;  %v9954_v14 = vld [vmem:[%s12726_s1 + $0xe0] ss:$8 sps:$4 sm:$0xff]   ;;  %v9960_v15 = vld [vmem:[%s12726_s1 + $0xf4] ss:$8 sps:$4 sm:$0xff]  }
   0x6   :  { %v9965_v16 = vld [vmem:[%s12726_s1 + $0xf0] ss:$8 sps:$4 sm:$0xff]   ;;  %v66_v17 = vld [vmem:[%s12727_s0 + $0x1] sm:$0xff]  ;;  %v9990_v22 = vld [vmem:[%s12726_s1 + $0x14] ss:$8 sps:$4 sm:$0xff]   ;;  %vm9811_vm3 = vmmov 0  }
   0x7   :  { %172 = vmatpush1.bf16.msra.mxu0 %v9894_v4  ;;  %v67_v18 = vld [vmem:[%s12727_s0 + $0x9] sm:$0xff]  ;;  %v68_v24 = vld [vmem:[%s12727_s0 + $0x11] sm:$0xff]  ;;  %v69_v25 = vld [vmem:[%s12727_s0 + $0x19] sm:$0xf] }
   0x8   :  { %173 = vmatprep.subr.bf16.mxu0 %v9900_v5  ;;  %v9978_v19 = vld [vmem:[%s12726_s1 + $0x4] ss:$8 sps:$4 sm:$0xff]   ;;  %v70_v20 = vpack.c.bf16 %v67_v18, %v66_v17  ;;  %v9984_v21 = vld [vmem:[%s12726_s1] ss:$8 sps:$4 sm:$0xff]   ;;  %v9995_v23 = vld [vmem:[%s12726_s1 + $0x10] ss:$8 sps:$4 sm:$0xff]   ;;  %v71_v27 = vpack.c.bf16 %v69_v25, %v68_v24 }
   0x9   :  { %v10009_v26 = vld [vmem:[%s12726_s1 + $0x24] ss:$8 sps:$4 sm:$0xff]   ;;  %v10015_v28 = vld [vmem:[%s12726_s1 + $0x20] ss:$8 sps:$4 sm:$0xff]   ;;  %v10021_v29 = vld [vmem:[%s12726_s1 + $0x34] ss:$8 sps:$4 sm:$0xff]  }
   0xa   :  { %v10027_v30 = vld [vmem:[%s12726_s1 + $0x30] ss:$8 sps:$4 sm:$0xff]   ;;  %v10034_v31 = vld [vmem:[%s12726_s1 + $0x44] ss:$8 sps:$4 sm:$0xff]   ;;  %v10040_v32 = vld [vmem:[%s12726_s1 + $0x40] ss:$8 sps:$4 sm:$0xff]  }
   0xb   :  { %174 = vmatpush1.bf16.msra.mxu0 %v9906_v6  ;;  %v10046_v33 = vld [vmem:[%s12726_s1 + $0x54] ss:$8 sps:$4 sm:$0xff]   ;;  %v10052_v34 = vld [vmem:[%s12726_s1 + $0x50] ss:$8 sps:$4 sm:$0xff]   ;;  %v10058_v35 = vld [vmem:[%s12726_s1 + $0x64] ss:$8 sps:$4 sm:$0xff]  }
   0xc   :  { %175 = vmatprep.subr.bf16.mxu0 %v9912_v7  ;;  %v10064_v36 = vld [vmem:[%s12726_s1 + $0x60] ss:$8 sps:$4 sm:$0xff]   ;;  %v10070_v37 = vld [vmem:[%s12726_s1 + $0x74] ss:$8 sps:$4 sm:$0xff]   ;;  %v10075_v38 = vld [vmem:[%s12726_s1 + $0x70] ss:$8 sps:$4 sm:$0xff]  }
   0xd   :  { %v10081_v39 = vld [vmem:[%s12726_s1 + $0x104] ss:$8 sps:$4 sm:$0xff]   ;;  %v10093_v42 = vld [vmem:[%s12726_s1 + $0x100] ss:$8 sps:$4 sm:$0xff]   ;;  %v10100_v44 = vld [vmem:[%s12726_s1 + $0x114] ss:$8 sps:$4 sm:$0xff]  }
   0xe   :  { %v44_v40 = vld [vmem:[%s12727_s0] sm:$0xff]  ;;  %v45_v41 = vld [vmem:[%s12727_s0 + $0x8] sm:$0xff]  ;;  %v10105_v45 = vld [vmem:[%s12726_s1 + $0x110] ss:$8 sps:$4 sm:$0xff]  }
   0xf   :  { %176 = vmatpush1.bf16.msra.mxu0 %v9918_v8  ;;  %v48_v43 = vpack.c.bf16 %v45_v41, %v44_v40  ;;  %v46_v46 = vld [vmem:[%s12727_s0 + $0x10] sm:$0xff]  ;;  %v47_v47 = vld [vmem:[%s12727_s0 + $0x18] sm:$0xf]  ;;  %v10116_v48 = vld [vmem:[%s12726_s1 + $0x124] ss:$8 sps:$4 sm:$0xff]  }
  0x10   :  { %177 = vmatprep.subr.bf16.mxu0 %v9924_v9  ;;  %v10124_v49 = vld [vmem:[%s12726_s1 + $0x120] ss:$8 sps:$4 sm:$0xff]   ;;  %v10129_v50 = vld [vmem:[%s12726_s1 + $0x134] ss:$8 sps:$4 sm:$0xff]   ;;  %v49_v51 = vpack.c.bf16 %v47_v47, %v46_v46  ;;  %v10136_v52 = vld [vmem:[%s12726_s1 + $0x130] ss:$8 sps:$4 sm:$0xff]  }
  0x11   :  { %v10141_v53 = vld [vmem:[%s12726_s1 + $0x144] ss:$8 sps:$4 sm:$0xff]   ;;  %v10149_v54 = vld [vmem:[%s12726_s1 + $0x140] ss:$8 sps:$4 sm:$0xff]   ;;  %v10154_v55 = vld [vmem:[%s12726_s1 + $0x154] ss:$8 sps:$4 sm:$0xff]  }
  0x12   :  { %v10161_v56 = vld [vmem:[%s12726_s1 + $0x150] ss:$8 sps:$4 sm:$0xff]   ;;  %v10166_v57 = vld [vmem:[%s12726_s1 + $0x164] ss:$8 sps:$4 sm:$0xff]   ;;  %v10173_v58 = vld [vmem:[%s12726_s1 + $0x160] ss:$8 sps:$4 sm:$0xff]  }
  0x13   :  { %178 = vmatpush1.bf16.msra.mxu0 %v9930_v10  ;;  %v10180_v59 = vld [vmem:[%s12726_s1 + $0x174] ss:$8 sps:$4 sm:$0xff]   ;;  %v10185_v60 = vld [vmem:[%s12726_s1 + $0x170] ss:$8 sps:$4 sm:$0xff]   ;;  %v355_v61 = vld [vmem:[%s12727_s0 + $0x2] sm:$0xff] }
  0x14   :  { %179 = vmatprep.subr.bf16.mxu0 %v9936_v11  ;;  %v356_v62 = vld [vmem:[%s12727_s0 + $0xa] sm:$0xff]  ;;  %v357_v25 = vld [vmem:[%s12727_s0 + $0x12] sm:$0xff] }
  0x15   :  { %v10196_v63 = vld [vmem:[%s12726_s1 + $0x184] ss:$8 sps:$4 sm:$0xff]   ;;  %v10203_v17 = vld [vmem:[%s12726_s1 + $0x180] ss:$8 sps:$4 sm:$0xff]   ;;  %v359_v18 = vpack.c.bf16 %v356_v62, %v355_v61  ;;  %v10215_v24 = vld [vmem:[%s12726_s1 + $0x190] ss:$8 sps:$4 sm:$0xff]  }
  0x16   :  { %v10226_v40 = vld [vmem:[%s12726_s1 + $0x1a4] ss:$8 sps:$4 sm:$0xff]   ;;  %v10234_v41 = vld [vmem:[%s12726_s1 + $0x1a0] ss:$8 sps:$4 sm:$0xff]   ;;  %v10246_v47 = vld [vmem:[%s12726_s1 + $0x1b0] ss:$8 sps:$4 sm:$0xff]  }
  0x17   :  { %180 = vmatpush1.bf16.msra.mxu0 %v9942_v12  ;;  %12795 = vst [vmem:[#allocation3_spill] sm:$0xff] %v10246_v47  ;;  %v10259_v61 = vld [vmem:[%s12726_s1 + $0x1c0] ss:$8 sps:$4 sm:$0xff]   ;;  %v10264_v62 = vld [vmem:[%s12726_s1 + $0x1d4] ss:$8 sps:$4 sm:$0xff]  }
  0x18   :  { %181 = vmatprep.subr.bf16.mxu0 %v9948_v13  ;;  %12797 = vst [vmem:[#allocation5_spill] sm:$0xff] %v10259_v61  ;;  %12798 = vst [vmem:[#allocation6_spill] sm:$0xff] %v10264_v62 }
  0x1b   :  { %182 = vmatpush1.bf16.msra.mxu0 %v9954_v14 }
  0x1c   :  { %183 = vmatprep.subr.bf16.mxu0 %v9960_v15 }
  0x1f   :  { %184 = vmatpush1.bf16.msra.mxu0 %v9965_v16 }
  0x20   :  { %302 = vmatprep.subr.bf16.mxu0 %v9978_v19 }
  0x22   :  { %202 = vmatmul.mubr.bf16.vlgmr.msra.gmra.mrb[0].mxu0 %v70_v20  ;;  %v10210_v20 = vld [vmem:[%s12726_s1 + $0x194] ss:$8 sps:$4 sm:$0xff]  }
  0x23   :  { %303 = vmatpush1.bf16.msra.mxu0 %v9984_v21  ;;  %211 = vmatprep.mubr.bf16.mxu0 %v12738_v1 }
  0x24   :  { %304 = vmatprep.subr.bf16.mxu0 %v9990_v22 }
  0x27   :  { %305 = vmatpush1.bf16.msra.mxu0 %v9995_v23 }
  0x28   :  { %306 = vmatprep.subr.bf16.mxu0 %v10009_v26 }
  0x2a   :  { %212 = vmatmul.mubr.bf16.gmra.mrb[4].mxu0 %v71_v27  ;;  %v358_v27 = vld [vmem:[%s12727_s0 + $0x1a] sm:$0xf] }
  0x2b   :  { %307 = vmatpush1.bf16.msra.mxu0 %v10015_v28  ;;  %334 = vmatprep.mubr.bf16.mxu0 %v12738_v1  ;;  %v360_v46 = vpack.c.bf16 %v358_v27, %v357_v25  ;;  %v10278_v25 = vld [vmem:[%s12726_s1 + $0x1e4] ss:$8 sps:$4 sm:$0xff]   ;;  %v10284_v27 = vld [vmem:[%s12726_s1 + $0x1e0] ss:$8 sps:$4 sm:$0xff]  }
  0x2c   :  { %308 = vmatprep.subr.bf16.mxu0 %v10021_v29  ;;  %12800 = vst [vmem:[#allocation8_spill] sm:$0xff] %v10278_v25  ;;  %12801 = vst [vmem:[#allocation9_spill] sm:$0xff] %v10284_v27 }
  0x2f   :  { %309 = vmatpush1.bf16.msra.mxu0 %v10027_v30 }
  0x30   :  { %310 = vmatprep.subr.bf16.mxu0 %v10034_v31 }
  0x33   :  { %311 = vmatpush1.bf16.msra.mxu0 %v10040_v32 }
  0x34   :  { %312 = vmatprep.subr.bf16.mxu0 %v10046_v33 }
  0x37   :  { %313 = vmatpush1.bf16.msra.mxu0 %v10052_v34 }
  0x38   :  { %314 = vmatprep.subr.bf16.mxu0 %v10058_v35 }
  0x3b   :  { %315 = vmatpush1.bf16.msra.mxu0 %v10064_v36 }
  0x3c   :  { %316 = vmatprep.subr.bf16.mxu0 %v10070_v37 }
  0x3f   :  { %317 = vmatpush1.bf16.msra.mxu0 %v10075_v38 }
  0x40   :  { %458 = vmatprep.subr.bf16.mxu0 %v10081_v39 }
  0x42   :  { %335 = vmatmul.mubr.bf16.vlgmr.msra.gmra.mrb[0].mxu0 %v48_v43  ;;  %v10239_v43 = vld [vmem:[%s12726_s1 + $0x1b4] ss:$8 sps:$4 sm:$0xff]  }
  0x43   :  { %459 = vmatpush1.bf16.msra.mxu0 %v10093_v42  ;;  %344 = vmatprep.mubr.bf16.mxu0 %v12738_v1 }
  0x44   :  { %460 = vmatprep.subr.bf16.mxu0 %v10100_v44 }
  0x47   :  { %461 = vmatpush1.bf16.msra.mxu0 %v10105_v45 }
  0x48   :  { %462 = vmatprep.subr.bf16.mxu0 %v10116_v48 }
  0x4a   :  { %345 = vmatmul.mubr.bf16.gmra.mrb[4].mxu0 %v49_v51  ;;  %v10251_v51 = vld [vmem:[%s12726_s1 + $0x1c4] ss:$8 sps:$4 sm:$0xff]  }
  0x4b   :  { %463 = vmatpush1.bf16.msra.mxu0 %v10124_v49  ;;  %490 = vmatprep.mubr.bf16.mxu0 %v12738_v1  ;;  %12796 = vst [vmem:[#allocation4_spill] sm:$0xff] %v10251_v51 }
  0x4c   :  { %464 = vmatprep.subr.bf16.mxu0 %v10129_v50 }
  0x4f   :  { %465 = vmatpush1.bf16.msra.mxu0 %v10136_v52 }
  0x50   :  { %466 = vmatprep.subr.bf16.mxu0 %v10141_v53 }
  0x53   :  { %467 = vmatpush1.bf16.msra.mxu0 %v10149_v54 }
  0x54   :  { %468 = vmatprep.subr.bf16.mxu0 %v10154_v55 }
  0x57   :  { %469 = vmatpush1.bf16.msra.mxu0 %v10161_v56 }
  0x58   :  { %470 = vmatprep.subr.bf16.mxu0 %v10166_v57 }
  0x5b   :  { %471 = vmatpush1.bf16.msra.mxu0 %v10173_v58 }
  0x5c   :  { %472 = vmatprep.subr.bf16.mxu0 %v10180_v59 }
  0x5f   :  { %473 = vmatpush1.bf16.msra.mxu0 %v10185_v60 }
  0x60   :  { %622 = vmatprep.subr.bf16.mxu0 %v10196_v63 }
  0x62   :  { %491 = vmatmul.mubr.bf16.vlgmr.msra.gmra.mrb[0].mxu0 %v359_v18  ;;  %v10272_v18 = vld [vmem:[%s12726_s1 + $0x1d0] ss:$8 sps:$4 sm:$0xff]  }
  0x63   :  { %623 = vmatpush1.bf16.msra.mxu0 %v10203_v17  ;;  %500 = vmatprep.mubr.bf16.mxu0 %v12738_v1  ;;  %12799 = vst [vmem:[#allocation7_spill] sm:$0xff] %v10272_v18 }
  0x64   :  { %624 = vmatprep.subr.bf16.mxu0 %v10210_v20 }
  0x67   :  { %625 = vmatpush1.bf16.msra.mxu0 %v10215_v24 }
  0x68   :  { %626 = vmatprep.subr.bf16.mxu0 %v10226_v40 }
  0x6a   :  { %501 = vmatmul.mubr.bf16.gmra.mrb[4].mxu0 %v360_v46  ;;  %v10290_v46 = vld [vmem:[%s12726_s1 + $0x1f4] ss:$8 sps:$4 sm:$0xff]  }
  0x6b   :  { %627 = vmatpush1.bf16.msra.mxu0 %v10234_v41  ;;  %654 = vmatprep.mubr.bf16.mxu0 %v12738_v1  ;;  %12802 = vst [vmem:[#allocation10_spill] sm:$0xff] %v10290_v46  ;;  %v10296_v1 = vld [vmem:[%s12726_s1 + $0x1f0] ss:$8 sps:$4 sm:$0xff]  }
  0x6c   :  { %628 = vmatprep.subr.bf16.mxu0 %v10239_v43  ;;  %12803 = vst [vmem:[#allocation11_spill] sm:$0xff] %v10296_v1 }
  0x6f   :  { %629 = vmatpush1.bf16.msra.mxu0 %v10246_v47  ;;  %v10351_v47 = vld [vmem:[%s12726_s1 + $0x234] ss:$8 sps:$4 sm:$0xff]  }
  0x70   :  { %630 = vmatprep.subr.bf16.mxu0 %v10251_v51  ;;  %v10320_v51 = vld [vmem:[%s12726_s1 + $0x214] ss:$8 sps:$4 sm:$0xff]   ;;  %12810 = vst [vmem:[#allocation17_spill] sm:$0xff] %v10351_v47 }
  0x73   :  { %631 = vmatpush1.bf16.msra.mxu0 %v10259_v61  ;;  %v10314_v61 = vld [vmem:[%s12726_s1 + $0x200] ss:$8 sps:$4 sm:$0xff]  }
  0x74   :  { %632 = vmatprep.subr.bf16.mxu0 %v10264_v62  ;;  %v10308_v62 = vld [vmem:[%s12726_s1 + $0x204] ss:$8 sps:$4 sm:$0xff]   ;;  %12805 = vst [vmem:[#allocation13_spill] sm:$0xff] %v10314_v61 }
  0x75   :  { %12804 = vst [vmem:[#allocation12_spill] sm:$0xff] %v10308_v62 }
  0x77   :  { %633 = vmatpush1.bf16.msra.mxu0 %v10272_v18  ;;  %v519_v18 = vld [vmem:[%s12727_s0 + $0x3] sm:$0xff] }
  0x78   :  { %634 = vmatprep.subr.bf16.mxu0 %v10278_v25  ;;  %v520_v25 = vld [vmem:[%s12727_s0 + $0xb] sm:$0xff] }
  0x7b   :  { %635 = vmatpush1.bf16.msra.mxu0 %v10284_v27  ;;  %v523_v27 = vpack.c.bf16 %v520_v25, %v519_v18  ;;  %v10326_v18 = vld [vmem:[%s12726_s1 + $0x210] ss:$8 sps:$4 sm:$0xff]   ;;  %v12807_v25 = vmov 0  }
  0x7c   :  { %636 = vmatprep.subr.bf16.mxu0 %v10290_v46  ;;  %12806 = vst [vmem:[#allocation14_spill] sm:$0xff] %v10326_v18  ;;  %v10345_v46 = vld [vmem:[%s12726_s1 + $0x220] ss:$8 sps:$4 sm:$0xff]  }
  0x7d   :  { %12809 = vst [vmem:[#allocation16_spill] sm:$0xff] %v10345_v46 }
  0x7f   :  { %637 = vmatpush1.bf16.msra.mxu0 %v10296_v1  ;;  %v521_v1 = vld [vmem:[%s12727_s0 + $0x13] sm:$0xff] }
  0x80   :  { %786 = vmatprep.subr.bf16.mxu0 %v10308_v62  ;;  %v522_v62 = vld [vmem:[%s12727_s0 + $0x1b] sm:$0xf] }
  0x82   :  { %655 = vmatmul.mubr.bf16.vlgmr.msra.gmra.mrb[0].mxu0 %v523_v27  ;;  %v10339_v27 = vld [vmem:[%s12726_s1 + $0x224] ss:$8 sps:$4 sm:$0xff]  }
  0x83   :  { %787 = vmatpush1.bf16.msra.mxu0 %v10314_v61  ;;  %664 = vmatprep.mubr.bf16.mxu0 %v12807_v25  ;;  %12808 = vst [vmem:[#allocation15_spill] sm:$0xff] %v10339_v27  ;;  %v524_v61 = vpack.c.bf16 %v522_v62, %v521_v1  ;;  %v10357_v1 = vld [vmem:[%s12726_s1 + $0x230] ss:$8 sps:$4 sm:$0xff]   ;;  %v10364_v62 = vld [vmem:[%s12726_s1 + $0x244] ss:$8 sps:$4 sm:$0xff]  }
  0x84   :  { %788 = vmatprep.subr.bf16.mxu0 %v10320_v51  ;;  %12811 = vst [vmem:[#allocation18_spill] sm:$0xff] %v10357_v1  ;;  %12812 = vst [vmem:[#allocation19_spill] sm:$0xff] %v10364_v62 }
  0x87   :  { %789 = vmatpush1.bf16.msra.mxu0 %v10326_v18  ;;  %v686_v18 = vld [vmem:[%s12727_s0 + $0x1c] sm:$0xf] }
  0x88   :  { %790 = vmatprep.subr.bf16.mxu0 %v10339_v27 }
  0x8a   :  { %665 = vmatmul.mubr.bf16.gmra.mrb[4].mxu0 %v524_v61  ;;  %v10370_v61 = vld [vmem:[%s12726_s1 + $0x240] ss:$8 sps:$4 sm:$0xff]  }
  0x8b   :  { %791 = vmatpush1.bf16.msra.mxu0 %v10345_v46  ;;  %818 = vmatprep.mubr.bf16.mxu0 %v12807_v25  ;;  %12813 = vst [vmem:[#allocation20_spill] sm:$0xff] %v10370_v61  ;;  %v10376_v46 = vld [vmem:[%s12726_s1 + $0x254] ss:$8 sps:$4 sm:$0xff]  }
  0x8c   :  { %792 = vmatprep.subr.bf16.mxu0 %v10351_v47  ;;  %12814 = vst [vmem:[#allocation21_spill] sm:$0xff] %v10376_v46  ;;  %v10382_v47 = vld [vmem:[%s12726_s1 + $0x250] ss:$8 sps:$4 sm:$0xff]  }
  0x8d   :  { %12815 = vst [vmem:[#allocation22_spill] sm:$0xff] %v10382_v47 }
  0x8f   :  { %793 = vmatpush1.bf16.msra.mxu0 %v10357_v1  ;;  %v10388_v1 = vld [vmem:[%s12726_s1 + $0x264] ss:$8 sps:$4 sm:$0xff]  }
  0x90   :  { %794 = vmatprep.subr.bf16.mxu0 %v10364_v62  ;;  %12816 = vst [vmem:[#allocation23_spill] sm:$0xff] %v10388_v1  ;;  %v10394_v62 = vld [vmem:[%s12726_s1 + $0x260] ss:$8 sps:$4 sm:$0xff]  }
  0x91   :  { %12817 = vst [vmem:[#allocation24_spill] sm:$0xff] %v10394_v62 }
  0x93   :  { %795 = vmatpush1.bf16.msra.mxu0 %v10370_v61  ;;  %v10400_v61 = vld [vmem:[%s12726_s1 + $0x274] ss:$8 sps:$4 sm:$0xff]  }
  0x94   :  { %796 = vmatprep.subr.bf16.mxu0 %v10376_v46  ;;  %v10406_v46 = vld [vmem:[%s12726_s1 + $0x270] ss:$8 sps:$4 sm:$0xff]  }
  0x97   :  { %797 = vmatpush1.bf16.msra.mxu0 %v10382_v47  ;;  %v683_v47 = vld [vmem:[%s12727_s0 + $0x4] sm:$0xff] }
  0x98   :  { %798 = vmatprep.subr.bf16.mxu0 %v10388_v1  ;;  %v684_v1 = vld [vmem:[%s12727_s0 + $0xc] sm:$0xff] }
  0x99   :  { %v687_v27 = vpack.c.bf16 %v684_v1, %v683_v47  ;;  %v12834_v1 = vld [vmem:[#allocation19_spill] sm:$0xff] }
  0x9b   :  { %799 = vmatpush1.bf16.msra.mxu0 %v10394_v62  ;;  %v685_v62 = vld [vmem:[%s12727_s0 + $0x14] sm:$0xff] }
  0x9c   :  { %800 = vmatprep.subr.bf16.mxu0 %v10400_v61  ;;  %v688_v47 = vpack.c.bf16 %v686_v18, %v685_v62  ;;  %v12832_v18 = vld [vmem:[#allocation17_spill] sm:$0xff]  ;;  %v12835_v62 = vld [vmem:[#allocation20_spill] sm:$0xff] }
  0x9f   :  { %801 = vmatpush1.bf16.msra.mxu0 %v10406_v46 }
  0xa0   :  { %1836 = vmatprep.subr.bf16.mxu0 %v9875_v0  ;;  %v7658_v0 = vld [vmem:[%s12727_s0 + $0x21] sm:$0xff] }
  0xa2   :  { %819 = vmatmul.mubr.bf16.vlgmr.msra.gmra.mrb[0].mxu0 %v687_v27  ;;  %v12833_v27 = vld [vmem:[#allocation18_spill] sm:$0xff] }
  0xa3   :  { %1837 = vmatpush1.bf16.msra.mxu0 %v9882_v2  ;;  %828 = vmatprep.mubr.bf16.mxu0 %v12807_v25  ;;  %v7659_v2 = vld [vmem:[%s12727_s0 + $0x29] sm:$0xff] }
  0xa4   :  { %1838 = vmatprep.subr.bf16.mxu0 %v9888_v3  ;;  %v1738_v3 = vpack.c.bf16 %v7659_v2, %v7658_v0  ;;  %v12838_v0 = vld [vmem:[#allocation23_spill] sm:$0xff] }
  0xa5   :  { %v7782_v2 = vld [vmem:[%s12727_s0 + $0x24] sm:$0xff] }
  0xa7   :  { %1839 = vmatpush1.bf16.msra.mxu0 %v9894_v4  ;;  %v7660_v4 = vld [vmem:[%s12727_s0 + $0x31] sm:$0xff] }
  0xa8   :  { %1840 = vmatprep.subr.bf16.mxu0 %v9900_v5  ;;  %v7661_v5 = vld [vmem:[%s12727_s0 + $0x39] sm:$0xf] }
  0xaa   :  { %829 = vmatmul.mubr.bf16.gmra.mrb[4].mxu0 %v688_v47  ;;  %v12836_v47 = vld [vmem:[#allocation21_spill] sm:$0xff] }
  0xab   :  { %1841 = vmatpush1.bf16.msra.mxu0 %v9906_v6  ;;  %1868 = vmatprep.mubr.bf16.mxu0 %v12807_v25  ;;  %v1739_v6 = vpack.c.bf16 %v7661_v5, %v7660_v4  ;;  %v7783_v4 = vld [vmem:[%s12727_s0 + $0x2c] sm:$0xff] }
  0xac   :  { %1842 = vmatprep.subr.bf16.mxu0 %v9912_v7  ;;  %v7654_v7 = vld [vmem:[%s12727_s0 + $0x20] sm:$0xff] }
  0xad   :  { %v9155_v5 = vld [vmem:[%s12726_s1 + $0x84] ss:$8 sps:$4 sm:$0xff]  }
  0xaf   :  { %1843 = vmatpush1.bf16.msra.mxu0 %v9918_v8  ;;  %v7655_v8 = vld [vmem:[%s12727_s0 + $0x28] sm:$0xff] }
  0xb0   :  { %1844 = vmatprep.subr.bf16.mxu0 %v9924_v9  ;;  %v1716_v9 = vpack.c.bf16 %v7655_v8, %v7654_v7  ;;  %v9153_v7 = vld [vmem:[%s12726_s1 + $0x80] ss:$8 sps:$4 sm:$0xff]   ;;  %v9158_v8 = vld [vmem:[%s12726_s1 + $0x94] ss:$8 sps:$4 sm:$0xff]  }
  0xb3   :  { %1845 = vmatpush1.bf16.msra.mxu0 %v9930_v10  ;;  %v7656_v10 = vld [vmem:[%s12727_s0 + $0x30] sm:$0xff] }
  0xb4   :  { %1846 = vmatprep.subr.bf16.mxu0 %v9936_v11  ;;  %v7657_v11 = vld [vmem:[%s12727_s0 + $0x38] sm:$0xf] }
  0xb7   :  { %1847 = vmatpush1.bf16.msra.mxu0 %v9942_v12  ;;  %v1717_v12 = vpack.c.bf16 %v7657_v11, %v7656_v10  ;;  %v9161_v10 = vld [vmem:[%s12726_s1 + $0xa4] ss:$8 sps:$4 sm:$0xff]  }
  0xb8   :  { %1848 = vmatprep.subr.bf16.mxu0 %v9948_v13  ;;  %v9189_v13 = vld [vmem:[%s12728_s3 + $0x84] ss:$8 sps:$4 sm:$0xff]  }
  0xb9   :  { %1009 = vmatprep.subr.bf16.mxu1 %v9189_v13  ;;  %v9164_v13 = vld [vmem:[%s12726_s1 + $0xb4] ss:$8 sps:$4 sm:$0xff]  }
  0xbb   :  { %1849 = vmatpush1.bf16.msra.mxu0 %v9954_v14  ;;  %v9191_v14 = vld [vmem:[%s12728_s3 + $0x80] ss:$8 sps:$4 sm:$0xff]  }
  0xbc   :  { %1850 = vmatprep.subr.bf16.mxu0 %v9960_v15  ;;  %1010 = vmatpush1.bf16.msra.mxu1 %v9191_v14  ;;  %v9195_v15 = vld [vmem:[%s12728_s3 + $0x94] ss:$8 sps:$4 sm:$0xff]   ;;  %v9162_v14 = vld [vmem:[%s12726_s1 + $0xb0] ss:$8 sps:$4 sm:$0xff]  }
  0xbd   :  { %1011 = vmatprep.subr.bf16.mxu1 %v9195_v15  ;;  %v9167_v15 = vld [vmem:[%s12726_s1 + $0xc4] ss:$8 sps:$4 sm:$0xff]  }
  0xbf   :  { %1851 = vmatpush1.bf16.msra.mxu0 %v9965_v16  ;;  %v9197_v16 = vld [vmem:[%s12728_s3 + $0x90] ss:$8 sps:$4 sm:$0xff]  }
  0xc0   :  { %1969 = vmatprep.subr.bf16.mxu0 %v9978_v19  ;;  %1012 = vmatpush1.bf16.msra.mxu1 %v9197_v16  ;;  %v9201_v19 = vld [vmem:[%s12728_s3 + $0xa4] ss:$8 sps:$4 sm:$0xff]   ;;  %v9165_v16 = vld [vmem:[%s12726_s1 + $0xc0] ss:$8 sps:$4 sm:$0xff]  }
  0xc1   :  { %1013 = vmatprep.subr.bf16.mxu1 %v9201_v19  ;;  %v9170_v19 = vld [vmem:[%s12726_s1 + $0xd4] ss:$8 sps:$4 sm:$0xff]  }
  0xc2   :  { %1869 = vmatmul.mubr.bf16.vlgmr.msra.gmra.mrb[8].mxu0 %v1738_v3  ;;  %v12839_v3 = vld [vmem:[#allocation24_spill] sm:$0xff] }
  0xc3   :  { %1970 = vmatpush1.bf16.msra.mxu0 %v9984_v21  ;;  %1878 = vmatprep.mubr.bf16.mxu0 %v12807_v25  ;;  %v9203_v21 = vld [vmem:[%s12728_s3 + $0xa0] ss:$8 sps:$4 sm:$0xff]  }
  0xc4   :  { %1971 = vmatprep.subr.bf16.mxu0 %v9990_v22  ;;  %v7710_v22 = vld [vmem:[%s12727_s0 + $0x22] sm:$0xff]  ;;  %1014 = vmatpush1.bf16.msra.mxu1 %v9203_v21  ;;  %v9168_v21 = vld [vmem:[%s12726_s1 + $0xd0] ss:$8 sps:$4 sm:$0xff]  }
  0xc7   :  { %1972 = vmatpush1.bf16.msra.mxu0 %v9995_v23  ;;  %v7711_v23 = vld [vmem:[%s12727_s0 + $0x2a] sm:$0xff] }
  0xc8   :  { %1973 = vmatprep.subr.bf16.mxu0 %v10009_v26  ;;  %v9207_v26 = vld [vmem:[%s12728_s3 + $0xb4] ss:$8 sps:$4 sm:$0xff]  }
  0xc9   :  { %1015 = vmatprep.subr.bf16.mxu1 %v9207_v26  ;;  %v9176_v26 = vld [vmem:[%s12726_s1 + $0xf4] ss:$8 sps:$4 sm:$0xff]  }
  0xca   :  { %1879 = vmatmul.mubr.bf16.gmra.mrb[12].mxu0 %v1739_v6  ;;  %v2352_v6 = vpack.c.bf16 %v7783_v4, %v7782_v2 }
  0xcb   :  { %1974 = vmatpush1.bf16.msra.mxu0 %v10015_v28  ;;  %2001 = vmatprep.mubr.bf16.mxu0 %v12807_v25  ;;  %v9209_v28 = vld [vmem:[%s12728_s3 + $0xb0] ss:$8 sps:$4 sm:$0xff]  }
  0xcc   :  { %1975 = vmatprep.subr.bf16.mxu0 %v10021_v29  ;;  %1016 = vmatpush1.bf16.msra.mxu1 %v9209_v28  ;;  %v2026_v29 = vpack.c.bf16 %v7711_v23, %v7710_v22  ;;  %v9173_v22 = vld [vmem:[%s12726_s1 + $0xe4] ss:$8 sps:$4 sm:$0xff]   ;;  %v9171_v23 = vld [vmem:[%s12726_s1 + $0xe0] ss:$8 sps:$4 sm:$0xff]   ;;  %v9174_v28 = vld [vmem:[%s12726_s1 + $0xf0] ss:$8 sps:$4 sm:$0xff]  }
  0xcf   :  { %1976 = vmatpush1.bf16.msra.mxu0 %v10027_v30  ;;  %v9213_v30 = vld [vmem:[%s12728_s3 + $0xc4] ss:$8 sps:$4 sm:$0xff]  }
  0xd0   :  { %1977 = vmatprep.subr.bf16.mxu0 %v10034_v31  ;;  %v9215_v31 = vld [vmem:[%s12728_s3 + $0xc0] ss:$8 sps:$4 sm:$0xff]   ;;  %1017 = vmatprep.subr.bf16.mxu1 %v9213_v30 }
  0xd1   :  { %1018 = vmatpush1.bf16.msra.mxu1 %v9215_v31  ;;  %v7968_v30 = vld [vmem:[%s12727_s0 + $0x41] sm:$0xff]  ;;  %v7969_v31 = vld [vmem:[%s12727_s0 + $0x49] sm:$0xff] }
  0xd3   :  { %1978 = vmatpush1.bf16.msra.mxu0 %v10040_v32  ;;  %v7712_v32 = vld [vmem:[%s12727_s0 + $0x32] sm:$0xff] }
  0xd4   :  { %1979 = vmatprep.subr.bf16.mxu0 %v10046_v33  ;;  %v7713_v33 = vld [vmem:[%s12727_s0 + $0x3a] sm:$0xf] }
  0xd7   :  { %1980 = vmatpush1.bf16.msra.mxu0 %v10052_v34  ;;  %v9219_v34 = vld [vmem:[%s12728_s3 + $0xd4] ss:$8 sps:$4 sm:$0xff]  }
  0xd8   :  { %1981 = vmatprep.subr.bf16.mxu0 %v10058_v35  ;;  %v9221_v35 = vld [vmem:[%s12728_s3 + $0xd0] ss:$8 sps:$4 sm:$0xff]   ;;  %1019 = vmatprep.subr.bf16.mxu1 %v9219_v34  ;;  %v9182_v34 = vld [vmem:[%s12726_s1 + $0x14] ss:$8 sps:$4 sm:$0xff]  }
  0xd9   :  { %1020 = vmatpush1.bf16.msra.mxu1 %v9221_v35  ;;  %v9180_v35 = vld [vmem:[%s12726_s1 + $0x10] ss:$8 sps:$4 sm:$0xff]  }
  0xdb   :  { %1982 = vmatpush1.bf16.msra.mxu0 %v10064_v36  ;;  %v2027_v36 = vpack.c.bf16 %v7713_v33, %v7712_v32  ;;  %v3393_v32 = vpack.c.bf16 %v7969_v31, %v7968_v30  ;;  %v9177_v33 = vld [vmem:[%s12726_s1] ss:$8 sps:$4 sm:$0xff]  }
  0xdc   :  { %1983 = vmatprep.subr.bf16.mxu0 %v10070_v37  ;;  %v9225_v37 = vld [vmem:[%s12728_s3 + $0xe4] ss:$8 sps:$4 sm:$0xff]  }
  0xdd   :  { %1021 = vmatprep.subr.bf16.mxu1 %v9225_v37  ;;  %v7970_v37 = vld [vmem:[%s12727_s0 + $0x51] sm:$0xff] }
  0xdf   :  { %1984 = vmatpush1.bf16.msra.mxu0 %v10075_v38  ;;  %v9227_v38 = vld [vmem:[%s12728_s3 + $0xe0] ss:$8 sps:$4 sm:$0xff]  }
  0xe0   :  { %2124 = vmatprep.subr.bf16.mxu0 %v10081_v39  ;;  %1022 = vmatpush1.bf16.msra.mxu1 %v9227_v38  ;;  %v9231_v39 = vld [vmem:[%s12728_s3 + $0xf4] ss:$8 sps:$4 sm:$0xff]  }
  0xe1   :  { %1023 = vmatprep.subr.bf16.mxu1 %v9231_v39  ;;  %v7971_v38 = vld [vmem:[%s12727_s0 + $0x59] sm:$0xf] }
  0xe2   :  { %2002 = vmatmul.mubr.bf16.vlgmr.msra.gmra.mrb[8].mxu0 %v1716_v9  ;;  %v9156_v9 = vld [vmem:[%s12726_s1 + $0x90] ss:$8 sps:$4 sm:$0xff]   ;;  %v3394_v39 = vpack.c.bf16 %v7971_v38, %v7970_v37  ;;  %v9242_v37 = vld [vmem:[%s12726_s1 + $0x144] ss:$8 sps:$4 sm:$0xff]  }
  0xe3   :  { %2125 = vmatpush1.bf16.msra.mxu0 %v10093_v42  ;;  %2011 = vmatprep.mubr.bf16.mxu0 %v12807_v25  ;;  %v9233_v42 = vld [vmem:[%s12728_s3 + $0xf0] ss:$8 sps:$4 sm:$0xff]  }
  0xe4   :  { %2126 = vmatprep.subr.bf16.mxu0 %v10100_v44  ;;  %1024 = vmatpush1.bf16.msra.mxu1 %v9233_v42  ;;  %v9239_v44 = vld [vmem:[%s12728_s3 + $0x4] ss:$8 sps:$4 sm:$0xff]   ;;  %v9183_v42 = vld [vmem:[%s12726_s1 + $0x20] ss:$8 sps:$4 sm:$0xff]  }
  0xe5   :  { %1140 = vmatprep.subr.bf16.mxu1 %v9239_v44  ;;  %v9188_v44 = vld [vmem:[%s12726_s1 + $0x34] ss:$8 sps:$4 sm:$0xff]  }
  0xe7   :  { %2127 = vmatpush1.bf16.msra.mxu0 %v10105_v45  ;;  %v12818_v45 = vld [vmem:[#allocation3_spill] sm:$0xff] }
  0xe8   :  { %2128 = vmatprep.subr.bf16.mxu0 %v10116_v48  ;;  %v12819_v48 = vld [vmem:[#allocation4_spill] sm:$0xff] }
  0xea   :  { %2012 = vmatmul.mubr.bf16.gmra.mrb[12].mxu0 %v1717_v12  ;;  %v9159_v12 = vld [vmem:[%s12726_s1 + $0xa0] ss:$8 sps:$4 sm:$0xff]  }
  0xeb   :  { %2129 = vmatpush1.bf16.msra.mxu0 %v10124_v49  ;;  %2156 = vmatprep.mubr.bf16.mxu0 %v12807_v25  ;;  %v12820_v49 = vld [vmem:[#allocation5_spill] sm:$0xff] }
  0xec   :  { %2130 = vmatprep.subr.bf16.mxu0 %v10129_v50  ;;  %v12821_v50 = vld [vmem:[#allocation6_spill] sm:$0xff] }
  0xef   :  { %2131 = vmatpush1.bf16.msra.mxu0 %v10136_v52  ;;  %v12822_v52 = vld [vmem:[#allocation7_spill] sm:$0xff] }
  0xf0   :  { %2132 = vmatprep.subr.bf16.mxu0 %v10141_v53  ;;  %v12823_v53 = vld [vmem:[#allocation8_spill] sm:$0xff] }
  0xf3   :  { %2133 = vmatpush1.bf16.msra.mxu0 %v10149_v54  ;;  %v12824_v54 = vld [vmem:[#allocation9_spill] sm:$0xff] }
  0xf4   :  { %2134 = vmatprep.subr.bf16.mxu0 %v10154_v55  ;;  %v7746_v55 = vld [vmem:[%s12727_s0 + $0x23] sm:$0xff] }
  0xf7   :  { %2135 = vmatpush1.bf16.msra.mxu0 %v10161_v56  ;;  %v7747_v56 = vld [vmem:[%s12727_s0 + $0x2b] sm:$0xff] }
  0xf8   :  { %2136 = vmatprep.subr.bf16.mxu0 %v10166_v57  ;;  %v12825_v57 = vld [vmem:[#allocation10_spill] sm:$0xff] }
  0xfb   :  { %2137 = vmatpush1.bf16.msra.mxu0 %v10173_v58  ;;  %v2189_v58 = vpack.c.bf16 %v7747_v56, %v7746_v55  ;;  %v7508_v56 = vld [vmem:[%s12729_s2] ss:$0 sm:$0xff] }
  0xfc   :  { %2138 = vmatprep.subr.bf16.mxu0 %v10180_v59  ;;  %v12826_v59 = vld [vmem:[#allocation11_spill] sm:$0xff] }
  0xff   :  { %2139 = vmatpush1.bf16.msra.mxu0 %v10185_v60  ;;  %v12827_v60 = vld [vmem:[#allocation12_spill] sm:$0xff] }
 0x100   :  { %2287 = vmatprep.subr.bf16.mxu0 %v10196_v63  ;;  %v12828_v63 = vld [vmem:[#allocation13_spill] sm:$0xff] }
 0x102   :  { %2157 = vmatmul.mubr.bf16.vlgmr.msra.gmra.mrb[8].mxu0 %v2026_v29  ;;  %v9179_v29 = vld [vmem:[%s12726_s1 + $0x4] ss:$8 sps:$4 sm:$0xff]  }
 0x103   :  { %2288 = vmatpush1.bf16.msra.mxu0 %v10203_v17  ;;  %2166 = vmatprep.mubr.bf16.mxu0 %v12807_v25  ;;  %v7748_v17 = vld [vmem:[%s12727_s0 + $0x33] sm:$0xff] }
 0x104   :  { %2289 = vmatprep.subr.bf16.mxu0 %v10210_v20  ;;  %v7749_v20 = vld [vmem:[%s12727_s0 + $0x3b] sm:$0xf] }
 0x107   :  { %2290 = vmatpush1.bf16.msra.mxu0 %v10215_v24  ;;  %v2190_v24 = vpack.c.bf16 %v7749_v20, %v7748_v17 }
 0x108   :  { %2291 = vmatprep.subr.bf16.mxu0 %v10226_v40  ;;  %v12829_v40 = vld [vmem:[#allocation14_spill] sm:$0xff] }
 0x10a   :  { %2167 = vmatmul.mubr.bf16.gmra.mrb[12].mxu0 %v2027_v36  ;;  %v9185_v36 = vld [vmem:[%s12726_s1 + $0x24] ss:$8 sps:$4 sm:$0xff]  }
 0x10b   :  { %2292 = vmatpush1.bf16.msra.mxu0 %v10234_v41  ;;  %2319 = vmatprep.mubr.bf16.mxu0 %v12807_v25  ;;  %v12830_v41 = vld [vmem:[#allocation15_spill] sm:$0xff] }
 0x10c   :  { %2293 = vmatprep.subr.bf16.mxu0 %v10239_v43  ;;  %v12831_v43 = vld [vmem:[#allocation16_spill] sm:$0xff] }
 0x10f   :  { %2294 = vmatpush1.bf16.msra.mxu0 %v12818_v45  ;;  %v9186_v45 = vld [vmem:[%s12726_s1 + $0x30] ss:$8 sps:$4 sm:$0xff]  }
 0x110   :  { %2295 = vmatprep.subr.bf16.mxu0 %v12819_v48  ;;  %v9194_v48 = vld [vmem:[%s12726_s1 + $0x44] ss:$8 sps:$4 sm:$0xff]  }
 0x113   :  { %2296 = vmatpush1.bf16.msra.mxu0 %v12820_v49  ;;  %v9192_v49 = vld [vmem:[%s12726_s1 + $0x40] ss:$8 sps:$4 sm:$0xff]  }
 0x114   :  { %2297 = vmatprep.subr.bf16.mxu0 %v12821_v50  ;;  %v9200_v50 = vld [vmem:[%s12726_s1 + $0x54] ss:$8 sps:$4 sm:$0xff]  }
 0x117   :  { %2298 = vmatpush1.bf16.msra.mxu0 %v12822_v52  ;;  %v9198_v52 = vld [vmem:[%s12726_s1 + $0x50] ss:$8 sps:$4 sm:$0xff]  }
 0x118   :  { %2299 = vmatprep.subr.bf16.mxu0 %v12823_v53  ;;  %v9206_v53 = vld [vmem:[%s12726_s1 + $0x64] ss:$8 sps:$4 sm:$0xff]  }
 0x11b   :  { %2300 = vmatpush1.bf16.msra.mxu0 %v12824_v54 }
 0x11c   :  { %2301 = vmatprep.subr.bf16.mxu0 %v12825_v57 }
 0x11f   :  { %2302 = vmatpush1.bf16.msra.mxu0 %v12826_v59  ;;  %v9204_v59 = vld [vmem:[%s12726_s1 + $0x60] ss:$8 sps:$4 sm:$0xff]  }
 0x120   :  { %2450 = vmatprep.subr.bf16.mxu0 %v12827_v60 }
 0x122   :  { %2320 = vmatmul.mubr.bf16.vlgmr.msra.gmra.mrb[8].mxu0 %v2189_v58 }
 0x123   :  { %2451 = vmatpush1.bf16.msra.mxu0 %v12828_v63  ;;  %2329 = vmatprep.mubr.bf16.mxu0 %v12807_v25  ;;  %v9212_v63 = vld [vmem:[%s12726_s1 + $0x74] ss:$8 sps:$4 sm:$0xff]  }
 0x124   :  { %2452 = vmatprep.subr.bf16.mxu0 %v10320_v51  ;;  %v12837_v51 = vld [vmem:[#allocation22_spill] sm:$0xff] }
 0x127   :  { %2453 = vmatpush1.bf16.msra.mxu0 %v12829_v40 }
 0x128   :  { %2454 = vmatprep.subr.bf16.mxu0 %v12830_v41  ;;  %v9210_v41 = vld [vmem:[%s12726_s1 + $0x70] ss:$8 sps:$4 sm:$0xff]  }
 0x12a   :  { %2330 = vmatmul.mubr.bf16.gmra.mrb[12].mxu0 %v2190_v24 }
 0x12b   :  { %2455 = vmatpush1.bf16.msra.mxu0 %v12831_v43  ;;  %2482 = vmatprep.mubr.bf16.mxu0 %v12807_v25  ;;  %v7964_v43 = vld [vmem:[%s12727_s0 + $0x40] sm:$0xff] }
 0x12c   :  { %2456 = vmatprep.subr.bf16.mxu0 %v12832_v18  ;;  %v7965_v18 = vld [vmem:[%s12727_s0 + $0x48] sm:$0xff] }
 0x12f   :  { %2457 = vmatpush1.bf16.msra.mxu0 %v12833_v27  ;;  %v9218_v27 = vld [vmem:[%s12726_s1 + $0x104] ss:$8 sps:$4 sm:$0xff]  }
 0x130   :  { %2458 = vmatprep.subr.bf16.mxu0 %v12834_v1 }
 0x133   :  { %2459 = vmatpush1.bf16.msra.mxu0 %v12835_v62 }
 0x134   :  { %2460 = vmatprep.subr.bf16.mxu0 %v12836_v47 }
 0x137   :  { %2461 = vmatpush1.bf16.msra.mxu0 %v12837_v51  ;;  %v3371_v51 = vpack.c.bf16 %v7965_v18, %v7964_v43  ;;  %v9258_v43 = vld [vmem:[%s12726_s1 + $0x170] ss:$8 sps:$4 sm:$0xff]   ;;  %v9263_v18 = vld [vmem:[%s12728_s3 + $0x44] ss:$8 sps:$4 sm:$0xff]  }
 0x138   :  { %2462 = vmatprep.subr.bf16.mxu0 %v12838_v0 }
 0x13b   :  { %2463 = vmatpush1.bf16.msra.mxu0 %v12839_v3 }
 0x13c   :  { %2464 = vmatprep.subr.bf16.mxu0 %v10400_v61  ;;  %v7784_v61 = vld [vmem:[%s12727_s0 + $0x34] sm:$0xff] }
 0x13f   :  { %2465 = vmatpush1.bf16.msra.mxu0 %v10406_v46  ;;  %v7785_v46 = vld [vmem:[%s12727_s0 + $0x3c] sm:$0xf] }
 0x140   :  { %3491 = vmatprep.subr.bf16.mxu0 %v9155_v5  ;;  %v2353_v11 = vpack.c.bf16 %v7785_v46, %v7784_v61  ;;  %v9216_v5 = vld [vmem:[%s12726_s1 + $0x100] ss:$8 sps:$4 sm:$0xff]  }
 0x142   :  { %2483 = vmatmul.mubr.bf16.vlgmr.msra.gmra.mrb[8].mxu0 %v2352_v6 }
 0x143   :  { %3492 = vmatpush1.bf16.msra.mxu0 %v9153_v7  ;;  %2492 = vmatprep.mubr.bf16.mxu0 %v12807_v25  ;;  %v9224_v7 = vld [vmem:[%s12726_s1 + $0x114] ss:$8 sps:$4 sm:$0xff]  }
 0x144   :  { %3493 = vmatprep.subr.bf16.mxu0 %v9158_v8 }
 0x147   :  { %3494 = vmatpush1.bf16.msra.mxu0 %v9156_v9 }
 0x148   :  { %3495 = vmatprep.subr.bf16.mxu0 %v9161_v10 }
 0x14a   :  { %2493 = vmatmul.mubr.bf16.gmra.mrb[12].mxu0 %v2353_v11 }
 0x14b   :  { %3496 = vmatpush1.bf16.msra.mxu0 %v9159_v12  ;;  %3523 = vmatprep.mubr.bf16.mxu0 %v12807_v25  ;;  %v9222_v12 = vld [vmem:[%s12726_s1 + $0x110] ss:$8 sps:$4 sm:$0xff]  }
 0x14c   :  { %3497 = vmatprep.subr.bf16.mxu0 %v9164_v13  ;;  %v7966_v13 = vld [vmem:[%s12727_s0 + $0x50] sm:$0xff] }
 0x14f   :  { %3498 = vmatpush1.bf16.msra.mxu0 %v9162_v14  ;;  %v7967_v14 = vld [vmem:[%s12727_s0 + $0x58] sm:$0xf] }
 0x150   :  { %3499 = vmatprep.subr.bf16.mxu0 %v9167_v15  ;;  %v9230_v15 = vld [vmem:[%s12726_s1 + $0x124] ss:$8 sps:$4 sm:$0xff]  }
 0x153   :  { %3500 = vmatpush1.bf16.msra.mxu0 %v9165_v16 }
 0x154   :  { %3501 = vmatprep.subr.bf16.mxu0 %v9170_v19 }
 0x157   :  { %3502 = vmatpush1.bf16.msra.mxu0 %v9168_v21  ;;  %v3372_v21 = vpack.c.bf16 %v7967_v14, %v7966_v13  ;;  %v9279_v13 = vld [vmem:[%s12728_s3 + $0x70] ss:$8 sps:$4 sm:$0xff]  }
 0x158   :  { %3503 = vmatprep.subr.bf16.mxu0 %v9173_v22  ;;  %v9282_v14 = vld [vmem:[%s12726_s1 + $0x1b0] ss:$8 sps:$4 sm:$0xff]  }
 0x15b   :  { %3504 = vmatpush1.bf16.msra.mxu0 %v9171_v23 }
 0x15c   :  { %3505 = vmatprep.subr.bf16.mxu0 %v9176_v26  ;;  %v9228_v26 = vld [vmem:[%s12726_s1 + $0x120] ss:$8 sps:$4 sm:$0xff]  }
 0x15f   :  { %3506 = vmatpush1.bf16.msra.mxu0 %v9174_v28 }
 0x160   :  { %3624 = vmatprep.subr.bf16.mxu0 %v9179_v29  ;;  %v9236_v29 = vld [vmem:[%s12726_s1 + $0x134] ss:$8 sps:$4 sm:$0xff]  }
 0x162   :  { %3524 = vmatmul.mubr.bf16.vlgmr.msra.gmra.mrb[16].mxu0 %v3393_v32 }
 0x163   :  { %3625 = vmatpush1.bf16.msra.mxu0 %v9177_v33  ;;  %3533 = vmatprep.mubr.bf16.mxu0 %v12807_v25 }
 0x164   :  { %3626 = vmatprep.subr.bf16.mxu0 %v9182_v34  ;;  %v9234_v34 = vld [vmem:[%s12726_s1 + $0x130] ss:$8 sps:$4 sm:$0xff]  }
 0x167   :  { %3627 = vmatpush1.bf16.msra.mxu0 %v9180_v35 }
 0x168   :  { %3628 = vmatprep.subr.bf16.mxu0 %v9185_v36 }
 0x16a   :  { %3534 = vmatmul.mubr.bf16.gmra.mrb[20].mxu0 %v3394_v39 }
 0x16b   :  { %3629 = vmatpush1.bf16.msra.mxu0 %v9183_v42  ;;  %3656 = vmatprep.mubr.bf16.mxu0 %v12807_v25 }
 0x16c   :  { %3630 = vmatprep.subr.bf16.mxu0 %v9188_v44 }
 0x16f   :  { %3631 = vmatpush1.bf16.msra.mxu0 %v9186_v45  ;;  %v9237_v45 = vld [vmem:[%s12728_s3] ss:$8 sps:$4 sm:$0xff]  }
 0x170   :  { %3632 = vmatprep.subr.bf16.mxu0 %v9194_v48 }
 0x173   :  { %3633 = vmatpush1.bf16.msra.mxu0 %v9192_v49 }
 0x174   :  { %3634 = vmatprep.subr.bf16.mxu0 %v9200_v50 }
 0x175   :  { %v820_v54 = vpop.f32.mrb[0].mxu0 }
 0x176   :  { %v822_v55 = vpop.f32.mrb[1].mxu0 }
 0x177   :  { %v847_v57 = vmax.f32 %v820_v54, %v822_v55  ;;  %v824_v58 = vpop.f32.mrb[2].mxu0  ;;  %3635 = vmatpush1.bf16.msra.mxu0 %v9198_v52  ;;  %v9240_v52 = vld [vmem:[%s12726_s1 + $0x140] ss:$8 sps:$4 sm:$0xff]   ;;  %v9248_v55 = vld [vmem:[%s12726_s1 + $0x154] ss:$8 sps:$4 sm:$0xff]  }
 0x178   :  { %v826_v60 = vpop.f32.mrb[3].mxu0  ;;  %3636 = vmatprep.subr.bf16.mxu0 %v9206_v53  ;;  %v9245_v53 = vld [vmem:[%s12728_s3 + $0x14] ss:$8 sps:$4 sm:$0xff]  }
 0x179   :  { %v858_v17 = vadd.f32 %v7508_v56, %v847_v57  ;;  %v848_v20 = vmax.f32 %v824_v58, %v826_v60  ;;  %v9243_v58 = vld [vmem:[%s12728_s3 + $0x10] ss:$8 sps:$4 sm:$0xff]   ;;  %v9251_v60 = vld [vmem:[%s12728_s3 + $0x24] ss:$8 sps:$4 sm:$0xff]  }
 0x17b   :  { %v862_v24 = vmax.f32 %v858_v17, 0.0  ;;  %v859_v40 = vadd.f32 %v7508_v56, %v848_v20  ;;  %3637 = vmatpush1.bf16.msra.mxu0 %v9204_v59  ;;  %v9246_v59 = vld [vmem:[%s12726_s1 + $0x150] ss:$8 sps:$4 sm:$0xff]   ;;  %v9249_v17 = vld [vmem:[%s12728_s3 + $0x20] ss:$8 sps:$4 sm:$0xff]  }
 0x17c   :  { %3638 = vmatprep.subr.bf16.mxu0 %v9212_v63  ;;  %v9254_v63 = vld [vmem:[%s12726_s1 + $0x164] ss:$8 sps:$4 sm:$0xff]   ;;  %v9252_v20 = vld [vmem:[%s12726_s1 + $0x160] ss:$8 sps:$4 sm:$0xff]  }
 0x17d   :  { %v863_v1 = vmax.f32 %v859_v40, 0.0  ;;  %v830_v62 = vpop.f32.mrb[4].mxu0  ;;  %v871_v0 = vrot.slane %v862_v24, 1  ;;  %v9260_v40 = vld [vmem:[%s12726_s1 + $0x174] ss:$8 sps:$4 sm:$0xff]  }
 0x17e   :  { %v832_v47 = vpop.f32.mrb[5].mxu0 }
 0x17f   :  { %v872_v2 = vrot.slane %v863_v1, 1  ;;  %v849_v3 = vmax.f32 %v830_v62, %v832_v47  ;;  %v834_v4 = vpop.f32.mrb[6].mxu0  ;;  %3639 = vmatpush1.bf16.msra.mxu0 %v9210_v41  ;;  %v9255_v41 = vld [vmem:[%s12728_s3 + $0x30] ss:$8 sps:$4 sm:$0xff]   ;;  %v9266_v62 = vld [vmem:[%s12726_s1 + $0x184] ss:$8 sps:$4 sm:$0xff]  }
 0x180   :  { %v836_v6 = vpop.f32.mrb[7].mxu0  ;;  %3779 = vmatprep.subr.bf16.mxu0 %v9218_v27  ;;  %v8020_v27 = vld [vmem:[%s12727_s0 + $0x42] sm:$0xff] }
 0x181   :  { %v873_v8 = vsel %vm870_vm0, %v871_v0, %v872_v2  ;;  %v860_v9 = vadd.f32 %v7508_v56, %v849_v3  ;;  %v850_v61 = vmax.f32 %v834_v4, %v836_v6  ;;  %v9261_v47 = vld [vmem:[%s12728_s3 + $0x40] ss:$8 sps:$4 sm:$0xff]   ;;  %v9272_v3 = vld [vmem:[%s12726_s1 + $0x194] ss:$8 sps:$4 sm:$0xff]   ;;  %v9267_v4 = vld [vmem:[%s12728_s3 + $0x50] ss:$8 sps:$4 sm:$0xff]  }
 0x182   :  { %v882_v46 = vmax.f32 %v862_v24, %v873_v8  ;;  %3657 = vmatmul.mubr.bf16.vlgmr.msra.gmra.mrb[16].mxu0 %v3371_v51  ;;  %v9257_v24 = vld [vmem:[%s12728_s3 + $0x34] ss:$8 sps:$4 sm:$0xff]   ;;  %v9264_v0 = vld [vmem:[%s12726_s1 + $0x180] ss:$8 sps:$4 sm:$0xff]   ;;  %v9275_v6 = vld [vmem:[%s12728_s3 + $0x64] ss:$8 sps:$4 sm:$0xff]  }
 0x183   :  { %v864_v10 = vmax.f32 %v860_v9, 0.0  ;;  %v861_v11 = vadd.f32 %v7508_v56, %v850_v61  ;;  %3780 = vmatpush1.bf16.msra.mxu0 %v9216_v5  ;;  %3666 = vmatprep.mubr.bf16.mxu0 %v12807_v25  ;;  %v9270_v5 = vld [vmem:[%s12726_s1 + $0x190] ss:$8 sps:$4 sm:$0xff]   ;;  %v9278_v9 = vld [vmem:[%s12726_s1 + $0x1a4] ss:$8 sps:$4 sm:$0xff]  }
 0x184   :  { %3781 = vmatprep.subr.bf16.mxu0 %v9224_v7  ;;  %v8022_v7 = vld [vmem:[%s12727_s0 + $0x52] sm:$0xff]  ;;  %v8023_v8 = vld [vmem:[%s12727_s0 + $0x5a] sm:$0xf]  ;;  %v9273_v61 = vld [vmem:[%s12728_s3 + $0x60] ss:$8 sps:$4 sm:$0xff]  }
 0x185   :  { %v874_v16 = vrot.slane %v864_v10, 1  ;;  %v865_v19 = vmax.f32 %v861_v11, 0.0  ;;  %v9281_v11 = vld [vmem:[%s12728_s3 + $0x74] ss:$8 sps:$4 sm:$0xff]  }
 0x187   :  { %v875_v22 = vsel %vm870_vm0, %v872_v2, %v874_v16  ;;  %v876_v23 = vrot.slane %v865_v19, 1  ;;  %3782 = vmatpush1.bf16.msra.mxu0 %v9222_v12  ;;  %v9269_v2 = vld [vmem:[%s12728_s3 + $0x54] ss:$8 sps:$4 sm:$0xff]  }
 0x188   :  { %v10771_v28 = vmax.f32 %v863_v1, %v875_v22  ;;  %3783 = vmatprep.subr.bf16.mxu0 %v9230_v15  ;;  %v8021_v1 = vld [vmem:[%s12727_s0 + $0x4a] sm:$0xff]  ;;  %v9284_v12 = vld [vmem:[%s12726_s1 + $0x1b4] ss:$8 sps:$4 sm:$0xff]  }
 0x189   :  { %v877_v30 = vsel %vm870_vm0, %v874_v16, %v876_v23  ;;  %v10777_v31 = vmax.f32 %v865_v19, %v876_v23  ;;  %v3681_v51 = vpack.c.bf16 %v8021_v1, %v8020_v27  ;;  %v9287_v15 = vld [vmem:[%s12728_s3 + $0x104] ss:$8 sps:$4 sm:$0xff]   ;;  %v9285_v19 = vld [vmem:[%s12728_s3 + $0x100] ss:$8 sps:$4 sm:$0xff]   ;;  %v9293_v22 = vld [vmem:[%s12728_s3 + $0x114] ss:$8 sps:$4 sm:$0xff]  }
 0x18a   :  { %v10780_v32 = vpack.c.bf16 %v10771_v28, %v882_v46  ;;  %v10782_v33 = vmax.f32 %v864_v10, %v877_v30  ;;  %3667 = vmatmul.mubr.bf16.gmra.mrb[20].mxu0 %v3372_v21  ;;  %v3682_v46 = vpack.c.bf16 %v8023_v8, %v8022_v7  ;;  %v9276_v10 = vld [vmem:[%s12726_s1 + $0x1a0] ss:$8 sps:$4 sm:$0xff]   ;;  %v9290_v16 = vld [vmem:[%s12726_s1 + $0x1c4] ss:$8 sps:$4 sm:$0xff]   ;;  %v9296_v23 = vld [vmem:[%s12726_s1 + $0x1d4] ss:$8 sps:$4 sm:$0xff]  }
 0x18b   :  { %3784 = vmatpush1.bf16.msra.mxu0 %v9228_v26  ;;  %3811 = vmatprep.mubr.bf16.mxu0 %v12807_v25  ;;  %v9288_v21 = vld [vmem:[%s12726_s1 + $0x1c0] ss:$8 sps:$4 sm:$0xff]   ;;  %v9291_v26 = vld [vmem:[%s12728_s3 + $0x110] ss:$8 sps:$4 sm:$0xff]   ;;  %v9299_v30 = vld [vmem:[%s12728_s3 + $0x124] ss:$8 sps:$4 sm:$0xff]  }
 0x18c   :  { %v1351_v35 = vpack.c.bf16 %v10777_v31, %v10782_v33  ;;  %3785 = vmatprep.subr.bf16.mxu0 %v9236_v29  ;;  %v10792_v36 = vpack.c.bf16 %v10782_v33, %v10782_v33  ;;  %v924_v38 = vrot.slane %v10780_v32, 1  ;;  %v1209_v39 = vrot.slane %v10780_v32, 2  ;;  %v9294_v29 = vld [vmem:[%s12726_s1 + $0x1d0] ss:$8 sps:$4 sm:$0xff]   ;;  %v9324_v27 = vld [vmem:[%s12726_s1 + $0x220] ss:$8 sps:$4 sm:$0xff]  }
 0x18d   :  { %v1513_v42 = vpack.c.bf16 %v10782_v33, %v10771_v28  ;;  %v1371_v50 = vrot.slane %v10780_v32, 3  ;;  %v9329_v1 = vld [vmem:[%s12728_s3 + $0x174] ss:$8 sps:$4 sm:$0xff]   ;;  %v9339_v7 = vld [vmem:[%s12728_s3 + $0x190] ss:$8 sps:$4 sm:$0xff]  }
 0x18e   :  { %v10801_v44 = vrot.slane %v1351_v35, 3  ;;  %v925_v48 = vrot.slane %v10792_v36, 1  ;;  %v1210_v49 = vrot.slane %v10792_v36, 2  ;;  %v9300_v35 = vld [vmem:[%s12726_s1 + $0x1e0] ss:$8 sps:$4 sm:$0xff]  }
 0x18f   :  { %3786 = vmatpush1.bf16.msra.mxu0 %v9234_v34  ;;  %v9297_v34 = vld [vmem:[%s12728_s3 + $0x120] ss:$8 sps:$4 sm:$0xff]   ;;  %v9342_v8 = vld [vmem:[%s12726_s1 + $0x250] ss:$8 sps:$4 sm:$0xff]   ;;  %v9446_v28 = vld [vmem:[%s12726_s1 + $0x64] ss:$8 sps:$4 sm:$0xff]  }
 0x190   :  { %v926_v54 = vsel %vm870_vm0, %v924_v38, %v925_v48  ;;  %3787 = vmatprep.subr.bf16.mxu0 %v9242_v37  ;;  %v10822_v56 = vsel %vm1208_vm1, %v1209_v39, %v1210_v49  ;;  %v10826_v57 = vsel %vm1370_vm2, %v1371_v50, %v10801_v44  ;;  %v9305_v37 = vld [vmem:[%s12728_s3 + $0x134] ss:$8 sps:$4 sm:$0xff]   ;;  %v9303_v39 = vld [vmem:[%s12728_s3 + $0x130] ss:$8 sps:$4 sm:$0xff]   ;;  %v8056_v50 = vld [vmem:[%s12727_s0 + $0x43] sm:$0xff] }
 0x191   :  { %1042 = vmatmul.mubr.bf16.vlgmr.msra.gmra.mrb[0].mxu1 %v926_v54  ;;  %v9308_v38 = vld [vmem:[%s12726_s1 + $0x1f4] ss:$8 sps:$4 sm:$0xff]   ;;  %v9309_v54 = vld [vmem:[%s12728_s3 + $0x140] ss:$8 sps:$4 sm:$0xff]  }
 0x192   :  { %1141 = vmatpush1.bf16.msra.mxu1 %v9237_v45  ;;  %1051 = vmatprep.mubr.bf16.mxu1 %v12807_v25  ;;  %v9306_v45 = vld [vmem:[%s12726_s1 + $0x1f0] ss:$8 sps:$4 sm:$0xff]  }
 0x193   :  { %3788 = vmatpush1.bf16.msra.mxu0 %v9240_v52  ;;  %1142 = vmatprep.subr.bf16.mxu1 %v9245_v53  ;;  %v8057_v52 = vld [vmem:[%s12727_s0 + $0x4b] sm:$0xff] }
 0x194   :  { %3789 = vmatprep.subr.bf16.mxu0 %v9248_v55  ;;  %v9314_v53 = vld [vmem:[%s12726_s1 + $0x204] ss:$8 sps:$4 sm:$0xff]   ;;  %v3844_v55 = vpack.c.bf16 %v8057_v52, %v8056_v50  ;;  %v9375_v50 = vld [vmem:[%s12728_s3 + $0x1f0] ss:$8 sps:$4 sm:$0xff]  }
 0x195   :  { %v9378_v52 = vld [vmem:[%s12726_s1 + $0xb0] ss:$8 sps:$4 sm:$0xff]  }
 0x196   :  { %1143 = vmatpush1.bf16.msra.mxu1 %v9243_v58  ;;  %v9312_v58 = vld [vmem:[%s12726_s1 + $0x200] ss:$8 sps:$4 sm:$0xff]  }
 0x197   :  { %3790 = vmatpush1.bf16.msra.mxu0 %v9246_v59  ;;  %1144 = vmatprep.subr.bf16.mxu1 %v9251_v60  ;;  %v9317_v59 = vld [vmem:[%s12728_s3 + $0x154] ss:$8 sps:$4 sm:$0xff]  }
 0x198   :  { %3791 = vmatprep.subr.bf16.mxu0 %v9254_v63  ;;  %v9320_v60 = vld [vmem:[%s12726_s1 + $0x214] ss:$8 sps:$4 sm:$0xff]   ;;  %v9315_v63 = vld [vmem:[%s12728_s3 + $0x150] ss:$8 sps:$4 sm:$0xff]  }
 0x199   :  { %1052 = vmatmul.mubr.bf16.gmra.mrb[4].mxu1 %v925_v48  ;;  %v9311_v48 = vld [vmem:[%s12728_s3 + $0x144] ss:$8 sps:$4 sm:$0xff]  }
 0x19a   :  { %1145 = vmatpush1.bf16.msra.mxu1 %v9249_v17  ;;  %1172 = vmatprep.mubr.bf16.mxu1 %v12807_v25  ;;  %v9318_v17 = vld [vmem:[%s12726_s1 + $0x210] ss:$8 sps:$4 sm:$0xff]  }
 0x19b   :  { %3792 = vmatpush1.bf16.msra.mxu0 %v9252_v20  ;;  %1146 = vmatprep.subr.bf16.mxu1 %v9257_v24  ;;  %v9323_v20 = vld [vmem:[%s12728_s3 + $0x164] ss:$8 sps:$4 sm:$0xff]   ;;  %v8058_v24 = vld [vmem:[%s12727_s0 + $0x53] sm:$0xff] }
 0x19c   :  { %3793 = vmatprep.subr.bf16.mxu0 %v9260_v40  ;;  %v8059_v40 = vld [vmem:[%s12727_s0 + $0x5b] sm:$0xf] }
 0x19e   :  { %1147 = vmatpush1.bf16.msra.mxu1 %v9255_v41  ;;  %v9326_v41 = vld [vmem:[%s12726_s1 + $0x224] ss:$8 sps:$4 sm:$0xff]  }
 0x19f   :  { %3794 = vmatpush1.bf16.msra.mxu0 %v9258_v43  ;;  %1148 = vmatprep.subr.bf16.mxu1 %v9263_v18  ;;  %v9321_v43 = vld [vmem:[%s12728_s3 + $0x160] ss:$8 sps:$4 sm:$0xff]   ;;  %v3845_v18 = vpack.c.bf16 %v8059_v40, %v8058_v24 }
 0x1a0   :  { %3942 = vmatprep.subr.bf16.mxu0 %v9266_v62  ;;  %v9332_v62 = vld [vmem:[%s12726_s1 + $0x234] ss:$8 sps:$4 sm:$0xff]   ;;  %v9393_v24 = vld [vmem:[%s12728_s3 + $0x220] ss:$8 sps:$4 sm:$0xff]  }
 0x1a1   :  { %v9396_v40 = vld [vmem:[%s12726_s1 + $0xe0] ss:$8 sps:$4 sm:$0xff]  }
 0x1a2   :  { %1149 = vmatpush1.bf16.msra.mxu1 %v9261_v47  ;;  %3812 = vmatmul.mubr.bf16.vlgmr.msra.gmra.mrb[16].mxu0 %v3681_v51  ;;  %v9327_v47 = vld [vmem:[%s12728_s3 + $0x170] ss:$8 sps:$4 sm:$0xff]  }
 0x1a3   :  { %3943 = vmatpush1.bf16.msra.mxu0 %v9264_v0  ;;  %1150 = vmatprep.subr.bf16.mxu1 %v9269_v2  ;;  %v9330_v51 = vld [vmem:[%s12726_s1 + $0x230] ss:$8 sps:$4 sm:$0xff]   ;;  %v9335_v0 = vld [vmem:[%s12728_s3 + $0x184] ss:$8 sps:$4 sm:$0xff]  }
 0x1a4   :  { %3944 = vmatprep.subr.bf16.mxu0 %v9272_v3  ;;  %3821 = vmatprep.mubr.bf16.mxu0 %v12807_v25  ;;  %v9338_v2 = vld [vmem:[%s12726_s1 + $0x244] ss:$8 sps:$4 sm:$0xff]   ;;  %v9333_v3 = vld [vmem:[%s12728_s3 + $0x180] ss:$8 sps:$4 sm:$0xff]  }
 0x1a6   :  { %1151 = vmatpush1.bf16.msra.mxu1 %v9267_v4  ;;  %v9336_v4 = vld [vmem:[%s12726_s1 + $0x240] ss:$8 sps:$4 sm:$0xff]  }
 0x1a7   :  { %3945 = vmatpush1.bf16.msra.mxu0 %v9270_v5  ;;  %1152 = vmatprep.subr.bf16.mxu1 %v9275_v6  ;;  %v9341_v5 = vld [vmem:[%s12728_s3 + $0x194] ss:$8 sps:$4 sm:$0xff]  }
 0x1a8   :  { %3946 = vmatprep.subr.bf16.mxu0 %v9278_v9  ;;  %v9344_v6 = vld [vmem:[%s12726_s1 + $0x254] ss:$8 sps:$4 sm:$0xff]   ;;  %v9347_v9 = vld [vmem:[%s12728_s3 + $0x1a4] ss:$8 sps:$4 sm:$0xff]  }
 0x1aa   :  { %1153 = vmatpush1.bf16.msra.mxu1 %v9273_v61  ;;  %3822 = vmatmul.mubr.bf16.gmra.mrb[20].mxu0 %v3682_v46  ;;  %v9345_v61 = vld [vmem:[%s12728_s3 + $0x1a0] ss:$8 sps:$4 sm:$0xff]  }
 0x1ab   :  { %3947 = vmatpush1.bf16.msra.mxu0 %v9276_v10  ;;  %1154 = vmatprep.subr.bf16.mxu1 %v9281_v11  ;;  %v9348_v46 = vld [vmem:[%s12726_s1 + $0x260] ss:$8 sps:$4 sm:$0xff]   ;;  %v9353_v10 = vld [vmem:[%s12728_s3 + $0x1b4] ss:$8 sps:$4 sm:$0xff]  }
 0x1ac   :  { %3948 = vmatprep.subr.bf16.mxu0 %v9284_v12  ;;  %3974 = vmatprep.mubr.bf16.mxu0 %v12807_v25  ;;  %v9356_v11 = vld [vmem:[%s12726_s1 + $0x274] ss:$8 sps:$4 sm:$0xff]   ;;  %v9351_v12 = vld [vmem:[%s12728_s3 + $0x1b0] ss:$8 sps:$4 sm:$0xff]  }
 0x1ae   :  { %1155 = vmatpush1.bf16.msra.mxu1 %v9279_v13  ;;  %v9354_v13 = vld [vmem:[%s12726_s1 + $0x270] ss:$8 sps:$4 sm:$0xff]  }
 0x1af   :  { %3949 = vmatpush1.bf16.msra.mxu0 %v9282_v14  ;;  %1294 = vmatprep.subr.bf16.mxu1 %v9287_v15  ;;  %v9359_v14 = vld [vmem:[%s12728_s3 + $0x1c4] ss:$8 sps:$4 sm:$0xff]  }
 0x1b0   :  { %3950 = vmatprep.subr.bf16.mxu0 %v9290_v16  ;;  %v9362_v15 = vld [vmem:[%s12726_s1 + $0x84] ss:$8 sps:$4 sm:$0xff]   ;;  %v9357_v16 = vld [vmem:[%s12728_s3 + $0x1c0] ss:$8 sps:$4 sm:$0xff]  }
 0x1b1   :  { %1173 = vmatmul.mubr.bf16.vlgmr.msra.gmra.mrb[0].mxu1 %v10780_v32  ;;  %v9302_v32 = vld [vmem:[%s12726_s1 + $0x1e4] ss:$8 sps:$4 sm:$0xff]  }
 0x1b2   :  { %1295 = vmatpush1.bf16.msra.mxu1 %v9285_v19  ;;  %1182 = vmatprep.mubr.bf16.mxu1 %v12807_v25 }
 0x1b3   :  { %3951 = vmatpush1.bf16.msra.mxu0 %v9288_v21  ;;  %1296 = vmatprep.subr.bf16.mxu1 %v9293_v22  ;;  %v9360_v21 = vld [vmem:[%s12726_s1 + $0x80] ss:$8 sps:$4 sm:$0xff]   ;;  %v9365_v22 = vld [vmem:[%s12728_s3 + $0x1d4] ss:$8 sps:$4 sm:$0xff]  }
 0x1b4   :  { %3952 = vmatprep.subr.bf16.mxu0 %v9296_v23  ;;  %v9368_v23 = vld [vmem:[%s12726_s1 + $0x94] ss:$8 sps:$4 sm:$0xff]  }
 0x1b6   :  { %1297 = vmatpush1.bf16.msra.mxu1 %v9291_v26  ;;  %v9363_v26 = vld [vmem:[%s12728_s3 + $0x1d0] ss:$8 sps:$4 sm:$0xff]  }
 0x1b7   :  { %3953 = vmatpush1.bf16.msra.mxu0 %v9294_v29  ;;  %1298 = vmatprep.subr.bf16.mxu1 %v9299_v30  ;;  %v9366_v29 = vld [vmem:[%s12726_s1 + $0x90] ss:$8 sps:$4 sm:$0xff]   ;;  %v9371_v30 = vld [vmem:[%s12728_s3 + $0x1e4] ss:$8 sps:$4 sm:$0xff]  }
 0x1b8   :  { %3954 = vmatprep.subr.bf16.mxu0 %v9302_v32  ;;  %v8094_v32 = vld [vmem:[%s12727_s0 + $0x54] sm:$0xff] }
 0x1b9   :  { %1183 = vmatmul.mubr.bf16.gmra.mrb[4].mxu1 %v10792_v36  ;;  %v8092_v36 = vld [vmem:[%s12727_s0 + $0x44] sm:$0xff] }
 0x1ba   :  { %1299 = vmatpush1.bf16.msra.mxu1 %v9297_v34  ;;  %1326 = vmatprep.mubr.bf16.mxu1 %v12807_v25  ;;  %v8095_v34 = vld [vmem:[%s12727_s0 + $0x5c] sm:$0xf] }
 0x1bb   :  { %3955 = vmatpush1.bf16.msra.mxu0 %v9300_v35  ;;  %1300 = vmatprep.subr.bf16.mxu1 %v9305_v37  ;;  %v9374_v35 = vld [vmem:[%s12726_s1 + $0xa4] ss:$8 sps:$4 sm:$0xff]   ;;  %v9369_v37 = vld [vmem:[%s12728_s3 + $0x1e0] ss:$8 sps:$4 sm:$0xff]  }
 0x1bc   :  { %3956 = vmatprep.subr.bf16.mxu0 %v9308_v38  ;;  %v4008_v38 = vpack.c.bf16 %v8095_v34, %v8094_v32 }
 0x1be   :  { %1301 = vmatpush1.bf16.msra.mxu1 %v9303_v39  ;;  %v9372_v39 = vld [vmem:[%s12726_s1 + $0xa0] ss:$8 sps:$4 sm:$0xff]  }
 0x1bf   :  { %3957 = vmatpush1.bf16.msra.mxu0 %v9306_v45  ;;  %1302 = vmatprep.subr.bf16.mxu1 %v9311_v48  ;;  %v9377_v45 = vld [vmem:[%s12728_s3 + $0x1f4] ss:$8 sps:$4 sm:$0xff]  }
 0x1c0   :  { %4105 = vmatprep.subr.bf16.mxu0 %v9314_v53  ;;  %v9380_v48 = vld [vmem:[%s12726_s1 + $0xb4] ss:$8 sps:$4 sm:$0xff]   ;;  %v9383_v53 = vld [vmem:[%s12728_s3 + $0x204] ss:$8 sps:$4 sm:$0xff]  }
 0x1c2   :  { %1303 = vmatpush1.bf16.msra.mxu1 %v9309_v54  ;;  %3975 = vmatmul.mubr.bf16.vlgmr.msra.gmra.mrb[16].mxu0 %v3844_v55  ;;  %v9386_v54 = vld [vmem:[%s12726_s1 + $0xc4] ss:$8 sps:$4 sm:$0xff]   ;;  %v9381_v55 = vld [vmem:[%s12728_s3 + $0x200] ss:$8 sps:$4 sm:$0xff]  }
 0x1c3   :  { %4106 = vmatpush1.bf16.msra.mxu0 %v9312_v58  ;;  %1304 = vmatprep.subr.bf16.mxu1 %v9317_v59  ;;  %v9384_v58 = vld [vmem:[%s12726_s1 + $0xc0] ss:$8 sps:$4 sm:$0xff]   ;;  %v9389_v59 = vld [vmem:[%s12728_s3 + $0x214] ss:$8 sps:$4 sm:$0xff]  }
 0x1c4   :  { %4107 = vmatprep.subr.bf16.mxu0 %v9320_v60  ;;  %3984 = vmatprep.mubr.bf16.mxu0 %v12807_v25  ;;  %v9392_v60 = vld [vmem:[%s12726_s1 + $0xd4] ss:$8 sps:$4 sm:$0xff]  }
 0x1c6   :  { %1305 = vmatpush1.bf16.msra.mxu1 %v9315_v63  ;;  %v9387_v63 = vld [vmem:[%s12728_s3 + $0x210] ss:$8 sps:$4 sm:$0xff]  }
 0x1c7   :  { %4108 = vmatpush1.bf16.msra.mxu0 %v9318_v17  ;;  %1306 = vmatprep.subr.bf16.mxu1 %v9323_v20  ;;  %v9390_v17 = vld [vmem:[%s12726_s1 + $0xd0] ss:$8 sps:$4 sm:$0xff]   ;;  %v9395_v20 = vld [vmem:[%s12728_s3 + $0x224] ss:$8 sps:$4 sm:$0xff]  }
 0x1c8   :  { %4109 = vmatprep.subr.bf16.mxu0 %v9326_v41  ;;  %v9401_v41 = vld [vmem:[%s12728_s3 + $0x234] ss:$8 sps:$4 sm:$0xff]  }
 0x1ca   :  { %1307 = vmatpush1.bf16.msra.mxu1 %v9321_v43  ;;  %3985 = vmatmul.mubr.bf16.gmra.mrb[20].mxu0 %v3845_v18  ;;  %v9404_v43 = vld [vmem:[%s12726_s1 + $0xf4] ss:$8 sps:$4 sm:$0xff]   ;;  %v9399_v18 = vld [vmem:[%s12728_s3 + $0x230] ss:$8 sps:$4 sm:$0xff]  }
 0x1cb   :  { %4110 = vmatpush1.bf16.msra.mxu0 %v9324_v27  ;;  %1308 = vmatprep.subr.bf16.mxu1 %v9329_v1  ;;  %v9402_v27 = vld [vmem:[%s12726_s1 + $0xf0] ss:$8 sps:$4 sm:$0xff]   ;;  %v9407_v1 = vld [vmem:[%s12728_s3 + $0x244] ss:$8 sps:$4 sm:$0xff]  }
 0x1cc   :  { %4111 = vmatprep.subr.bf16.mxu0 %v9332_v62  ;;  %4137 = vmatprep.mubr.bf16.mxu0 %v12807_v25  ;;  %v8279_v62 = vld [vmem:[%s12727_s0 + $0x69] sm:$0xff] }
 0x1ce   :  { %1309 = vmatpush1.bf16.msra.mxu1 %v9327_v47  ;;  %v9410_v47 = vld [vmem:[%s12726_s1 + $0x4] ss:$8 sps:$4 sm:$0xff]  }
 0x1cf   :  { %4112 = vmatpush1.bf16.msra.mxu0 %v9330_v51  ;;  %1456 = vmatprep.subr.bf16.mxu1 %v9335_v0  ;;  %v9405_v51 = vld [vmem:[%s12728_s3 + $0x240] ss:$8 sps:$4 sm:$0xff]  }
 0x1d0   :  { %4113 = vmatprep.subr.bf16.mxu0 %v9338_v2  ;;  %v9408_v2 = vld [vmem:[%s12726_s1] ss:$8 sps:$4 sm:$0xff]  }
 0x1d1   :  { %1327 = vmatmul.mubr.bf16.vlgmr.msra.gmra.mrb[0].mxu1 %v10822_v56  ;;  %v9350_v56 = vld [vmem:[%s12726_s1 + $0x264] ss:$8 sps:$4 sm:$0xff]  }
 0x1d2   :  { %1457 = vmatpush1.bf16.msra.mxu1 %v9333_v3  ;;  %1336 = vmatprep.mubr.bf16.mxu1 %v12807_v25  ;;  %v9413_v3 = vld [vmem:[%s12728_s3 + $0x254] ss:$8 sps:$4 sm:$0xff]  }
 0x1d3   :  { %4114 = vmatpush1.bf16.msra.mxu0 %v9336_v4  ;;  %1458 = vmatprep.subr.bf16.mxu1 %v9341_v5  ;;  %v9416_v4 = vld [vmem:[%s12726_s1 + $0x14] ss:$8 sps:$4 sm:$0xff]   ;;  %v9411_v5 = vld [vmem:[%s12728_s3 + $0x250] ss:$8 sps:$4 sm:$0xff]  }
 0x1d4   :  { %4115 = vmatprep.subr.bf16.mxu0 %v9344_v6  ;;  %v9414_v6 = vld [vmem:[%s12726_s1 + $0x10] ss:$8 sps:$4 sm:$0xff]  }
 0x1d6   :  { %1459 = vmatpush1.bf16.msra.mxu1 %v9339_v7  ;;  %v9419_v7 = vld [vmem:[%s12728_s3 + $0x264] ss:$8 sps:$4 sm:$0xff]  }
 0x1d7   :  { %4116 = vmatpush1.bf16.msra.mxu0 %v9342_v8  ;;  %1460 = vmatprep.subr.bf16.mxu1 %v9347_v9  ;;  %v8280_v8 = vld [vmem:[%s12727_s0 + $0x71] sm:$0xff]  ;;  %v8281_v9 = vld [vmem:[%s12727_s0 + $0x79] sm:$0xf] }
 0x1d8   :  { %4117 = vmatprep.subr.bf16.mxu0 %v9350_v56  ;;  %v9422_v56 = vld [vmem:[%s12726_s1 + $0x24] ss:$8 sps:$4 sm:$0xff]  }
 0x1d9   :  { %1337 = vmatmul.mubr.bf16.gmra.mrb[4].mxu1 %v1210_v49  ;;  %v8093_v49 = vld [vmem:[%s12727_s0 + $0x4c] sm:$0xff] }
 0x1da   :  { %1461 = vmatpush1.bf16.msra.mxu1 %v9345_v61  ;;  %1488 = vmatprep.mubr.bf16.mxu1 %v12807_v25  ;;  %v4007_v19 = vpack.c.bf16 %v8093_v49, %v8092_v36  ;;  %v9417_v61 = vld [vmem:[%s12728_s3 + $0x260] ss:$8 sps:$4 sm:$0xff]   ;;  %v9431_v36 = vld [vmem:[%s12728_s3 + $0x84] ss:$8 sps:$4 sm:$0xff]  }
 0x1db   :  { %4118 = vmatpush1.bf16.msra.mxu0 %v9348_v46  ;;  %1462 = vmatprep.subr.bf16.mxu1 %v9353_v10  ;;  %v5049_v46 = vpack.c.bf16 %v8281_v9, %v8280_v8  ;;  %v9420_v10 = vld [vmem:[%s12726_s1 + $0x20] ss:$8 sps:$4 sm:$0xff]   ;;  %v9434_v49 = vld [vmem:[%s12726_s1 + $0x44] ss:$8 sps:$4 sm:$0xff]   ;;  %v8276_v8 = vld [vmem:[%s12727_s0 + $0x70] sm:$0xff] }
 0x1dc   :  { %4119 = vmatprep.subr.bf16.mxu0 %v9356_v11  ;;  %v9425_v11 = vld [vmem:[%s12728_s3 + $0x274] ss:$8 sps:$4 sm:$0xff]   ;;  %v8277_v9 = vld [vmem:[%s12727_s0 + $0x78] sm:$0xf] }
 0x1de   :  { %1463 = vmatpush1.bf16.msra.mxu1 %v9351_v12  ;;  %v9428_v12 = vld [vmem:[%s12726_s1 + $0x34] ss:$8 sps:$4 sm:$0xff]  }
 0x1df   :  { %4120 = vmatpush1.bf16.msra.mxu0 %v9354_v13  ;;  %1464 = vmatprep.subr.bf16.mxu1 %v9359_v14  ;;  %v9423_v13 = vld [vmem:[%s12728_s3 + $0x270] ss:$8 sps:$4 sm:$0xff]  }
 0x1e0   :  { %5146 = vmatprep.subr.bf16.mxu0 %v9362_v15  ;;  %v9426_v14 = vld [vmem:[%s12726_s1 + $0x30] ss:$8 sps:$4 sm:$0xff]   ;;  %v9429_v15 = vld [vmem:[%s12728_s3 + $0x80] ss:$8 sps:$4 sm:$0xff]  }
 0x1e2   :  { %1465 = vmatpush1.bf16.msra.mxu1 %v9357_v16  ;;  %4138 = vmatmul.mubr.bf16.vlgmr.msra.gmra.mrb[16].mxu0 %v4007_v19  ;;  %v9432_v16 = vld [vmem:[%s12726_s1 + $0x40] ss:$8 sps:$4 sm:$0xff]   ;;  %v9437_v19 = vld [vmem:[%s12728_s3 + $0x94] ss:$8 sps:$4 sm:$0xff]  }
 0x1e3   :  { %5147 = vmatpush1.bf16.msra.mxu0 %v9360_v21  ;;  %1466 = vmatprep.subr.bf16.mxu1 %v9365_v22  ;;  %v9440_v21 = vld [vmem:[%s12726_s1 + $0x54] ss:$8 sps:$4 sm:$0xff]   ;;  %v9435_v22 = vld [vmem:[%s12728_s3 + $0x90] ss:$8 sps:$4 sm:$0xff]  }
 0x1e4   :  { %5148 = vmatprep.subr.bf16.mxu0 %v9368_v23  ;;  %4147 = vmatprep.mubr.bf16.mxu0 %v12807_v25  ;;  %v9438_v23 = vld [vmem:[%s12726_s1 + $0x50] ss:$8 sps:$4 sm:$0xff]  }
 0x1e6   :  { %1467 = vmatpush1.bf16.msra.mxu1 %v9363_v26  ;;  %v11296_v26 = vld [vmem:[%s12728_s3 + $0xa4] ss:$8 sps:$4 sm:$0xff]  }
 0x1e7   :  { %5149 = vmatpush1.bf16.msra.mxu0 %v9366_v29  ;;  %1468 = vmatprep.subr.bf16.mxu1 %v9371_v30  ;;  %v7818_v29 = vld [vmem:[%s12729_s2] ss:$0 sm:$0xff] }
 0x1e8   :  { %5150 = vmatprep.subr.bf16.mxu0 %v9374_v35  ;;  %v11307_v30 = vld [vmem:[%s12728_s3 + $0xa0] ss:$8 sps:$4 sm:$0xff]   ;;  %v1514_v35 = vpack.c.bf16 %v10777_v31, %v10777_v31 }
 0x1ea   :  { %1469 = vmatpush1.bf16.msra.mxu1 %v9369_v37  ;;  %4148 = vmatmul.mubr.bf16.gmra.mrb[20].mxu0 %v4008_v38  ;;  %v9444_v37 = vld [vmem:[%s12726_s1 + $0x60] ss:$8 sps:$4 sm:$0xff]   ;;  %v11318_v38 = vld [vmem:[%s12728_s3 + $0xb4] ss:$8 sps:$4 sm:$0xff]  }
 0x1eb   :  { %5151 = vmatpush1.bf16.msra.mxu0 %v9372_v39  ;;  %1470 = vmatprep.subr.bf16.mxu1 %v9377_v45  ;;  %v9452_v45 = vld [vmem:[%s12726_s1 + $0x74] ss:$8 sps:$4 sm:$0xff]  }
 0x1ec   :  { %5152 = vmatprep.subr.bf16.mxu0 %v9380_v48  ;;  %5178 = vmatprep.mubr.bf16.mxu0 %v12807_v25 }
 0x1ee   :  { %1471 = vmatpush1.bf16.msra.mxu1 %v9375_v50  ;;  %v11327_v50 = vld [vmem:[%s12728_s3 + $0xb0] ss:$8 sps:$4 sm:$0xff]  }
 0x1ef   :  { %5153 = vmatpush1.bf16.msra.mxu0 %v9378_v52  ;;  %1612 = vmatprep.subr.bf16.mxu1 %v9383_v53  ;;  %v9450_v52 = vld [vmem:[%s12726_s1 + $0x70] ss:$8 sps:$4 sm:$0xff]  }
 0x1f0   :  { %5154 = vmatprep.subr.bf16.mxu0 %v9386_v54 }
 0x1f1   :  { %1489 = vmatmul.mubr.bf16.vlgmr.msra.gmra.mrb[0].mxu1 %v10826_v57  ;;  %v9398_v57 = vld [vmem:[%s12726_s1 + $0xe4] ss:$8 sps:$4 sm:$0xff]  }
 0x1f2   :  { %1613 = vmatpush1.bf16.msra.mxu1 %v9381_v55  ;;  %1498 = vmatprep.mubr.bf16.mxu1 %v12807_v25  ;;  %v11337_v55 = vld [vmem:[%s12728_s3 + $0xc4] ss:$8 sps:$4 sm:$0xff]  }
 0x1f3   :  { %5155 = vmatpush1.bf16.msra.mxu0 %v9384_v58  ;;  %1614 = vmatprep.subr.bf16.mxu1 %v9389_v59  ;;  %v8274_v58 = vld [vmem:[%s12727_s0 + $0x60] sm:$0xff]  ;;  %v8275_v59 = vld [vmem:[%s12727_s0 + $0x68] sm:$0xff] }
 0x1f4   :  { %5156 = vmatprep.subr.bf16.mxu0 %v9392_v60  ;;  %v9458_v60 = vld [vmem:[%s12726_s1 + $0x104] ss:$8 sps:$4 sm:$0xff]  }
 0x1f6   :  { %1615 = vmatpush1.bf16.msra.mxu1 %v9387_v63 }
 0x1f7   :  { %5157 = vmatpush1.bf16.msra.mxu0 %v9390_v17  ;;  %1616 = vmatprep.subr.bf16.mxu1 %v9395_v20 }
 0x1f8   :  { %5158 = vmatprep.subr.bf16.mxu0 %v9398_v57  ;;  %v11352_v57 = vld [vmem:[%s12728_s3 + $0xc0] ss:$8 sps:$4 sm:$0xff]  }
 0x1f9   :  { %1499 = vmatmul.mubr.bf16.gmra.mrb[4].mxu1 %v10801_v44  ;;  %v8278_v44 = vld [vmem:[%s12727_s0 + $0x61] sm:$0xff] }
 0x1fa   :  { %1617 = vmatpush1.bf16.msra.mxu1 %v9393_v24  ;;  %1644 = vmatprep.mubr.bf16.mxu1 %v12807_v25  ;;  %v5048_v0 = vpack.c.bf16 %v8279_v62, %v8278_v44  ;;  %v9456_v24 = vld [vmem:[%s12726_s1 + $0x100] ss:$8 sps:$4 sm:$0xff]   ;;  %v9464_v62 = vld [vmem:[%s12726_s1 + $0x114] ss:$8 sps:$4 sm:$0xff]  }
 0x1fb   :  { %5159 = vmatpush1.bf16.msra.mxu0 %v9396_v40  ;;  %1618 = vmatprep.subr.bf16.mxu1 %v9401_v41  ;;  %v5026_v40 = vpack.c.bf16 %v8275_v59, %v8274_v58  ;;  %v9488_v59 = vld [vmem:[%s12726_s1 + $0x154] ss:$8 sps:$4 sm:$0xff]  }
 0x1fc   :  { %5160 = vmatprep.subr.bf16.mxu0 %v9404_v43 }
 0x1fe   :  { %1619 = vmatpush1.bf16.msra.mxu1 %v9399_v18 }
 0x1ff   :  { %5161 = vmatpush1.bf16.msra.mxu0 %v9402_v27  ;;  %1620 = vmatprep.subr.bf16.mxu1 %v9407_v1  ;;  %v11361_v1 = vld [vmem:[%s12728_s3 + $0xd4] ss:$8 sps:$4 sm:$0xff]  }
 0x200   :  { %5279 = vmatprep.subr.bf16.mxu0 %v9410_v47 }
 0x202   :  { %1621 = vmatpush1.bf16.msra.mxu1 %v9405_v51  ;;  %5179 = vmatmul.mubr.bf16.vlgmr.msra.gmra.mrb[24].mxu0 %v5048_v0 }
 0x203   :  { %5280 = vmatpush1.bf16.msra.mxu0 %v9408_v2  ;;  %1622 = vmatprep.subr.bf16.mxu1 %v9413_v3  ;;  %v11371_v3 = vld [vmem:[%s12728_s3 + $0xd0] ss:$8 sps:$4 sm:$0xff]  }
 0x204   :  { %5281 = vmatprep.subr.bf16.mxu0 %v9416_v4  ;;  %5188 = vmatprep.mubr.bf16.mxu0 %v12807_v25  ;;  %v9462_v4 = vld [vmem:[%s12726_s1 + $0x110] ss:$8 sps:$4 sm:$0xff]  }
 0x206   :  { %1623 = vmatpush1.bf16.msra.mxu1 %v9411_v5 }
 0x207   :  { %5282 = vmatpush1.bf16.msra.mxu0 %v9414_v6  ;;  %1624 = vmatprep.subr.bf16.mxu1 %v9419_v7  ;;  %v11380_v7 = vld [vmem:[%s12728_s3 + $0xe4] ss:$8 sps:$4 sm:$0xff]  }
 0x208   :  { %5283 = vmatprep.subr.bf16.mxu0 %v9422_v56  ;;  %v9470_v56 = vld [vmem:[%s12726_s1 + $0x124] ss:$8 sps:$4 sm:$0xff]  }
 0x20a   :  { %1625 = vmatpush1.bf16.msra.mxu1 %v9417_v61  ;;  %5189 = vmatmul.mubr.bf16.gmra.mrb[28].mxu0 %v5049_v46 }
 0x20b   :  { %5284 = vmatpush1.bf16.msra.mxu0 %v9420_v10  ;;  %1626 = vmatprep.subr.bf16.mxu1 %v9425_v11  ;;  %v11396_v10 = vld [vmem:[%s12728_s3 + $0xe0] ss:$8 sps:$4 sm:$0xff]   ;;  %v5027_v11 = vpack.c.bf16 %v8277_v9, %v8276_v8  ;;  %v11558_v8 = vld [vmem:[%s12728_s3 + $0x54] ss:$8 sps:$4 sm:$0xff]  }
 0x20c   :  { %5285 = vmatprep.subr.bf16.mxu0 %v9428_v12  ;;  %5311 = vmatprep.mubr.bf16.mxu0 %v12807_v25  ;;  %v9512_v9 = vld [vmem:[%s12726_s1 + $0x194] ss:$8 sps:$4 sm:$0xff]  }
 0x20e   :  { %1627 = vmatpush1.bf16.msra.mxu1 %v9423_v13 }
 0x20f   :  { %5286 = vmatpush1.bf16.msra.mxu0 %v9426_v14  ;;  %2670 = vmatprep.subr.bf16.mxu1 %v9431_v36  ;;  %v9468_v14 = vld [vmem:[%s12726_s1 + $0x120] ss:$8 sps:$4 sm:$0xff]   ;;  %v11406_v36 = vld [vmem:[%s12728_s3 + $0xf4] ss:$8 sps:$4 sm:$0xff]  }
 0x210   :  { %5287 = vmatprep.subr.bf16.mxu0 %v9434_v49 }
 0x211   :  { %1645 = vmatmul.mubr.bf16.vlgmr.msra.gmra.mrb[0].mxu1 %v1513_v42 }
 0x212   :  { %2671 = vmatpush1.bf16.msra.mxu1 %v9429_v15  ;;  %1654 = vmatprep.mubr.bf16.mxu1 %v12807_v25  ;;  %v9476_v15 = vld [vmem:[%s12726_s1 + $0x134] ss:$8 sps:$4 sm:$0xff]  }
 0x213   :  { %5288 = vmatpush1.bf16.msra.mxu0 %v9432_v16  ;;  %2672 = vmatprep.subr.bf16.mxu1 %v9437_v19 }
 0x214   :  { %5289 = vmatprep.subr.bf16.mxu0 %v9440_v21 }
 0x215   :  { %v2484_v33 = vpop.f32.mrb[8].mxu0 }
 0x216   :  { %2673 = vmatpush1.bf16.msra.mxu1 %v9435_v22  ;;  %v2486_v42 = vpop.f32.mrb[9].mxu0 }
 0x217   :  { %v2511_v32 = vmax.f32 %v2484_v33, %v2486_v42  ;;  %v2488_v34 = vpop.f32.mrb[10].mxu0  ;;  %5290 = vmatpush1.bf16.msra.mxu0 %v9438_v23  ;;  %2674 = vmatprep.subr.bf16.mxu1 %v11296_v26  ;;  %v11425_v23 = vld [vmem:[%s12728_s3 + $0xf0] ss:$8 sps:$4 sm:$0xff]   ;;  %v11434_v33 = vld [vmem:[%s12728_s3 + $0x4] ss:$8 sps:$4 sm:$0xff]  }
 0x218   :  { %v2490_v39 = vpop.f32.mrb[11].mxu0  ;;  %5291 = vmatprep.subr.bf16.mxu0 %v9446_v28  ;;  %v9474_v28 = vld [vmem:[%s12726_s1 + $0x130] ss:$8 sps:$4 sm:$0xff]  }
 0x219   :  { %v2522_v48 = vadd.f32 %v7818_v29, %v2511_v32  ;;  %1655 = vmatmul.mubr.bf16.gmra.mrb[4].mxu1 %v1514_v35  ;;  %v2512_v31 = vmax.f32 %v2488_v34, %v2490_v39  ;;  %v9482_v32 = vld [vmem:[%s12726_s1 + $0x144] ss:$8 sps:$4 sm:$0xff]  }
 0x21a   :  { %2675 = vmatpush1.bf16.msra.mxu1 %v11307_v30  ;;  %2702 = vmatprep.mubr.bf16.mxu1 %v12807_v25 }
 0x21b   :  { %v2526_v53 = vmax.f32 %v2522_v48, 0.0  ;;  %v2523_v54 = vadd.f32 %v7818_v29, %v2512_v31  ;;  %5292 = vmatpush1.bf16.msra.mxu0 %v9444_v37  ;;  %2676 = vmatprep.subr.bf16.mxu1 %v11318_v38  ;;  %v9594_v37 = vld [vmem:[%s12726_s1 + $0x270] ss:$8 sps:$4 sm:$0xff]  }
 0x21c   :  { %5293 = vmatprep.subr.bf16.mxu0 %v9452_v45  ;;  %v11456_v45 = vld [vmem:[%s12728_s3] ss:$8 sps:$4 sm:$0xff]  }
 0x21d   :  { %v2527_v63 = vmax.f32 %v2523_v54, 0.0  ;;  %v2494_v17 = vpop.f32.mrb[12].mxu0  ;;  %v2534_v41 = vrot.slane %v2526_v53, 1  ;;  %v11468_v54 = vld [vmem:[%s12728_s3 + $0x14] ss:$8 sps:$4 sm:$0xff]  }
 0x21e   :  { %2677 = vmatpush1.bf16.msra.mxu1 %v11327_v50  ;;  %v2496_v20 = vpop.f32.mrb[13].mxu0 }
 0x21f   :  { %v2535_v43 = vrot.slane %v2527_v63, 1  ;;  %v2513_v18 = vmax.f32 %v2494_v17, %v2496_v20  ;;  %v2498_v27 = vpop.f32.mrb[14].mxu0  ;;  %5294 = vmatpush1.bf16.msra.mxu0 %v9450_v52  ;;  %2678 = vmatprep.subr.bf16.mxu1 %v11337_v55  ;;  %v11487_v17 = vld [vmem:[%s12728_s3 + $0x10] ss:$8 sps:$4 sm:$0xff]  }
 0x220   :  { %v2500_v44 = vpop.f32.mrb[15].mxu0  ;;  %5434 = vmatprep.subr.bf16.mxu0 %v9458_v60  ;;  %v9486_v20 = vld [vmem:[%s12726_s1 + $0x150] ss:$8 sps:$4 sm:$0xff]  }
 0x221   :  { %v2536_v47 = vsel %vm870_vm0, %v2534_v41, %v2535_v43  ;;  %v2524_v51 = vadd.f32 %v7818_v29, %v2513_v18  ;;  %v2514_v0 = vmax.f32 %v2498_v27, %v2500_v44  ;;  %v11506_v41 = vld [vmem:[%s12728_s3 + $0x20] ss:$8 sps:$4 sm:$0xff]   ;;  %v11515_v18 = vld [vmem:[%s12728_s3 + $0x34] ss:$8 sps:$4 sm:$0xff]   ;;  %v11524_v44 = vld [vmem:[%s12728_s3 + $0x30] ss:$8 sps:$4 sm:$0xff]  }
 0x222   :  { %v2545_v2 = vmax.f32 %v2526_v53, %v2536_v47  ;;  %2679 = vmatpush1.bf16.msra.mxu1 %v11352_v57  ;;  %5312 = vmatmul.mubr.bf16.vlgmr.msra.gmra.mrb[24].mxu0 %v5026_v40  ;;  %v9480_v53 = vld [vmem:[%s12726_s1 + $0x140] ss:$8 sps:$4 sm:$0xff]   ;;  %v9494_v40 = vld [vmem:[%s12726_s1 + $0x164] ss:$8 sps:$4 sm:$0xff]   ;;  %v9500_v27 = vld [vmem:[%s12726_s1 + $0x174] ss:$8 sps:$4 sm:$0xff]  }
 0x223   :  { %v2528_v5 = vmax.f32 %v2524_v51, 0.0  ;;  %v2525_v6 = vadd.f32 %v7818_v29, %v2514_v0  ;;  %5435 = vmatpush1.bf16.msra.mxu0 %v9456_v24  ;;  %2680 = vmatprep.subr.bf16.mxu1 %v11361_v1  ;;  %v11497_v24 = vld [vmem:[%s12728_s3 + $0x24] ss:$8 sps:$4 sm:$0xff]  }
 0x224   :  { %5436 = vmatprep.subr.bf16.mxu0 %v9464_v62  ;;  %5321 = vmatprep.mubr.bf16.mxu0 %v12807_v25  ;;  %v9498_v62 = vld [vmem:[%s12726_s1 + $0x170] ss:$8 sps:$4 sm:$0xff]   ;;  %v11534_v47 = vld [vmem:[%s12728_s3 + $0x44] ss:$8 sps:$4 sm:$0xff]  }
 0x225   :  { %v2537_v61 = vrot.slane %v2528_v5, 1  ;;  %v2529_v46 = vmax.f32 %v2525_v6, 0.0  ;;  %v8330_v51 = vld [vmem:[%s12727_s0 + $0x62] sm:$0xff]  ;;  %v8331_v0 = vld [vmem:[%s12727_s0 + $0x6a] sm:$0xff] }
 0x226   :  { %2681 = vmatpush1.bf16.msra.mxu1 %v11371_v3  ;;  %v9504_v6 = vld [vmem:[%s12726_s1 + $0x180] ss:$8 sps:$4 sm:$0xff]  }
 0x227   :  { %v2538_v12 = vsel %vm870_vm0, %v2535_v43, %v2537_v61  ;;  %v2539_v13 = vrot.slane %v2529_v46, 1  ;;  %5437 = vmatpush1.bf16.msra.mxu0 %v9462_v4  ;;  %2682 = vmatprep.subr.bf16.mxu1 %v11380_v7  ;;  %v9492_v43 = vld [vmem:[%s12726_s1 + $0x160] ss:$8 sps:$4 sm:$0xff]  }
 0x228   :  { %v11408_v49 = vmax.f32 %v2527_v63, %v2538_v12  ;;  %5438 = vmatprep.subr.bf16.mxu0 %v9470_v56  ;;  %v11549_v4 = vld [vmem:[%s12728_s3 + $0x40] ss:$8 sps:$4 sm:$0xff]   ;;  %v11567_v56 = vld [vmem:[%s12728_s3 + $0x50] ss:$8 sps:$4 sm:$0xff]  }
 0x229   :  { %v2540_v16 = vsel %vm870_vm0, %v2537_v61, %v2539_v13  ;;  %v11414_v19 = vmax.f32 %v2529_v46, %v2539_v13  ;;  %v9510_v61 = vld [vmem:[%s12726_s1 + $0x190] ss:$8 sps:$4 sm:$0xff]   ;;  %v11576_v46 = vld [vmem:[%s12728_s3 + $0x64] ss:$8 sps:$4 sm:$0xff]  }
 0x22a   :  { %v11417_v21 = vpack.c.bf16 %v11408_v49, %v2545_v2  ;;  %v11419_v22 = vmax.f32 %v2528_v5, %v2540_v16  ;;  %2683 = vmatpush1.bf16.msra.mxu1 %v11396_v10  ;;  %5322 = vmatmul.mubr.bf16.gmra.mrb[28].mxu0 %v5027_v11  ;;  %v9506_v2 = vld [vmem:[%s12726_s1 + $0x184] ss:$8 sps:$4 sm:$0xff]   ;;  %v5336_v5 = vpack.c.bf16 %v8331_v0, %v8330_v51  ;;  %v8332_v11 = vld [vmem:[%s12727_s0 + $0x72] sm:$0xff]  ;;  %v8333_v12 = vld [vmem:[%s12727_s0 + $0x7a] sm:$0xf] }
 0x22b   :  { %5439 = vmatpush1.bf16.msra.mxu0 %v9468_v14  ;;  %2684 = vmatprep.subr.bf16.mxu1 %v11406_v36  ;;  %v9518_v13 = vld [vmem:[%s12726_s1 + $0x1a4] ss:$8 sps:$4 sm:$0xff]   ;;  %v11592_v14 = vld [vmem:[%s12728_s3 + $0x60] ss:$8 sps:$4 sm:$0xff]   ;;  %v11676_v51 = vld [vmem:[%s12728_s3 + $0x134] ss:$8 sps:$4 sm:$0xff]  }
 0x22c   :  { %v3010_v42 = vpack.c.bf16 %v11414_v19, %v11419_v22  ;;  %5440 = vmatprep.subr.bf16.mxu0 %v9476_v15  ;;  %v11440_v29 = vpack.c.bf16 %v11419_v22, %v11419_v22  ;;  %5466 = vmatprep.mubr.bf16.mxu0 %v12807_v25  ;;  %v2585_v34 = vrot.slane %v11417_v21, 1  ;;  %v2868_v35 = vrot.slane %v11417_v21, 2  ;;  %v9516_v16 = vld [vmem:[%s12726_s1 + $0x1a0] ss:$8 sps:$4 sm:$0xff]   ;;  %v9548_v0 = vld [vmem:[%s12726_s1 + $0x1f4] ss:$8 sps:$4 sm:$0xff]  }
 0x22d   :  { %v3028_v52 = vrot.slane %v11417_v21, 3  ;;  %v5337_v15 = vpack.c.bf16 %v8333_v12, %v8332_v11  ;;  %v9554_v11 = vld [vmem:[%s12726_s1 + $0x204] ss:$8 sps:$4 sm:$0xff]   ;;  %v11711_v12 = vld [vmem:[%s12728_s3 + $0x140] ss:$8 sps:$4 sm:$0xff]  }
 0x22e   :  { %v11450_v39 = vrot.slane %v3010_v42, 3  ;;  %2685 = vmatpush1.bf16.msra.mxu1 %v11425_v23  ;;  %v2586_v48 = vrot.slane %v11440_v29, 1  ;;  %v2869_v31 = vrot.slane %v11440_v29, 2  ;;  %v9524_v42 = vld [vmem:[%s12726_s1 + $0x1b4] ss:$8 sps:$4 sm:$0xff]  }
 0x22f   :  { %5441 = vmatpush1.bf16.msra.mxu0 %v9474_v28  ;;  %2801 = vmatprep.subr.bf16.mxu1 %v11434_v33  ;;  %v11601_v28 = vld [vmem:[%s12728_s3 + $0x74] ss:$8 sps:$4 sm:$0xff]  }
 0x230   :  { %v2587_v58 = vsel %vm870_vm0, %v2585_v34, %v2586_v48  ;;  %5442 = vmatprep.subr.bf16.mxu0 %v9482_v32  ;;  %v11477_v60 = vsel %vm1208_vm1, %v2868_v35, %v2869_v31  ;;  %v11481_v63 = vsel %vm1370_vm2, %v3028_v52, %v11450_v39  ;;  %v11610_v32 = vld [vmem:[%s12728_s3 + $0x70] ss:$8 sps:$4 sm:$0xff]   ;;  %v11619_v35 = vld [vmem:[%s12728_s3 + $0x104] ss:$8 sps:$4 sm:$0xff]   ;;  %v11629_v52 = vld [vmem:[%s12728_s3 + $0x100] ss:$8 sps:$4 sm:$0xff]  }
 0x231   :  { %2703 = vmatmul.mubr.bf16.vlgmr.msra.gmra.mrb[8].mxu1 %v2587_v58  ;;  %v9522_v34 = vld [vmem:[%s12726_s1 + $0x1b0] ss:$8 sps:$4 sm:$0xff]   ;;  %v11638_v58 = vld [vmem:[%s12728_s3 + $0x114] ss:$8 sps:$4 sm:$0xff]  }
 0x232   :  { %2802 = vmatpush1.bf16.msra.mxu1 %v11456_v45  ;;  %2712 = vmatprep.mubr.bf16.mxu1 %v12807_v25 }
 0x233   :  { %5443 = vmatpush1.bf16.msra.mxu0 %v9480_v53  ;;  %2803 = vmatprep.subr.bf16.mxu1 %v11468_v54  ;;  %v9528_v53 = vld [vmem:[%s12726_s1 + $0x1c0] ss:$8 sps:$4 sm:$0xff]  }
 0x234   :  { %5444 = vmatprep.subr.bf16.mxu0 %v9488_v59  ;;  %v9536_v59 = vld [vmem:[%s12726_s1 + $0x1d4] ss:$8 sps:$4 sm:$0xff]  }
 0x236   :  { %2804 = vmatpush1.bf16.msra.mxu1 %v11487_v17 }
 0x237   :  { %5445 = vmatpush1.bf16.msra.mxu0 %v9486_v20  ;;  %2805 = vmatprep.subr.bf16.mxu1 %v11497_v24  ;;  %v11648_v20 = vld [vmem:[%s12728_s3 + $0x110] ss:$8 sps:$4 sm:$0xff]  }
 0x238   :  { %5446 = vmatprep.subr.bf16.mxu0 %v9494_v40  ;;  %v9534_v40 = vld [vmem:[%s12726_s1 + $0x1d0] ss:$8 sps:$4 sm:$0xff]  }
 0x239   :  { %2713 = vmatmul.mubr.bf16.gmra.mrb[12].mxu1 %v2586_v48  ;;  %v9530_v48 = vld [vmem:[%s12726_s1 + $0x1c4] ss:$8 sps:$4 sm:$0xff]  }
 0x23a   :  { %2806 = vmatpush1.bf16.msra.mxu1 %v11506_v41  ;;  %2833 = vmatprep.mubr.bf16.mxu1 %v12807_v25 }
 0x23b   :  { %5447 = vmatpush1.bf16.msra.mxu0 %v9492_v43  ;;  %2807 = vmatprep.subr.bf16.mxu1 %v11515_v18  ;;  %v9542_v43 = vld [vmem:[%s12726_s1 + $0x1e4] ss:$8 sps:$4 sm:$0xff]  }
 0x23c   :  { %5448 = vmatprep.subr.bf16.mxu0 %v9500_v27  ;;  %v11667_v27 = vld [vmem:[%s12728_s3 + $0x120] ss:$8 sps:$4 sm:$0xff]  }
 0x23e   :  { %2808 = vmatpush1.bf16.msra.mxu1 %v11524_v44 }
 0x23f   :  { %5449 = vmatpush1.bf16.msra.mxu0 %v9498_v62  ;;  %2809 = vmatprep.subr.bf16.mxu1 %v11534_v47  ;;  %v9540_v62 = vld [vmem:[%s12726_s1 + $0x1e0] ss:$8 sps:$4 sm:$0xff]  }
 0x240   :  { %5597 = vmatprep.subr.bf16.mxu0 %v9506_v2  ;;  %v11686_v2 = vld [vmem:[%s12728_s3 + $0x130] ss:$8 sps:$4 sm:$0xff]  }
 0x242   :  { %2810 = vmatpush1.bf16.msra.mxu1 %v11549_v4  ;;  %5467 = vmatmul.mubr.bf16.vlgmr.msra.gmra.mrb[24].mxu0 %v5336_v5  ;;  %v9546_v5 = vld [vmem:[%s12726_s1 + $0x1f0] ss:$8 sps:$4 sm:$0xff]  }
 0x243   :  { %5598 = vmatpush1.bf16.msra.mxu0 %v9504_v6  ;;  %2811 = vmatprep.subr.bf16.mxu1 %v11558_v8  ;;  %v11696_v6 = vld [vmem:[%s12728_s3 + $0x144] ss:$8 sps:$4 sm:$0xff]  }
 0x244   :  { %5599 = vmatprep.subr.bf16.mxu0 %v9512_v9  ;;  %5476 = vmatprep.mubr.bf16.mxu0 %v12807_v25  ;;  %v8366_v9 = vld [vmem:[%s12727_s0 + $0x63] sm:$0xff] }
 0x246   :  { %2812 = vmatpush1.bf16.msra.mxu1 %v11567_v56 }
 0x247   :  { %5600 = vmatpush1.bf16.msra.mxu0 %v9510_v61  ;;  %2813 = vmatprep.subr.bf16.mxu1 %v11576_v46  ;;  %v8367_v61 = vld [vmem:[%s12727_s0 + $0x6b] sm:$0xff] }
 0x248   :  { %5601 = vmatprep.subr.bf16.mxu0 %v9518_v13  ;;  %v5499_v13 = vpack.c.bf16 %v8367_v61, %v8366_v9  ;;  %v11763_v9 = vld [vmem:[%s12728_s3 + $0x174] ss:$8 sps:$4 sm:$0xff]  }
 0x249   :  { %v9572_v61 = vld [vmem:[%s12726_s1 + $0x234] ss:$8 sps:$4 sm:$0xff]  }
 0x24a   :  { %2814 = vmatpush1.bf16.msra.mxu1 %v11592_v14  ;;  %5477 = vmatmul.mubr.bf16.gmra.mrb[28].mxu0 %v5337_v15  ;;  %v9552_v15 = vld [vmem:[%s12726_s1 + $0x200] ss:$8 sps:$4 sm:$0xff]  }
 0x24b   :  { %5602 = vmatpush1.bf16.msra.mxu0 %v9516_v16  ;;  %2815 = vmatprep.subr.bf16.mxu1 %v11601_v28  ;;  %v11720_v16 = vld [vmem:[%s12728_s3 + $0x154] ss:$8 sps:$4 sm:$0xff]  }
 0x24c   :  { %5603 = vmatprep.subr.bf16.mxu0 %v9524_v42  ;;  %5629 = vmatprep.mubr.bf16.mxu0 %v12807_v25  ;;  %v9560_v42 = vld [vmem:[%s12726_s1 + $0x214] ss:$8 sps:$4 sm:$0xff]  }
 0x24e   :  { %2816 = vmatpush1.bf16.msra.mxu1 %v11610_v32 }
 0x24f   :  { %5604 = vmatpush1.bf16.msra.mxu0 %v9522_v34  ;;  %2953 = vmatprep.subr.bf16.mxu1 %v11619_v35  ;;  %v11729_v34 = vld [vmem:[%s12728_s3 + $0x150] ss:$8 sps:$4 sm:$0xff]  }
 0x250   :  { %5605 = vmatprep.subr.bf16.mxu0 %v9530_v48  ;;  %v9558_v48 = vld [vmem:[%s12726_s1 + $0x210] ss:$8 sps:$4 sm:$0xff]  }
 0x251   :  { %2834 = vmatmul.mubr.bf16.vlgmr.msra.gmra.mrb[8].mxu1 %v11417_v21  ;;  %v11658_v21 = vld [vmem:[%s12728_s3 + $0x124] ss:$8 sps:$4 sm:$0xff]  }
 0x252   :  { %2954 = vmatpush1.bf16.msra.mxu1 %v11629_v52  ;;  %2843 = vmatprep.mubr.bf16.mxu1 %v12807_v25 }
 0x253   :  { %5606 = vmatpush1.bf16.msra.mxu0 %v9528_v53  ;;  %2955 = vmatprep.subr.bf16.mxu1 %v11638_v58  ;;  %v11738_v53 = vld [vmem:[%s12728_s3 + $0x164] ss:$8 sps:$4 sm:$0xff]  }
 0x254   :  { %5607 = vmatprep.subr.bf16.mxu0 %v9536_v59  ;;  %v8368_v59 = vld [vmem:[%s12727_s0 + $0x73] sm:$0xff] }
 0x256   :  { %2956 = vmatpush1.bf16.msra.mxu1 %v11648_v20 }
 0x257   :  { %5608 = vmatpush1.bf16.msra.mxu0 %v9534_v40  ;;  %2957 = vmatprep.subr.bf16.mxu1 %v11658_v21  ;;  %v8369_v40 = vld [vmem:[%s12727_s0 + $0x7b] sm:$0xf] }
 0x258   :  { %5609 = vmatprep.subr.bf16.mxu0 %v9542_v43  ;;  %v9566_v43 = vld [vmem:[%s12726_s1 + $0x224] ss:$8 sps:$4 sm:$0xff]  }
 0x259   :  { %2844 = vmatmul.mubr.bf16.gmra.mrb[12].mxu1 %v11440_v29  ;;  %v11864_v29 = vld [vmem:[%s12728_s3 + $0x1c4] ss:$8 sps:$4 sm:$0xff]  }
 0x25a   :  { %2958 = vmatpush1.bf16.msra.mxu1 %v11667_v27  ;;  %2985 = vmatprep.mubr.bf16.mxu1 %v12807_v25  ;;  %12843 = vst [vmem:[#allocation6_spill] sm:$0xff] %v11864_v29 }
 0x25b   :  { %5610 = vmatpush1.bf16.msra.mxu0 %v9540_v62  ;;  %2959 = vmatprep.subr.bf16.mxu1 %v11676_v51  ;;  %v11754_v62 = vld [vmem:[%s12728_s3 + $0x160] ss:$8 sps:$4 sm:$0xff]  }
 0x25c   :  { %5611 = vmatprep.subr.bf16.mxu0 %v9548_v0  ;;  %v5500_v0 = vpack.c.bf16 %v8369_v40, %v8368_v59  ;;  %v11796_v59 = vld [vmem:[%s12728_s3 + $0x180] ss:$8 sps:$4 sm:$0xff]  }
 0x25d   :  { %v9576_v40 = vld [vmem:[%s12726_s1 + $0x240] ss:$8 sps:$4 sm:$0xff]  }
 0x25e   :  { %2960 = vmatpush1.bf16.msra.mxu1 %v11686_v2 }
 0x25f   :  { %5612 = vmatpush1.bf16.msra.mxu0 %v9546_v5  ;;  %2961 = vmatprep.subr.bf16.mxu1 %v11696_v6  ;;  %v9564_v5 = vld [vmem:[%s12726_s1 + $0x220] ss:$8 sps:$4 sm:$0xff]  }
 0x260   :  { %5760 = vmatprep.subr.bf16.mxu0 %v9554_v11  ;;  %v11772_v11 = vld [vmem:[%s12728_s3 + $0x170] ss:$8 sps:$4 sm:$0xff]  }
 0x262   :  { %2962 = vmatpush1.bf16.msra.mxu1 %v11711_v12  ;;  %5630 = vmatmul.mubr.bf16.vlgmr.msra.gmra.mrb[24].mxu0 %v5499_v13  ;;  %v9570_v13 = vld [vmem:[%s12726_s1 + $0x230] ss:$8 sps:$4 sm:$0xff]  }
 0x263   :  { %5761 = vmatpush1.bf16.msra.mxu0 %v9552_v15  ;;  %2963 = vmatprep.subr.bf16.mxu1 %v11720_v16  ;;  %v11781_v15 = vld [vmem:[%s12728_s3 + $0x184] ss:$8 sps:$4 sm:$0xff]  }
 0x264   :  { %5762 = vmatprep.subr.bf16.mxu0 %v9560_v42  ;;  %5639 = vmatprep.mubr.bf16.mxu0 %v12807_v25  ;;  %v9578_v42 = vld [vmem:[%s12726_s1 + $0x244] ss:$8 sps:$4 sm:$0xff]  }
 0x266   :  { %2964 = vmatpush1.bf16.msra.mxu1 %v11729_v34 }
 0x267   :  { %5763 = vmatpush1.bf16.msra.mxu0 %v9558_v48  ;;  %2965 = vmatprep.subr.bf16.mxu1 %v11738_v53  ;;  %v12762_v48 = vmov 0.0  }
 0x268   :  { %5764 = vmatprep.subr.bf16.mxu0 %v9566_v43  ;;  %39 = vst [vmem:[#allocation2] sm:$0xff] %v12762_v48  ;;  %40 = vst [vmem:[#allocation2 + $0x8] sm:$0xff] %v12762_v48  ;;  %v11805_v43 = vld [vmem:[%s12728_s3 + $0x194] ss:$8 sps:$4 sm:$0xff]  }
 0x269   :  { %41 = vst [vmem:[#allocation2 + $0x10] sm:$0xff] %v12762_v48  ;;  %42 = vst [vmem:[#allocation2 + $0x18] sm:$0xff] %v12762_v48 }
 0x26a   :  { %2966 = vmatpush1.bf16.msra.mxu1 %v11754_v62  ;;  %5640 = vmatmul.mubr.bf16.gmra.mrb[28].mxu0 %v5500_v0  ;;  %43 = vst [vmem:[#allocation2 + $0x20] sm:$0xff] %v12762_v48  ;;  %v9584_v0 = vld [vmem:[%s12726_s1 + $0x254] ss:$8 sps:$4 sm:$0xff]  }
 0x26b   :  { %5765 = vmatpush1.bf16.msra.mxu0 %v9564_v5  ;;  %2967 = vmatprep.subr.bf16.mxu1 %v11763_v9  ;;  %v11815_v5 = vld [vmem:[%s12728_s3 + $0x190] ss:$8 sps:$4 sm:$0xff]   ;;  %v9596_v48 = vld [vmem:[%s12726_s1 + $0x274] ss:$8 sps:$4 sm:$0xff]  }
 0x26c   :  { %5766 = vmatprep.subr.bf16.mxu0 %v9572_v61  ;;  %5792 = vmatprep.mubr.bf16.mxu0 %v12807_v25  ;;  %v9582_v61 = vld [vmem:[%s12726_s1 + $0x250] ss:$8 sps:$4 sm:$0xff]  }
 0x26e   :  { %2968 = vmatpush1.bf16.msra.mxu1 %v11772_v11 }
 0x26f   :  { %5767 = vmatpush1.bf16.msra.mxu0 %v9570_v13  ;;  %3113 = vmatprep.subr.bf16.mxu1 %v11781_v15  ;;  %v9590_v13 = vld [vmem:[%s12726_s1 + $0x264] ss:$8 sps:$4 sm:$0xff]  }
 0x270   :  { %5768 = vmatprep.subr.bf16.mxu0 %v9578_v42  ;;  %v11834_v42 = vld [vmem:[%s12728_s3 + $0x1a0] ss:$8 sps:$4 sm:$0xff]  }
 0x271   :  { %2986 = vmatmul.mubr.bf16.vlgmr.msra.gmra.mrb[8].mxu1 %v11477_v60  ;;  %v11825_v60 = vld [vmem:[%s12728_s3 + $0x1a4] ss:$8 sps:$4 sm:$0xff]   ;;  %12840 = vst [vmem:[#allocation3_spill] sm:$0xff] %v11834_v42 }
 0x272   :  { %3114 = vmatpush1.bf16.msra.mxu1 %v11796_v59  ;;  %2995 = vmatprep.mubr.bf16.mxu1 %v12807_v25 }
 0x273   :  { %5769 = vmatpush1.bf16.msra.mxu0 %v9576_v40  ;;  %3115 = vmatprep.subr.bf16.mxu1 %v11805_v43  ;;  %v9588_v40 = vld [vmem:[%s12726_s1 + $0x260] ss:$8 sps:$4 sm:$0xff]  }
 0x274   :  { %5770 = vmatprep.subr.bf16.mxu0 %v9584_v0  ;;  %v11843_v0 = vld [vmem:[%s12728_s3 + $0x1b4] ss:$8 sps:$4 sm:$0xff]  }
 0x275   :  { %12841 = vst [vmem:[#allocation4_spill] sm:$0xff] %v11843_v0 }
 0x276   :  { %3116 = vmatpush1.bf16.msra.mxu1 %v11815_v5 }
 0x277   :  { %5771 = vmatpush1.bf16.msra.mxu0 %v9582_v61  ;;  %3117 = vmatprep.subr.bf16.mxu1 %v11825_v60  ;;  %v11854_v61 = vld [vmem:[%s12728_s3 + $0x1b0] ss:$8 sps:$4 sm:$0xff]  }
 0x278   :  { %5772 = vmatprep.subr.bf16.mxu0 %v9590_v13  ;;  %12842 = vst [vmem:[#allocation5_spill] sm:$0xff] %v11854_v61  ;;  %v8403_v13 = vld [vmem:[%s12727_s0 + $0x6c] sm:$0xff] }
 0x279   :  { %2996 = vmatmul.mubr.bf16.gmra.mrb[12].mxu1 %v2869_v31  ;;  %v8402_v31 = vld [vmem:[%s12727_s0 + $0x64] sm:$0xff] }
 0x27a   :  { %3118 = vmatpush1.bf16.msra.mxu1 %v11834_v42  ;;  %3145 = vmatprep.mubr.bf16.mxu1 %v12807_v25  ;;  %v11882_v42 = vld [vmem:[%s12728_s3 + $0x1d4] ss:$8 sps:$4 sm:$0xff]  }
 0x27b   :  { %5773 = vmatpush1.bf16.msra.mxu0 %v9588_v40  ;;  %3119 = vmatprep.subr.bf16.mxu1 %v11843_v0  ;;  %v11876_v40 = vld [vmem:[%s12728_s3 + $0x1c0] ss:$8 sps:$4 sm:$0xff]   ;;  %v5662_v0 = vpack.c.bf16 %v8403_v13, %v8402_v31  ;;  %12845 = vst [vmem:[#allocation8_spill] sm:$0xff] %v11882_v42  ;;  %v8404_v31 = vld [vmem:[%s12727_s0 + $0x74] sm:$0xff] }
 0x27c   :  { %5774 = vmatprep.subr.bf16.mxu0 %v9596_v48  ;;  %12844 = vst [vmem:[#allocation7_spill] sm:$0xff] %v11876_v40  ;;  %v11888_v48 = vld [vmem:[%s12728_s3 + $0x1d0] ss:$8 sps:$4 sm:$0xff]   ;;  %v11907_v13 = vld [vmem:[%s12728_s3 + $0x1e0] ss:$8 sps:$4 sm:$0xff]  }
 0x27d   :  { %12846 = vst [vmem:[#allocation9_spill] sm:$0xff] %v11888_v48  ;;  %12848 = vst [vmem:[#allocation11_spill] sm:$0xff] %v11907_v13 }
 0x27e   :  { %3120 = vmatpush1.bf16.msra.mxu1 %v11854_v61 }
 0x27f   :  { %5775 = vmatpush1.bf16.msra.mxu0 %v9594_v37  ;;  %3121 = vmatprep.subr.bf16.mxu1 %v11864_v29  ;;  %v11894_v37 = vld [vmem:[%s12728_s3 + $0x1e4] ss:$8 sps:$4 sm:$0xff]  }
 0x280   :  { %12847 = vst [vmem:[#allocation10_spill] sm:$0xff] %v11894_v37 }
 0x282   :  { %3122 = vmatpush1.bf16.msra.mxu1 %v11876_v40  ;;  %5793 = vmatmul.mubr.bf16.vlgmr.msra.gmra.mrb[24].mxu0 %v5662_v0  ;;  %v8405_v0 = vld [vmem:[%s12727_s0 + $0x7c] sm:$0xf] }
 0x283   :  { %3123 = vmatprep.subr.bf16.mxu1 %v11882_v42  ;;  %5802 = vmatprep.mubr.bf16.mxu0 %v12807_v25  ;;  %v5663_v42 = vpack.c.bf16 %v8405_v0, %v8404_v31  ;;  %v11913_v40 = vld [vmem:[%s12728_s3 + $0x1f4] ss:$8 sps:$4 sm:$0xff]   ;;  %v11925_v31 = vld [vmem:[%s12728_s3 + $0x204] ss:$8 sps:$4 sm:$0xff]   ;;  %v11931_v0 = vld [vmem:[%s12728_s3 + $0x200] ss:$8 sps:$4 sm:$0xff]  }
 0x284   :  { %12849 = vst [vmem:[#allocation12_spill] sm:$0xff] %v11913_v40  ;;  %12851 = vst [vmem:[#allocation14_spill] sm:$0xff] %v11925_v31 }
 0x285   :  { %12852 = vst [vmem:[#allocation15_spill] sm:$0xff] %v11931_v0 }
 0x286   :  { %3124 = vmatpush1.bf16.msra.mxu1 %v11888_v48  ;;  %v11919_v48 = vld [vmem:[%s12728_s3 + $0x1f0] ss:$8 sps:$4 sm:$0xff]  }
 0x287   :  { %3125 = vmatprep.subr.bf16.mxu1 %v11894_v37  ;;  %12850 = vst [vmem:[#allocation13_spill] sm:$0xff] %v11919_v48 }
 0x28a   :  { %3126 = vmatpush1.bf16.msra.mxu1 %v11907_v13  ;;  %5803 = vmatmul.mubr.bf16.gmra.mrb[28].mxu0 %v5663_v42  ;;  %v11937_v42 = vld [vmem:[%s12728_s3 + $0x214] ss:$8 sps:$4 sm:$0xff]  }
 0x28b   :  { %3127 = vmatprep.subr.bf16.mxu1 %v11913_v40  ;;  %12853 = vst [vmem:[#allocation16_spill] sm:$0xff] %v11937_v42 }
 0x28e   :  { %3128 = vmatpush1.bf16.msra.mxu1 %v11919_v48  ;;  %v11944_v48 = vld [vmem:[%s12728_s3 + $0x210] ss:$8 sps:$4 sm:$0xff]  }
 0x28f   :  { %3268 = vmatprep.subr.bf16.mxu1 %v11925_v31  ;;  %12854 = vst [vmem:[#allocation17_spill] sm:$0xff] %v11944_v48  ;;  %v11951_v31 = vld [vmem:[%s12728_s3 + $0x224] ss:$8 sps:$4 sm:$0xff]  }
 0x290   :  { %12855 = vst [vmem:[#allocation18_spill] sm:$0xff] %v11951_v31 }
 0x291   :  { %3146 = vmatmul.mubr.bf16.vlgmr.msra.gmra.mrb[8].mxu1 %v11481_v63  ;;  %v11957_v63 = vld [vmem:[%s12728_s3 + $0x220] ss:$8 sps:$4 sm:$0xff]  }
 0x292   :  { %3269 = vmatpush1.bf16.msra.mxu1 %v11931_v0  ;;  %3155 = vmatprep.mubr.bf16.mxu1 %v12807_v25  ;;  %12856 = vst [vmem:[#allocation19_spill] sm:$0xff] %v11957_v63  ;;  %v11963_v0 = vld [vmem:[%s12728_s3 + $0x234] ss:$8 sps:$4 sm:$0xff]  }
 0x293   :  { %3270 = vmatprep.subr.bf16.mxu1 %v11937_v42  ;;  %12857 = vst [vmem:[#allocation20_spill] sm:$0xff] %v11963_v0 }
 0x296   :  { %3271 = vmatpush1.bf16.msra.mxu1 %v11944_v48  ;;  %v11970_v48 = vld [vmem:[%s12728_s3 + $0x230] ss:$8 sps:$4 sm:$0xff]  }
 0x297   :  { %3272 = vmatprep.subr.bf16.mxu1 %v11951_v31  ;;  %12858 = vst [vmem:[#allocation21_spill] sm:$0xff] %v11970_v48  ;;  %v11977_v31 = vld [vmem:[%s12728_s3 + $0x244] ss:$8 sps:$4 sm:$0xff]  }
 0x298   :  { %12859 = vst [vmem:[#allocation22_spill] sm:$0xff] %v11977_v31 }
 0x299   :  { %3156 = vmatmul.mubr.bf16.gmra.mrb[12].mxu1 %v11450_v39  ;;  %v11983_v39 = vld [vmem:[%s12728_s3 + $0x240] ss:$8 sps:$4 sm:$0xff]  }
 0x29a   :  { %3273 = vmatpush1.bf16.msra.mxu1 %v11957_v63  ;;  %3300 = vmatprep.mubr.bf16.mxu1 %v12807_v25  ;;  %12860 = vst [vmem:[#allocation23_spill] sm:$0xff] %v11983_v39  ;;  %v11989_v63 = vld [vmem:[%s12728_s3 + $0x254] ss:$8 sps:$4 sm:$0xff]  }
 0x29b   :  { %3274 = vmatprep.subr.bf16.mxu1 %v11963_v0  ;;  %12861 = vst [vmem:[#allocation24_spill] sm:$0xff] %v11989_v63  ;;  %v11995_v0 = vld [vmem:[%s12728_s3 + $0x250] ss:$8 sps:$4 sm:$0xff]  }
 0x29c   :  { %12862 = vst [vmem:[#allocation25_spill] sm:$0xff] %v11995_v0 }
 0x29e   :  { %3275 = vmatpush1.bf16.msra.mxu1 %v11970_v48  ;;  %v12001_v48 = vld [vmem:[%s12728_s3 + $0x264] ss:$8 sps:$4 sm:$0xff]  }
 0x29f   :  { %3276 = vmatprep.subr.bf16.mxu1 %v11977_v31  ;;  %12863 = vst [vmem:[#allocation26_spill] sm:$0xff] %v12001_v48  ;;  %v12007_v31 = vld [vmem:[%s12728_s3 + $0x260] ss:$8 sps:$4 sm:$0xff]  }
 0x2a0   :  { %12864 = vst [vmem:[#allocation27_spill] sm:$0xff] %v12007_v31 }
 0x2a2   :  { %3277 = vmatpush1.bf16.msra.mxu1 %v11983_v39  ;;  %v12013_v39 = vld [vmem:[%s12728_s3 + $0x274] ss:$8 sps:$4 sm:$0xff]  }
 0x2a3   :  { %3278 = vmatprep.subr.bf16.mxu1 %v11989_v63  ;;  %12865 = vst [vmem:[#allocation28_spill] sm:$0xff] %v12013_v39  ;;  %v12019_v63 = vld [vmem:[%s12728_s3 + $0x270] ss:$8 sps:$4 sm:$0xff]  }
 0x2a4   :  { %12866 = vst [vmem:[#allocation29_spill] sm:$0xff] %v12019_v63 }
 0x2a6   :  { %3279 = vmatpush1.bf16.msra.mxu1 %v11995_v0  ;;  %v12025_v0 = vld [vmem:[%s12728_s3 + $0x84] ss:$8 sps:$4 sm:$0xff]  }
 0x2a7   :  { %3280 = vmatprep.subr.bf16.mxu1 %v12001_v48  ;;  %12867 = vst [vmem:[#allocation30_spill] sm:$0xff] %v12025_v0  ;;  %v12031_v48 = vld [vmem:[%s12728_s3 + $0x80] ss:$8 sps:$4 sm:$0xff]  }
 0x2a8   :  { %12868 = vst [vmem:[#allocation31_spill] sm:$0xff] %v12031_v48 }
 0x2aa   :  { %3281 = vmatpush1.bf16.msra.mxu1 %v12007_v31  ;;  %v12037_v31 = vld [vmem:[%s12728_s3 + $0x94] ss:$8 sps:$4 sm:$0xff]  }
 0x2ab   :  { %3282 = vmatprep.subr.bf16.mxu1 %v12013_v39  ;;  %12869 = vst [vmem:[#allocation32_spill] sm:$0xff] %v12037_v31  ;;  %v12870_v39 = vpack.c.bf16 %v11419_v22, %v11408_v49  ;;  %v12054_v49 = vld [vmem:[%s12729_s2] ss:$0 sm:$0xff] }
 0x2ae   :  { %3283 = vmatpush1.bf16.msra.mxu1 %v12019_v63  ;;  %v12046_v63 = vld [vmem:[%s12728_s3 + $0x90] ss:$8 sps:$4 sm:$0xff]  }
 0x2af   :  { %4325 = vmatprep.subr.bf16.mxu1 %v12025_v0  ;;  %12871 = vst [vmem:[#allocation33_spill] sm:$0xff] %v12046_v63 }
 0x2b1   :  { %3301 = vmatmul.mubr.bf16.vlgmr.msra.gmra.mrb[8].mxu1 %v12870_v39 }
 0x2b2   :  { %4326 = vmatpush1.bf16.msra.mxu1 %v12031_v48  ;;  %3310 = vmatprep.mubr.bf16.mxu1 %v12807_v25  ;;  %v3171_v48 = vpack.c.bf16 %v11414_v19, %v11414_v19 }
 0x2b3   :  { %4327 = vmatprep.subr.bf16.mxu1 %v12037_v31 }
 0x2b5   :  { %v4139_v0 = vpop.f32.mrb[16].mxu0 }
 0x2b6   :  { %4328 = vmatpush1.bf16.msra.mxu1 %v12046_v63  ;;  %v4141_v42 = vpop.f32.mrb[17].mxu0 }
 0x2b7   :  { %v4166_v22 = vmax.f32 %v4139_v0, %v4141_v42  ;;  %v4143_v39 = vpop.f32.mrb[18].mxu0  ;;  %4329 = vmatprep.subr.bf16.mxu1 %v11296_v26 }
 0x2b8   :  { %v4145_v40 = vpop.f32.mrb[19].mxu0 }
 0x2b9   :  { %v4177_v13 = vadd.f32 %v12054_v49, %v4166_v22  ;;  %3311 = vmatmul.mubr.bf16.gmra.mrb[12].mxu1 %v3171_v48  ;;  %v4167_v31 = vmax.f32 %v4143_v39, %v4145_v40 }
 0x2ba   :  { %4330 = vmatpush1.bf16.msra.mxu1 %v11307_v30  ;;  %4357 = vmatprep.mubr.bf16.mxu1 %v12807_v25 }
 0x2bb   :  { %v4181_v63 = vmax.f32 %v4177_v13, 0.0  ;;  %v4178_v37 = vadd.f32 %v12054_v49, %v4167_v31  ;;  %4331 = vmatprep.subr.bf16.mxu1 %v11318_v38 }
 0x2bd   :  { %v4182_v0 = vmax.f32 %v4178_v37, 0.0  ;;  %v4149_v42 = vpop.f32.mrb[20].mxu0  ;;  %v4189_v26 = vrot.slane %v4181_v63, 1 }
 0x2be   :  { %4332 = vmatpush1.bf16.msra.mxu1 %v11327_v50  ;;  %v4151_v19 = vpop.f32.mrb[21].mxu0 }
 0x2bf   :  { %v4190_v29 = vrot.slane %v4182_v0, 1  ;;  %v4168_v61 = vmax.f32 %v4149_v42, %v4151_v19  ;;  %v4153_v22 = vpop.f32.mrb[22].mxu0  ;;  %4333 = vmatprep.subr.bf16.mxu1 %v11337_v55 }
 0x2c0   :  { %v4155_v40 = vpop.f32.mrb[23].mxu0 }
 0x2c1   :  { %v4191_v30 = vsel %vm870_vm0, %v4189_v26, %v4190_v29  ;;  %v4179_v48 = vadd.f32 %v12054_v49, %v4168_v61  ;;  %v4169_v13 = vmax.f32 %v4153_v22, %v4155_v40 }
 0x2c2   :  { %v4200_v31 = vmax.f32 %v4181_v63, %v4191_v30  ;;  %4334 = vmatpush1.bf16.msra.mxu1 %v11352_v57 }
 0x2c3   :  { %v4183_v38 = vmax.f32 %v4179_v48, 0.0  ;;  %v4180_v37 = vadd.f32 %v12054_v49, %v4169_v13  ;;  %4335 = vmatprep.subr.bf16.mxu1 %v11361_v1 }
 0x2c5   :  { %v4192_v50 = vrot.slane %v4183_v38, 1  ;;  %v4184_v39 = vmax.f32 %v4180_v37, 0.0 }
 0x2c6   :  { %4336 = vmatpush1.bf16.msra.mxu1 %v11371_v3 }
 0x2c7   :  { %v4193_v55 = vsel %vm870_vm0, %v4190_v29, %v4192_v50  ;;  %v4194_v42 = vrot.slane %v4184_v39, 1  ;;  %4337 = vmatprep.subr.bf16.mxu1 %v11380_v7 }
 0x2c8   :  { %v12074_v19 = vmax.f32 %v4182_v0, %v4193_v55 }
 0x2c9   :  { %v4195_v61 = vsel %vm870_vm0, %v4192_v50, %v4194_v42  ;;  %v12077_v63 = vmax.f32 %v4184_v39, %v4194_v42 }
 0x2ca   :  { %v4204_v57 = vpack.c.bf16 %v12074_v19, %v4200_v31  ;;  %v12080_v26 = vmax.f32 %v4183_v38, %v4195_v61  ;;  %4338 = vmatpush1.bf16.msra.mxu1 %v11396_v10 }
 0x2cb   :  { %4339 = vmatprep.subr.bf16.mxu1 %v11406_v36 }
 0x2cc   :  { %v4665_v1 = vpack.c.bf16 %v12077_v63, %v12080_v26  ;;  %v12088_v3 = vpack.c.bf16 %v12080_v26, %v12080_v26  ;;  %v4240_v7 = vrot.slane %v4204_v57, 1  ;;  %v4523_v29 = vrot.slane %v4204_v57, 2 }
 0x2cd   :  { %v4825_v0 = vpack.c.bf16 %v12080_v26, %v12074_v19  ;;  %v4683_v40 = vrot.slane %v4204_v57, 3 }
 0x2ce   :  { %v12092_v22 = vrot.slane %v4665_v1, 3  ;;  %4340 = vmatpush1.bf16.msra.mxu1 %v11425_v23  ;;  %v4241_v10 = vrot.slane %v12088_v3, 1  ;;  %v4524_v36 = vrot.slane %v12088_v3, 2 }
 0x2cf   :  { %4456 = vmatprep.subr.bf16.mxu1 %v11434_v33 }
 0x2d0   :  { %v4242_v30 = vsel %vm870_vm0, %v4240_v7, %v4241_v10  ;;  %v12102_v48 = vsel %vm1208_vm1, %v4523_v29, %v4524_v36  ;;  %v12106_v13 = vsel %vm1370_vm2, %v4683_v40, %v12092_v22  ;;  %v12893_v7 = vld [vmem:[#allocation24_spill] sm:$0xff]  ;;  %v12894_v29 = vld [vmem:[#allocation25_spill] sm:$0xff] }
 0x2d1   :  { %4358 = vmatmul.mubr.bf16.vlgmr.msra.gmra.mrb[16].mxu1 %v4242_v30  ;;  %v12898_v40 = vld [vmem:[#allocation29_spill] sm:$0xff]  ;;  %v12899_v30 = vld [vmem:[#allocation30_spill] sm:$0xff] }
 0x2d2   :  { %4457 = vmatpush1.bf16.msra.mxu1 %v11456_v45  ;;  %4367 = vmatprep.mubr.bf16.mxu1 %v12807_v25  ;;  %v12123_v45 = vld [vmem:[%s12730_s4] ss:$0 sm:$0xff] }
 0x2d3   :  { %4458 = vmatprep.subr.bf16.mxu1 %v11468_v54 }
 0x2d6   :  { %4459 = vmatpush1.bf16.msra.mxu1 %v11487_v17 }
 0x2d7   :  { %4460 = vmatprep.subr.bf16.mxu1 %v11497_v24 }
 0x2d9   :  { %4368 = vmatmul.mubr.bf16.gmra.mrb[20].mxu1 %v4241_v10  ;;  %v12895_v10 = vld [vmem:[#allocation26_spill] sm:$0xff] }
 0x2da   :  { %4461 = vmatpush1.bf16.msra.mxu1 %v11506_v41  ;;  %4488 = vmatprep.mubr.bf16.mxu1 %v12807_v25 }
 0x2db   :  { %4462 = vmatprep.subr.bf16.mxu1 %v11515_v18 }
 0x2de   :  { %4463 = vmatpush1.bf16.msra.mxu1 %v11524_v44 }
 0x2df   :  { %4464 = vmatprep.subr.bf16.mxu1 %v11534_v47 }
 0x2e2   :  { %4465 = vmatpush1.bf16.msra.mxu1 %v11549_v4 }
 0x2e3   :  { %4466 = vmatprep.subr.bf16.mxu1 %v11558_v8 }
 0x2e4   :  { %v1646_v23 = vpop.f32.mrb[0].mxu1 }
 0x2e5   :  { %v1648_v33 = vpop.f32.mrb[1].mxu1 }
 0x2e6   :  { %v1669_v54 = vmax.f32 %v1646_v23, %v1648_v33  ;;  %v1650_v17 = vpop.f32.mrb[2].mxu1  ;;  %4467 = vmatpush1.bf16.msra.mxu1 %v11567_v56  ;;  %v9641_v23 = vld [vmem:[%s12728_s3 + $0xa4] ss:$8 sps:$4 sm:$0xff]  }
 0x2e7   :  { %v1652_v24 = vpop.f32.mrb[3].mxu1  ;;  %4468 = vmatprep.subr.bf16.mxu1 %v11576_v46 }
 0x2e8   :  { %v1679_v41 = vadd.f32 %v12123_v45, %v1669_v54  ;;  %v1670_v18 = vmax.f32 %v1650_v17, %v1652_v24  ;;  %v12902_v54 = vld [vmem:[#allocation33_spill] sm:$0xff]  ;;  %v9639_v24 = vld [vmem:[%s12728_s3 + $0xa0] ss:$8 sps:$4 sm:$0xff]  }
 0x2ea   :  { %v1682_v44 = vmax.f32 %v1679_v41, 0.0  ;;  %v1680_v47 = vadd.f32 %v12123_v45, %v1670_v18  ;;  %4469 = vmatpush1.bf16.msra.mxu1 %v11592_v14  ;;  %v9644_v41 = vld [vmem:[%s12728_s3 + $0xb4] ss:$8 sps:$4 sm:$0xff]  }
 0x2eb   :  { %4470 = vmatprep.subr.bf16.mxu1 %v11601_v28 }
 0x2ec   :  { %v1683_v4 = vmax.f32 %v1680_v47, 0.0  ;;  %v1656_v8 = vpop.f32.mrb[4].mxu1  ;;  %v1689_v38 = vrot.slane %v1682_v44, 2 }
 0x2ed   :  { %v1658_v31 = vpop.f32.mrb[5].mxu1 }
 0x2ee   :  { %v1690_v37 = vrot.slane %v1683_v4, 2  ;;  %v1671_v50 = vmax.f32 %v1656_v8, %v1658_v31  ;;  %v1660_v56 = vpop.f32.mrb[6].mxu1  ;;  %4471 = vmatpush1.bf16.msra.mxu1 %v11610_v32  ;;  %v9647_v31 = vld [vmem:[%s12728_s3 + $0xc4] ss:$8 sps:$4 sm:$0xff]  }
 0x2ef   :  { %v1661_v46 = vpop.f32.mrb[7].mxu1  ;;  %4608 = vmatprep.subr.bf16.mxu1 %v11619_v35  ;;  %v9645_v56 = vld [vmem:[%s12728_s3 + $0xc0] ss:$8 sps:$4 sm:$0xff]  }
 0x2f0   :  { %v1691_v39 = vsel %vm1208_vm1, %v1689_v38, %v1690_v37  ;;  %v1681_v55 = vadd.f32 %v12123_v45, %v1671_v50 }
 0x2f1   :  { %v1697_v42 = vmax.f32 %v1682_v44, %v1691_v39  ;;  %4489 = vmatmul.mubr.bf16.vlgmr.msra.gmra.mrb[16].mxu1 %v4204_v57 }
 0x2f2   :  { %v1684_v14 = vmax.f32 %v1681_v55, 0.0  ;;  %4609 = vmatpush1.bf16.msra.mxu1 %v11629_v52  ;;  %4498 = vmatprep.mubr.bf16.mxu1 %v12807_v25  ;;  %v12872_v52 = vld [vmem:[#allocation3_spill] sm:$0xff] }
 0x2f3   :  { %1700 = vst [vmem:[#allocation2] sm:$0x1] %v1697_v42  ;;  %v1702_v28 = vrot.slane %v1697_v42, 4  ;;  %4610 = vmatprep.subr.bf16.mxu1 %v11638_v58  ;;  %v12873_v58 = vld [vmem:[#allocation4_spill] sm:$0xff] }
 0x2f4   :  { %v1692_v61 = vrot.slane %v1684_v14, 2 }
 0x2f5   :  { %1704 = vst [vmem:[#allocation2 + $0x8] sm:$0x1] %v1702_v28 }
 0x2f6   :  { %v1693_v32 = vsel %vm1208_vm1, %v1690_v37, %v1692_v61  ;;  %v1699_v35 = vmax.f32 %v1684_v14, %v1692_v61  ;;  %4611 = vmatpush1.bf16.msra.mxu1 %v11648_v20  ;;  %v12874_v20 = vld [vmem:[#allocation5_spill] sm:$0xff] }
 0x2f7   :  { %v1698_v1 = vmax.f32 %v1683_v4, %v1693_v32  ;;  %4612 = vmatprep.subr.bf16.mxu1 %v11658_v21  ;;  %v12875_v21 = vld [vmem:[#allocation6_spill] sm:$0xff]  ;;  %v9642_v4 = vld [vmem:[%s12728_s3 + $0xb0] ss:$8 sps:$4 sm:$0xff]   ;;  %v9650_v14 = vld [vmem:[%s12728_s3 + $0xd4] ss:$8 sps:$4 sm:$0xff]  }
 0x2f8   :  { %1710 = vst [vmem:[#allocation2 + $0x20] sm:$0x1] %v1699_v35 }
 0x2f9   :  { %1705 = vst [vmem:[#allocation2 + $0x10] sm:$0x1] %v1698_v1  ;;  %v1707_v57 = vrot.slane %v1698_v1, 4  ;;  %4499 = vmatmul.mubr.bf16.gmra.mrb[20].mxu1 %v12088_v3  ;;  %v12892_v3 = vld [vmem:[#allocation23_spill] sm:$0xff] }
 0x2fa   :  { %4613 = vmatpush1.bf16.msra.mxu1 %v11667_v27  ;;  %4640 = vmatprep.mubr.bf16.mxu1 %v12807_v25  ;;  %v12876_v27 = vld [vmem:[#allocation7_spill] sm:$0xff] }
 0x2fb   :  { %1709 = vst [vmem:[#allocation2 + $0x18] sm:$0x1] %v1707_v57  ;;  %4614 = vmatprep.subr.bf16.mxu1 %v11676_v51  ;;  %v12877_v51 = vld [vmem:[#allocation8_spill] sm:$0xff] }
 0x2fc   :  { %v9648_v57 = vld [vmem:[%s12728_s3 + $0xd0] ss:$8 sps:$4 sm:$0xff]  }
 0x2fe   :  { %4615 = vmatpush1.bf16.msra.mxu1 %v11686_v2  ;;  %v12878_v2 = vld [vmem:[#allocation9_spill] sm:$0xff] }
 0x2ff   :  { %4616 = vmatprep.subr.bf16.mxu1 %v11696_v6  ;;  %v12879_v6 = vld [vmem:[#allocation10_spill] sm:$0xff] }
 0x302   :  { %4617 = vmatpush1.bf16.msra.mxu1 %v11711_v12  ;;  %v12880_v12 = vld [vmem:[#allocation11_spill] sm:$0xff] }
 0x303   :  { %4618 = vmatprep.subr.bf16.mxu1 %v11720_v16  ;;  %v12881_v16 = vld [vmem:[#allocation12_spill] sm:$0xff] }
 0x306   :  { %4619 = vmatpush1.bf16.msra.mxu1 %v11729_v34  ;;  %v12882_v34 = vld [vmem:[#allocation13_spill] sm:$0xff] }
 0x307   :  { %4620 = vmatprep.subr.bf16.mxu1 %v11738_v53  ;;  %v12883_v53 = vld [vmem:[#allocation14_spill] sm:$0xff] }
 0x30a   :  { %4621 = vmatpush1.bf16.msra.mxu1 %v11754_v62  ;;  %v12884_v62 = vld [vmem:[#allocation15_spill] sm:$0xff] }
 0x30b   :  { %4622 = vmatprep.subr.bf16.mxu1 %v11763_v9  ;;  %v12885_v9 = vld [vmem:[#allocation16_spill] sm:$0xff] }
 0x30e   :  { %4623 = vmatpush1.bf16.msra.mxu1 %v11772_v11  ;;  %v12886_v11 = vld [vmem:[#allocation17_spill] sm:$0xff] }
 0x30f   :  { %4768 = vmatprep.subr.bf16.mxu1 %v11781_v15  ;;  %v12887_v15 = vld [vmem:[#allocation18_spill] sm:$0xff] }
 0x311   :  { %4641 = vmatmul.mubr.bf16.vlgmr.msra.gmra.mrb[16].mxu1 %v12102_v48  ;;  %v12900_v48 = vld [vmem:[#allocation31_spill] sm:$0xff] }
 0x312   :  { %4769 = vmatpush1.bf16.msra.mxu1 %v11796_v59  ;;  %4650 = vmatprep.mubr.bf16.mxu1 %v12807_v25  ;;  %v12888_v59 = vld [vmem:[#allocation19_spill] sm:$0xff] }
 0x313   :  { %4770 = vmatprep.subr.bf16.mxu1 %v11805_v43  ;;  %v12889_v43 = vld [vmem:[#allocation20_spill] sm:$0xff] }
 0x316   :  { %4771 = vmatpush1.bf16.msra.mxu1 %v11815_v5  ;;  %v12890_v5 = vld [vmem:[#allocation21_spill] sm:$0xff] }
 0x317   :  { %4772 = vmatprep.subr.bf16.mxu1 %v11825_v60  ;;  %v12891_v60 = vld [vmem:[#allocation22_spill] sm:$0xff] }
 0x319   :  { %4651 = vmatmul.mubr.bf16.gmra.mrb[20].mxu1 %v4524_v36  ;;  %v12896_v36 = vld [vmem:[#allocation27_spill] sm:$0xff] }
 0x31a   :  { %4773 = vmatpush1.bf16.msra.mxu1 %v12872_v52  ;;  %4800 = vmatprep.mubr.bf16.mxu1 %v12807_v25 }
 0x31b   :  { %4774 = vmatprep.subr.bf16.mxu1 %v12873_v58 }
 0x31e   :  { %4775 = vmatpush1.bf16.msra.mxu1 %v12874_v20  ;;  %v9653_v20 = vld [vmem:[%s12728_s3 + $0xe4] ss:$8 sps:$4 sm:$0xff]  }
 0x31f   :  { %4776 = vmatprep.subr.bf16.mxu1 %v12875_v21 }
 0x322   :  { %4777 = vmatpush1.bf16.msra.mxu1 %v12876_v27 }
 0x323   :  { %4778 = vmatprep.subr.bf16.mxu1 %v12877_v51  ;;  %v9651_v51 = vld [vmem:[%s12728_s3 + $0xe0] ss:$8 sps:$4 sm:$0xff]  }
 0x326   :  { %4779 = vmatpush1.bf16.msra.mxu1 %v12878_v2 }
 0x327   :  { %4780 = vmatprep.subr.bf16.mxu1 %v12879_v6 }
 0x32a   :  { %4781 = vmatpush1.bf16.msra.mxu1 %v12880_v12 }
 0x32b   :  { %4782 = vmatprep.subr.bf16.mxu1 %v12881_v16 }
 0x32e   :  { %4783 = vmatpush1.bf16.msra.mxu1 %v12882_v34 }
 0x32f   :  { %4923 = vmatprep.subr.bf16.mxu1 %v12883_v53 }
 0x331   :  { %4801 = vmatmul.mubr.bf16.vlgmr.msra.gmra.mrb[16].mxu1 %v12106_v13  ;;  %v12901_v13 = vld [vmem:[#allocation32_spill] sm:$0xff] }
 0x332   :  { %4924 = vmatpush1.bf16.msra.mxu1 %v12884_v62  ;;  %4810 = vmatprep.mubr.bf16.mxu1 %v12807_v25 }
 0x333   :  { %4925 = vmatprep.subr.bf16.mxu1 %v12885_v9  ;;  %v9654_v9 = vld [vmem:[%s12728_s3 + $0xf0] ss:$8 sps:$4 sm:$0xff]  }
 0x336   :  { %4926 = vmatpush1.bf16.msra.mxu1 %v12886_v11  ;;  %v9659_v11 = vld [vmem:[%s12728_s3 + $0x4] ss:$8 sps:$4 sm:$0xff]  }
 0x337   :  { %4927 = vmatprep.subr.bf16.mxu1 %v12887_v15 }
 0x339   :  { %4811 = vmatmul.mubr.bf16.gmra.mrb[20].mxu1 %v12092_v22  ;;  %v12897_v22 = vld [vmem:[#allocation28_spill] sm:$0xff] }
 0x33a   :  { %4928 = vmatpush1.bf16.msra.mxu1 %v12888_v59  ;;  %4955 = vmatprep.mubr.bf16.mxu1 %v12807_v25 }
 0x33b   :  { %4929 = vmatprep.subr.bf16.mxu1 %v12889_v43 }
 0x33e   :  { %4930 = vmatpush1.bf16.msra.mxu1 %v12890_v5 }
 0x33f   :  { %4931 = vmatprep.subr.bf16.mxu1 %v12891_v60 }
 0x342   :  { %4932 = vmatpush1.bf16.msra.mxu1 %v12892_v3 }
 0x343   :  { %4933 = vmatprep.subr.bf16.mxu1 %v12893_v7  ;;  %v9657_v7 = vld [vmem:[%s12728_s3] ss:$8 sps:$4 sm:$0xff]  }
 0x346   :  { %4934 = vmatpush1.bf16.msra.mxu1 %v12894_v29 }
 0x347   :  { %4935 = vmatprep.subr.bf16.mxu1 %v12895_v10 }
 0x34a   :  { %4936 = vmatpush1.bf16.msra.mxu1 %v12896_v36 }
 0x34b   :  { %4937 = vmatprep.subr.bf16.mxu1 %v12897_v22  ;;  %v9662_v22 = vld [vmem:[%s12728_s3 + $0x14] ss:$8 sps:$4 sm:$0xff]  }
 0x34e   :  { %4938 = vmatpush1.bf16.msra.mxu1 %v12898_v40 }
 0x34f   :  { %5980 = vmatprep.subr.bf16.mxu1 %v12899_v30 }
 0x351   :  { %4956 = vmatmul.mubr.bf16.vlgmr.msra.gmra.mrb[16].mxu1 %v4825_v0  ;;  %v4826_v0 = vpack.c.bf16 %v12077_v63, %v12077_v63 }
 0x352   :  { %5981 = vmatpush1.bf16.msra.mxu1 %v12900_v48  ;;  %4965 = vmatprep.mubr.bf16.mxu1 %v12807_v25 }
 0x353   :  { %5982 = vmatprep.subr.bf16.mxu1 %v12901_v13  ;;  %v9660_v13 = vld [vmem:[%s12728_s3 + $0x10] ss:$8 sps:$4 sm:$0xff]  }
 0x355   :  { %v5794_v33 = vpop.f32.mrb[24].mxu0 }
 0x356   :  { %5983 = vmatpush1.bf16.msra.mxu1 %v12902_v54  ;;  %v5796_v17 = vpop.f32.mrb[25].mxu0  ;;  %v9668_v54 = vld [vmem:[%s12728_s3 + $0x34] ss:$8 sps:$4 sm:$0xff]  }
 0x357   :  { %v5821_v19 = vmax.f32 %v5794_v33, %v5796_v17  ;;  %v5798_v26 = vpop.f32.mrb[26].mxu0  ;;  %5984 = vmatprep.subr.bf16.mxu1 %v9641_v23  ;;  %v9665_v23 = vld [vmem:[%s12728_s3 + $0x24] ss:$8 sps:$4 sm:$0xff]   ;;  %v9663_v33 = vld [vmem:[%s12728_s3 + $0x20] ss:$8 sps:$4 sm:$0xff]  }
 0x358   :  { %v5800_v18 = vpop.f32.mrb[27].mxu0  ;;  %v9666_v17 = vld [vmem:[%s12728_s3 + $0x30] ss:$8 sps:$4 sm:$0xff]  }
 0x359   :  { %v5832_v44 = vadd.f32 %v12054_v49, %v5821_v19  ;;  %4966 = vmatmul.mubr.bf16.gmra.mrb[20].mxu1 %v4826_v0  ;;  %v5822_v47 = vmax.f32 %v5798_v26, %v5800_v18  ;;  %v9669_v19 = vld [vmem:[%s12728_s3 + $0x40] ss:$8 sps:$4 sm:$0xff]   ;;  %v9674_v26 = vld [vmem:[%s12728_s3 + $0x54] ss:$8 sps:$4 sm:$0xff]   ;;  %v9672_v0 = vld [vmem:[%s12728_s3 + $0x50] ss:$8 sps:$4 sm:$0xff]  }
 0x35a   :  { %5985 = vmatpush1.bf16.msra.mxu1 %v9639_v24  ;;  %6012 = vmatprep.mubr.bf16.mxu1 %v12807_v25  ;;  %v9671_v24 = vld [vmem:[%s12728_s3 + $0x44] ss:$8 sps:$4 sm:$0xff]  }
 0x35b   :  { %v5836_v8 = vmax.f32 %v5832_v44, 0.0  ;;  %v5833_v63 = vadd.f32 %v12054_v49, %v5822_v47  ;;  %5986 = vmatprep.subr.bf16.mxu1 %v9644_v41  ;;  %v9677_v41 = vld [vmem:[%s12728_s3 + $0x64] ss:$8 sps:$4 sm:$0xff]  }
 0x35d   :  { %v5837_v38 = vmax.f32 %v5833_v63, 0.0  ;;  %v5804_v37 = vpop.f32.mrb[28].mxu0  ;;  %v5844_v46 = vrot.slane %v5836_v8, 1 }
 0x35e   :  { %5987 = vmatpush1.bf16.msra.mxu1 %v9642_v4  ;;  %v5806_v50 = vpop.f32.mrb[29].mxu0 }
 0x35f   :  { %v5845_v39 = vrot.slane %v5837_v38, 1  ;;  %v5823_v55 = vmax.f32 %v5804_v37, %v5806_v50  ;;  %v5808_v42 = vpop.f32.mrb[30].mxu0  ;;  %5988 = vmatprep.subr.bf16.mxu1 %v9647_v31  ;;  %v9680_v31 = vld [vmem:[%s12728_s3 + $0x74] ss:$8 sps:$4 sm:$0xff]  }
 0x360   :  { %v5810_v28 = vpop.f32.mrb[31].mxu0 }
 0x361   :  { %v5846_v61 = vsel %vm870_vm0, %v5844_v46, %v5845_v39  ;;  %v5834_v32 = vadd.f32 %v12054_v49, %v5823_v55  ;;  %v5824_v35 = vmax.f32 %v5808_v42, %v5810_v28  ;;  %v9678_v46 = vld [vmem:[%s12728_s3 + $0x70] ss:$8 sps:$4 sm:$0xff]  }
 0x362   :  { %v5855_v1 = vmax.f32 %v5836_v8, %v5846_v61  ;;  %5989 = vmatpush1.bf16.msra.mxu1 %v9645_v56  ;;  %v9675_v8 = vld [vmem:[%s12728_s3 + $0x60] ss:$8 sps:$4 sm:$0xff]  }
 0x363   :  { %v5838_v52 = vmax.f32 %v5834_v32, 0.0  ;;  %v5835_v58 = vadd.f32 %v12054_v49, %v5824_v35  ;;  %5990 = vmatprep.subr.bf16.mxu1 %v9650_v14  ;;  %v9656_v49 = vld [vmem:[%s12728_s3 + $0xf4] ss:$8 sps:$4 sm:$0xff]  }
 0x365   :  { %v5847_v21 = vrot.slane %v5838_v52, 1  ;;  %v5839_v27 = vmax.f32 %v5835_v58, 0.0 }
 0x366   :  { %5991 = vmatpush1.bf16.msra.mxu1 %v9648_v57 }
 0x367   :  { %v5848_v2 = vsel %vm870_vm0, %v5845_v39, %v5847_v21  ;;  %v5849_v6 = vrot.slane %v5839_v27, 1  ;;  %5992 = vmatprep.subr.bf16.mxu1 %v9653_v20  ;;  %v9683_v39 = vld [vmem:[%s12728_s3 + $0x104] ss:$8 sps:$4 sm:$0xff]  }
 0x368   :  { %v12245_v12 = vmax.f32 %v5837_v38, %v5848_v2 }
 0x369   :  { %v5850_v16 = vsel %vm870_vm0, %v5847_v21, %v5849_v6  ;;  %v12248_v34 = vmax.f32 %v5839_v27, %v5849_v6  ;;  %v9689_v6 = vld [vmem:[%s12728_s3 + $0x124] ss:$8 sps:$4 sm:$0xff]  }
 0x36a   :  { %v12251_v53 = vpack.c.bf16 %v12245_v12, %v5855_v1  ;;  %v12253_v62 = vmax.f32 %v5838_v52, %v5850_v16  ;;  %5993 = vmatpush1.bf16.msra.mxu1 %v9651_v51  ;;  %v9681_v1 = vld [vmem:[%s12728_s3 + $0x100] ss:$8 sps:$4 sm:$0xff]   ;;  %v9686_v52 = vld [vmem:[%s12728_s3 + $0x114] ss:$8 sps:$4 sm:$0xff]   ;;  %v9684_v51 = vld [vmem:[%s12728_s3 + $0x110] ss:$8 sps:$4 sm:$0xff]  }
 0x36b   :  { %5994 = vmatprep.subr.bf16.mxu1 %v9656_v49 }
 0x36c   :  { %v6320_v15 = vpack.c.bf16 %v12248_v34, %v12253_v62  ;;  %v12265_v59 = vpack.c.bf16 %v12253_v62, %v12253_v62  ;;  %v5895_v43 = vrot.slane %v12251_v53, 1  ;;  %v6178_v5 = vrot.slane %v12251_v53, 2 }
 0x36d   :  { %v6480_v60 = vpack.c.bf16 %v12253_v62, %v12245_v12  ;;  %v6338_v36 = vrot.slane %v12251_v53, 3 }
 0x36e   :  { %v12271_v3 = vrot.slane %v6320_v15, 3  ;;  %5995 = vmatpush1.bf16.msra.mxu1 %v9654_v9  ;;  %v5896_v29 = vrot.slane %v12265_v59, 1  ;;  %v6179_v10 = vrot.slane %v12265_v59, 2 }
 0x36f   :  { %6111 = vmatprep.subr.bf16.mxu1 %v9659_v11  ;;  %v9692_v11 = vld [vmem:[%s12728_s3 + $0x134] ss:$8 sps:$4 sm:$0xff]  }
 0x370   :  { %v5897_v40 = vsel %vm870_vm0, %v5895_v43, %v5896_v29  ;;  %v12286_v30 = vsel %vm1208_vm1, %v6178_v5, %v6179_v10  ;;  %v12290_v48 = vsel %vm1370_vm2, %v6338_v36, %v12271_v3  ;;  %v9690_v43 = vld [vmem:[%s12728_s3 + $0x130] ss:$8 sps:$4 sm:$0xff]   ;;  %v9695_v5 = vld [vmem:[%s12728_s3 + $0x144] ss:$8 sps:$4 sm:$0xff]  }
 0x371   :  { %6013 = vmatmul.mubr.bf16.vlgmr.msra.gmra.mrb[24].mxu1 %v5897_v40  ;;  %v9696_v36 = vld [vmem:[%s12728_s3 + $0x150] ss:$8 sps:$4 sm:$0xff]   ;;  %v9699_v40 = vld [vmem:[%s12728_s3 + $0x160] ss:$8 sps:$4 sm:$0xff]  }
 0x372   :  { %6112 = vmatpush1.bf16.msra.mxu1 %v9657_v7  ;;  %6022 = vmatprep.mubr.bf16.mxu1 %v12807_v25  ;;  %v9693_v7 = vld [vmem:[%s12728_s3 + $0x140] ss:$8 sps:$4 sm:$0xff]  }
 0x373   :  { %6113 = vmatprep.subr.bf16.mxu1 %v9662_v22  ;;  %v9701_v22 = vld [vmem:[%s12728_s3 + $0x164] ss:$8 sps:$4 sm:$0xff]  }
 0x376   :  { %6114 = vmatpush1.bf16.msra.mxu1 %v9660_v13  ;;  %v9704_v13 = vld [vmem:[%s12728_s3 + $0x174] ss:$8 sps:$4 sm:$0xff]  }
 0x377   :  { %6115 = vmatprep.subr.bf16.mxu1 %v9665_v23  ;;  %v9702_v23 = vld [vmem:[%s12728_s3 + $0x170] ss:$8 sps:$4 sm:$0xff]  }
 0x379   :  { %6023 = vmatmul.mubr.bf16.gmra.mrb[28].mxu1 %v5896_v29  ;;  %v9698_v29 = vld [vmem:[%s12728_s3 + $0x154] ss:$8 sps:$4 sm:$0xff]  }
 0x37a   :  { %6116 = vmatpush1.bf16.msra.mxu1 %v9663_v33  ;;  %6143 = vmatprep.mubr.bf16.mxu1 %v12807_v25  ;;  %v9707_v33 = vld [vmem:[%s12728_s3 + $0x184] ss:$8 sps:$4 sm:$0xff]  }
 0x37b   :  { %6117 = vmatprep.subr.bf16.mxu1 %v9668_v54  ;;  %v9705_v54 = vld [vmem:[%s12728_s3 + $0x180] ss:$8 sps:$4 sm:$0xff]  }
 0x37e   :  { %6118 = vmatpush1.bf16.msra.mxu1 %v9666_v17  ;;  %v9710_v17 = vld [vmem:[%s12728_s3 + $0x194] ss:$8 sps:$4 sm:$0xff]  }
 0x37f   :  { %6119 = vmatprep.subr.bf16.mxu1 %v9671_v24  ;;  %v9708_v24 = vld [vmem:[%s12728_s3 + $0x190] ss:$8 sps:$4 sm:$0xff]  }
 0x382   :  { %6120 = vmatpush1.bf16.msra.mxu1 %v9669_v19  ;;  %v9713_v19 = vld [vmem:[%s12728_s3 + $0x1a4] ss:$8 sps:$4 sm:$0xff]  }
 0x383   :  { %6121 = vmatprep.subr.bf16.mxu1 %v9674_v26  ;;  %v9711_v26 = vld [vmem:[%s12728_s3 + $0x1a0] ss:$8 sps:$4 sm:$0xff]  }
 0x384   :  { %v3302_v18 = vpop.f32.mrb[8].mxu1 }
 0x385   :  { %v3304_v44 = vpop.f32.mrb[9].mxu1 }
 0x386   :  { %v3325_v47 = vmax.f32 %v3302_v18, %v3304_v44  ;;  %v3306_v4 = vpop.f32.mrb[10].mxu1  ;;  %6122 = vmatpush1.bf16.msra.mxu1 %v9672_v0  ;;  %v9714_v0 = vld [vmem:[%s12728_s3 + $0x1b0] ss:$8 sps:$4 sm:$0xff]   ;;  %v9717_v18 = vld [vmem:[%s12728_s3 + $0x1c0] ss:$8 sps:$4 sm:$0xff]  }
 0x387   :  { %v3308_v63 = vpop.f32.mrb[11].mxu1  ;;  %6123 = vmatprep.subr.bf16.mxu1 %v9677_v41  ;;  %v9719_v41 = vld [vmem:[%s12728_s3 + $0x1c4] ss:$8 sps:$4 sm:$0xff]  }
 0x388   :  { %v3335_v38 = vadd.f32 %v12123_v45, %v3325_v47  ;;  %v3326_v37 = vmax.f32 %v3306_v4, %v3308_v63  ;;  %v9754_v44 = vld [vmem:[%s12731_s5] sm:$0xff]   ;;  %v9755_v47 = vld [vmem:[%s12731_s5 + $0x48] sm:$0xff]   ;;  %v9720_v4 = vld [vmem:[%s12728_s3 + $0x1d0] ss:$8 sps:$4 sm:$0xff]  }
 0x389   :  { %v9723_v63 = vld [vmem:[%s12728_s3 + $0x1e0] ss:$8 sps:$4 sm:$0xff]  }
 0x38a   :  { %v3338_v50 = vmax.f32 %v3335_v38, 0.0  ;;  %v3336_v56 = vadd.f32 %v12123_v45, %v3326_v37  ;;  %6124 = vmatpush1.bf16.msra.mxu1 %v9675_v8  ;;  %v9725_v8 = vld [vmem:[%s12728_s3 + $0x1e4] ss:$8 sps:$4 sm:$0xff]   ;;  %v9726_v38 = vld [vmem:[%s12728_s3 + $0x1f0] ss:$8 sps:$4 sm:$0xff]  }
 0x38b   :  { %6125 = vmatprep.subr.bf16.mxu1 %v9680_v31  ;;  %v9728_v31 = vld [vmem:[%s12728_s3 + $0x1f4] ss:$8 sps:$4 sm:$0xff]   ;;  %v9731_v37 = vld [vmem:[%s12728_s3 + $0x204] ss:$8 sps:$4 sm:$0xff]  }
 0x38c   :  { %v3339_v55 = vmax.f32 %v3336_v56, 0.0  ;;  %v3312_v42 = vpop.f32.mrb[12].mxu1  ;;  %v3344_v28 = vrot.slane %v3338_v50, 2  ;;  %v9734_v56 = vld [vmem:[%s12728_s3 + $0x214] ss:$8 sps:$4 sm:$0xff]  }
 0x38d   :  { %v3314_v14 = vpop.f32.mrb[13].mxu1 }
 0x38e   :  { %v3345_v61 = vrot.slane %v3339_v55, 2  ;;  %v3327_v32 = vmax.f32 %v3312_v42, %v3314_v14  ;;  %v3316_v35 = vpop.f32.mrb[14].mxu1  ;;  %6126 = vmatpush1.bf16.msra.mxu1 %v9678_v46  ;;  %v9732_v46 = vld [vmem:[%s12728_s3 + $0x210] ss:$8 sps:$4 sm:$0xff]   ;;  %v9740_v42 = vld [vmem:[%s12728_s3 + $0x234] ss:$8 sps:$4 sm:$0xff]  }
 0x38f   :  { %v3317_v57 = vpop.f32.mrb[15].mxu1  ;;  %6263 = vmatprep.subr.bf16.mxu1 %v9683_v39  ;;  %v9737_v39 = vld [vmem:[%s12728_s3 + $0x224] ss:$8 sps:$4 sm:$0xff]   ;;  %v9747_v35 = vld [vmem:[%s12728_s3 + $0x260] ss:$8 sps:$4 sm:$0xff]  }
 0x390   :  { %v3346_v58 = vsel %vm1208_vm1, %v3344_v28, %v3345_v61  ;;  %v3337_v20 = vadd.f32 %v12123_v45, %v3327_v32  ;;  %v9743_v14 = vld [vmem:[%s12728_s3 + $0x244] ss:$8 sps:$4 sm:$0xff]   ;;  %v9741_v28 = vld [vmem:[%s12728_s3 + $0x240] ss:$8 sps:$4 sm:$0xff]   ;;  %v9750_v57 = vld [vmem:[%s12728_s3 + $0x270] ss:$8 sps:$4 sm:$0xff]  }
 0x391   :  { %v3352_v21 = vmax.f32 %v3338_v50, %v3346_v58  ;;  %6144 = vmatmul.mubr.bf16.vlgmr.msra.gmra.mrb[24].mxu1 %v12251_v53  ;;  %v9687_v53 = vld [vmem:[%s12728_s3 + $0x120] ss:$8 sps:$4 sm:$0xff]   ;;  %v9749_v32 = vld [vmem:[%s12728_s3 + $0x264] ss:$8 sps:$4 sm:$0xff]  }
 0x392   :  { %v3340_v27 = vmax.f32 %v3337_v20, 0.0  ;;  %6264 = vmatpush1.bf16.msra.mxu1 %v9681_v1  ;;  %6153 = vmatprep.mubr.bf16.mxu1 %v12807_v25  ;;  %v9729_v50 = vld [vmem:[%s12728_s3 + $0x200] ss:$8 sps:$4 sm:$0xff]   ;;  %v9752_v1 = vld [vmem:[%s12728_s3 + $0x274] ss:$8 sps:$4 sm:$0xff]  }
 0x393   :  { %3355 = vst [vmem:[#allocation2 + $0x1] sm:$0x1] %v3352_v21  ;;  %v3357_v2 = vrot.slane %v3352_v21, 4  ;;  %6265 = vmatprep.subr.bf16.mxu1 %v9686_v52  ;;  %v6481_v52 = vpack.c.bf16 %v12248_v34, %v12248_v34  ;;  %v12513_v21 = vld [vmem:[%s12730_s4] ss:$0 sm:$0xff] }
 0x394   :  { %v3347_v49 = vrot.slane %v3340_v27, 2 }
 0x395   :  { %3359 = vst [vmem:[#allocation2 + $0x9] sm:$0x1] %v3357_v2 }
 0x396   :  { %v3348_v45 = vsel %vm1208_vm1, %v3345_v61, %v3347_v49  ;;  %v3354_v16 = vmax.f32 %v3340_v27, %v3347_v49  ;;  %6266 = vmatpush1.bf16.msra.mxu1 %v9684_v51  ;;  %v9744_v61 = vld [vmem:[%s12728_s3 + $0x250] ss:$8 sps:$4 sm:$0xff]  }
 0x397   :  { %v3353_v9 = vmax.f32 %v3339_v55, %v3348_v45  ;;  %6267 = vmatprep.subr.bf16.mxu1 %v9689_v6  ;;  %v9735_v55 = vld [vmem:[%s12728_s3 + $0x220] ss:$8 sps:$4 sm:$0xff]  }
 0x398   :  { %3365 = vst [vmem:[#allocation2 + $0x21] sm:$0x1] %v3354_v16 }
 0x399   :  { %3360 = vst [vmem:[#allocation2 + $0x11] sm:$0x1] %v3353_v9  ;;  %v3362_v15 = vrot.slane %v3353_v9, 4  ;;  %6154 = vmatmul.mubr.bf16.gmra.mrb[28].mxu1 %v12265_v59  ;;  %v9753_v59 = vld [vmem:[%s12731_s5 + $0x40] sm:$0xff]  }
 0x39a   :  { %6268 = vmatpush1.bf16.msra.mxu1 %v9687_v53  ;;  %6295 = vmatprep.mubr.bf16.mxu1 %v12807_v25 }
 0x39b   :  { %3364 = vst [vmem:[#allocation2 + $0x19] sm:$0x1] %v3362_v15  ;;  %6269 = vmatprep.subr.bf16.mxu1 %v9692_v11  ;;  %8643 = vmatprep.subr.bf16.mxu0 %v9753_v59  ;;  %v9766_v59 = vld [vmem:[%s12731_s5 + $0x60] sm:$0xff]  }
 0x39c   :  { %8644 = vmatpush3.bf16.msra.mxu0 %v9754_v44  ;;  %v9768_v44 = vld [vmem:[%s12731_s5 + $0x20] sm:$0xff]  }
 0x39d   :  { %8645 = vmatprep.subr.bf16.mxu0 %v9755_v47  ;;  %v9769_v47 = vld [vmem:[%s12731_s5 + $0xd8] sm:$0xff]  }
 0x39e   :  { %6270 = vmatpush1.bf16.msra.mxu1 %v9690_v43 }
 0x39f   :  { %6271 = vmatprep.subr.bf16.mxu1 %v9695_v5 }
 0x3a2   :  { %6272 = vmatpush1.bf16.msra.mxu1 %v9693_v7 }
 0x3a3   :  { %6273 = vmatprep.subr.bf16.mxu1 %v9698_v29 }
 0x3a6   :  { %6274 = vmatpush1.bf16.msra.mxu1 %v9696_v36 }
 0x3a7   :  { %6275 = vmatprep.subr.bf16.mxu1 %v9701_v22 }
 0x3aa   :  { %6276 = vmatpush1.bf16.msra.mxu1 %v9699_v40 }
 0x3ab   :  { %6277 = vmatprep.subr.bf16.mxu1 %v9704_v13 }
 0x3ae   :  { %6278 = vmatpush1.bf16.msra.mxu1 %v9702_v23 }
 0x3af   :  { %6423 = vmatprep.subr.bf16.mxu1 %v9707_v33  ;;  %v9756_v33 = vld [vmem:[%s12731_s5 + $0x8] sm:$0xff]  }
 0x3b0   :  { %8646 = vmatpush3.bf16.msra.mxu0 %v9756_v33 }
 0x3b1   :  { %6296 = vmatmul.mubr.bf16.vlgmr.msra.gmra.mrb[24].mxu1 %v12286_v30  ;;  %v9716_v30 = vld [vmem:[%s12728_s3 + $0x1b4] ss:$8 sps:$4 sm:$0xff]  }
 0x3b2   :  { %6424 = vmatpush1.bf16.msra.mxu1 %v9705_v54  ;;  %6305 = vmatprep.mubr.bf16.mxu1 %v12807_v25  ;;  %v9757_v54 = vld [vmem:[%s12731_s5 + $0xc0] sm:$0xff]  }
 0x3b3   :  { %6425 = vmatprep.subr.bf16.mxu1 %v9710_v17  ;;  %v9758_v17 = vld [vmem:[%s12731_s5 + $0x50] sm:$0xff]  }
 0x3b4   :  { %8647 = vmatprep.subr.bf16.mxu0 %v9758_v17 }
 0x3b6   :  { %6426 = vmatpush1.bf16.msra.mxu1 %v9708_v24  ;;  %v9759_v24 = vld [vmem:[%s12731_s5 + $0x80] sm:$0xff]  }
 0x3b7   :  { %6427 = vmatprep.subr.bf16.mxu1 %v9713_v19  ;;  %v9760_v19 = vld [vmem:[%s12731_s5 + $0x10] sm:$0xff]  }
 0x3b8   :  { %8648 = vmatpush3.bf16.msra.mxu0 %v9760_v19  ;;  %v9788_v19 = vld [vmem:[%s12731_s5 + $0x118] sm:$0xff]  }
 0x3b9   :  { %6306 = vmatmul.mubr.bf16.gmra.mrb[28].mxu1 %v6179_v10  ;;  %v9722_v10 = vld [vmem:[%s12728_s3 + $0x1d4] ss:$8 sps:$4 sm:$0xff]  }
 0x3ba   :  { %6428 = vmatpush1.bf16.msra.mxu1 %v9711_v26  ;;  %6455 = vmatprep.mubr.bf16.mxu1 %v12807_v25  ;;  %v9761_v26 = vld [vmem:[%s12731_s5 + $0xc8] sm:$0xff]  }
 0x3bb   :  { %6429 = vmatprep.subr.bf16.mxu1 %v9716_v30  ;;  %v9762_v30 = vld [vmem:[%s12731_s5 + $0x58] sm:$0xff]  }
 0x3bc   :  { %8649 = vmatprep.subr.bf16.mxu0 %v9762_v30  ;;  %v9790_v30 = vld [vmem:[%s12731_s5 + $0x128] sm:$0xff]  }
 0x3be   :  { %6430 = vmatpush1.bf16.msra.mxu1 %v9714_v0  ;;  %v9763_v0 = vld [vmem:[%s12731_s5 + $0x88] sm:$0xff]  }
 0x3bf   :  { %6431 = vmatprep.subr.bf16.mxu1 %v9719_v41  ;;  %v9764_v41 = vld [vmem:[%s12731_s5 + $0x18] sm:$0xff]  }
 0x3c0   :  { %8650 = vmatpush3.bf16.msra.mxu0 %v9764_v41  ;;  %v9792_v41 = vld [vmem:[%s12731_s5 + $0x138] sm:$0xff]  }
 0x3c1   :  { %8651 = vmatprep.subr.bf16.mxu0 %v9766_v59 }
 0x3c2   :  { %6432 = vmatpush1.bf16.msra.mxu1 %v9717_v18  ;;  %v9765_v18 = vld [vmem:[%s12731_s5 + $0xd0] sm:$0xff]  }
 0x3c3   :  { %6433 = vmatprep.subr.bf16.mxu1 %v9722_v10  ;;  %v9767_v10 = vld [vmem:[%s12731_s5 + $0x90] sm:$0xff]  }
 0x3c4   :  { %8652 = vmatpush3.bf16.msra.mxu0 %v9768_v44  ;;  %v9794_v44 = vld [vmem:[%s12732_s7 + $0x8] sm:$0xff]  }
 0x3c6   :  { %6434 = vmatpush1.bf16.msra.mxu1 %v9720_v4  ;;  %v9770_v4 = vld [vmem:[%s12731_s5 + $0x68] sm:$0xff]  }
 0x3c7   :  { %6435 = vmatprep.subr.bf16.mxu1 %v9725_v8  ;;  %v9771_v8 = vld [vmem:[%s12731_s5 + $0x98] sm:$0xff]   ;;  %8653 = vmatprep.subr.bf16.mxu0 %v9770_v4 }
 0x3c8   :  { %v9796_v4 = vld [vmem:[%s12732_s7 + $0x18] sm:$0xff]  }
 0x3ca   :  { %6436 = vmatpush1.bf16.msra.mxu1 %v9723_v63  ;;  %v9772_v63 = vld [vmem:[%s12731_s5 + $0x28] sm:$0xff]  }
 0x3cb   :  { %6437 = vmatprep.subr.bf16.mxu1 %v9728_v31  ;;  %8654 = vmatpush3.bf16.msra.mxu0 %v9772_v63  ;;  %v9773_v31 = vld [vmem:[%s12731_s5 + $0xe0] sm:$0xff]   ;;  %v9798_v63 = vld [vmem:[%s12732_s7 + $0x28] sm:$0xff]  }
 0x3ce   :  { %6438 = vmatpush1.bf16.msra.mxu1 %v9726_v38  ;;  %v9774_v38 = vld [vmem:[%s12731_s5 + $0x70] sm:$0xff]  }
 0x3cf   :  { %6578 = vmatprep.subr.bf16.mxu1 %v9731_v37  ;;  %v9775_v37 = vld [vmem:[%s12731_s5 + $0xa0] sm:$0xff]   ;;  %8655 = vmatprep.subr.bf16.mxu0 %v9774_v38  ;;  %v9800_v38 = vld [vmem:[%s12732_s7 + $0x38] sm:$0xff]  }
 0x3d1   :  { %6456 = vmatmul.mubr.bf16.vlgmr.msra.gmra.mrb[24].mxu1 %v12290_v48  ;;  %v9738_v48 = vld [vmem:[%s12728_s3 + $0x230] ss:$8 sps:$4 sm:$0xff]  }
 0x3d2   :  { %6579 = vmatpush1.bf16.msra.mxu1 %v9729_v50  ;;  %6465 = vmatprep.mubr.bf16.mxu1 %v12807_v25  ;;  %v9776_v50 = vld [vmem:[%s12731_s5 + $0x30] sm:$0xff]  }
 0x3d3   :  { %6580 = vmatprep.subr.bf16.mxu1 %v9734_v56  ;;  %8656 = vmatpush3.bf16.msra.mxu0 %v9776_v50  ;;  %v9777_v56 = vld [vmem:[%s12731_s5 + $0xe8] sm:$0xff]  }
 0x3d4   :  { %v9802_v50 = vld [vmem:[%s12733_s9 + $0x8] sm:$0xff]  }
 0x3d6   :  { %6581 = vmatpush1.bf16.msra.mxu1 %v9732_v46  ;;  %v9778_v46 = vld [vmem:[%s12731_s5 + $0x78] sm:$0xff]  }
 0x3d7   :  { %6582 = vmatprep.subr.bf16.mxu1 %v9737_v39  ;;  %v9779_v39 = vld [vmem:[%s12731_s5 + $0xa8] sm:$0xff]   ;;  %8657 = vmatprep.subr.bf16.mxu0 %v9778_v46  ;;  %v9804_v46 = vld [vmem:[%s12733_s9 + $0x18] sm:$0xff]  }
 0x3d9   :  { %6466 = vmatmul.mubr.bf16.gmra.mrb[28].mxu1 %v12271_v3  ;;  %v9746_v3 = vld [vmem:[%s12728_s3 + $0x254] ss:$8 sps:$4 sm:$0xff]  }
 0x3da   :  { %6583 = vmatpush1.bf16.msra.mxu1 %v9735_v55  ;;  %6610 = vmatprep.mubr.bf16.mxu1 %v12807_v25  ;;  %v9780_v55 = vld [vmem:[%s12731_s5 + $0x38] sm:$0xff]  }
 0x3db   :  { %6584 = vmatprep.subr.bf16.mxu1 %v9740_v42  ;;  %v9781_v42 = vld [vmem:[%s12731_s5 + $0xf0] sm:$0xff]   ;;  %8658 = vmatpush3.bf16.msra.mxu0 %v9780_v55  ;;  %v9806_v55 = vld [vmem:[%s12733_s9 + $0x28] sm:$0xff]  }
 0x3de   :  { %6585 = vmatpush1.bf16.msra.mxu1 %v9738_v48  ;;  %v9782_v48 = vld [vmem:[%s12731_s5 + $0xb0] sm:$0xff]  }
 0x3df   :  { %6586 = vmatprep.subr.bf16.mxu1 %v9743_v14  ;;  %v12903_v14 = vmov 0.0  }
 0x3e0   :  { %8714 = vmatprep.subr.bf16.mxu0 %v12903_v14 }
 0x3e2   :  { %6587 = vmatpush1.bf16.msra.mxu1 %v9741_v28  ;;  %v9784_v28 = vld [vmem:[%s12731_s5 + $0xf8] sm:$0xff]  }
 0x3e3   :  { %6588 = vmatprep.subr.bf16.mxu1 %v9746_v3  ;;  %v9785_v3 = vld [vmem:[%s12731_s5 + $0xb8] sm:$0xff]  }
 0x3e6   :  { %6589 = vmatpush1.bf16.msra.mxu1 %v9744_v61 }
 0x3e7   :  { %6590 = vmatprep.subr.bf16.mxu1 %v9749_v32 }
 0x3ea   :  { %6591 = vmatpush1.bf16.msra.mxu1 %v9747_v35 }
 0x3eb   :  { %6592 = vmatprep.subr.bf16.mxu1 %v9752_v1 }
 0x3ee   :  { %6593 = vmatpush1.bf16.msra.mxu1 %v9750_v57 }
 0x3ef   :  { %8665 = vmatprep.subr.bf16.mxu1 %v9757_v54 }
 0x3f1   :  { %6611 = vmatmul.mubr.bf16.vlgmr.msra.gmra.mrb[24].mxu1 %v6480_v60 }
 0x3f2   :  { %6620 = vmatprep.mubr.bf16.mxu1 %v12807_v25  ;;  %8666 = vmatpush3.bf16.msra.mxu1 %v9759_v24  ;;  %v9787_v24 = vld [vmem:[%s12731_s5 + $0x110] sm:$0xff]  }
 0x3f3   :  { %8667 = vmatprep.subr.bf16.mxu1 %v9761_v26  ;;  %v9789_v26 = vld [vmem:[%s12731_s5 + $0x120] sm:$0xff]  }
 0x3f6   :  { %8668 = vmatpush3.bf16.msra.mxu1 %v9763_v0  ;;  %v9791_v0 = vld [vmem:[%s12731_s5 + $0x130] sm:$0xff]  }
 0x3f7   :  { %8669 = vmatprep.subr.bf16.mxu1 %v9765_v18 }
 0x3f9   :  { %6621 = vmatmul.mubr.bf16.gmra.mrb[28].mxu1 %v6481_v52 }
 0x3fa   :  { %8670 = vmatpush3.bf16.msra.mxu1 %v9767_v10  ;;  %v9793_v10 = vld [vmem:[%s12732_s7] sm:$0xff]  }
 0x3fb   :  { %8671 = vmatprep.subr.bf16.mxu1 %v9769_v47  ;;  %v9795_v47 = vld [vmem:[%s12732_s7 + $0x10] sm:$0xff]  }
 0x3fe   :  { %8672 = vmatpush3.bf16.msra.mxu1 %v9771_v8  ;;  %v9797_v8 = vld [vmem:[%s12732_s7 + $0x20] sm:$0xff]  }
 0x3ff   :  { %8673 = vmatprep.subr.bf16.mxu1 %v9773_v31  ;;  %v9799_v31 = vld [vmem:[%s12732_s7 + $0x30] sm:$0xff]  }
 0x402   :  { %8674 = vmatpush3.bf16.msra.mxu1 %v9775_v37  ;;  %v9801_v37 = vld [vmem:[%s12733_s9] sm:$0xff]  }
 0x403   :  { %8675 = vmatprep.subr.bf16.mxu1 %v9777_v56  ;;  %v9803_v56 = vld [vmem:[%s12733_s9 + $0x10] sm:$0xff]  }
 0x406   :  { %8676 = vmatpush3.bf16.msra.mxu1 %v9779_v39  ;;  %v9805_v39 = vld [vmem:[%s12733_s9 + $0x20] sm:$0xff]  }
 0x407   :  { %8677 = vmatprep.subr.bf16.mxu1 %v9781_v42 }
 0x40a   :  { %8678 = vmatpush3.bf16.msra.mxu1 %v9782_v48 }
 0x40b   :  { %8679 = vmatprep.subr.bf16.mxu1 %v9784_v28 }
 0x40e   :  { %8680 = vmatpush3.bf16.msra.mxu1 %v9785_v3 }
 0x40f   :  { %8734 = vmatprep.subr.bf16.mxu1 %v12903_v14 }
 0x424   :  { %v4957_v58 = vpop.f32.mrb[16].mxu1 }
 0x425   :  { %v4959_v20 = vpop.f32.mrb[17].mxu1 }
 0x426   :  { %v4980_v27 = vmax.f32 %v4957_v58, %v4959_v20  ;;  %v4961_v51 = vpop.f32.mrb[18].mxu1 }
 0x427   :  { %v4963_v2 = vpop.f32.mrb[19].mxu1 }
 0x428   :  { %v4990_v6 = vadd.f32 %v12513_v21, %v4980_v27  ;;  %v4981_v12 = vmax.f32 %v4961_v51, %v4963_v2 }
 0x42a   :  { %v4993_v62 = vmax.f32 %v4990_v6, 0.0  ;;  %v4991_v25 = vadd.f32 %v12513_v21, %v4981_v12 }
 0x42c   :  { %v4994_v60 = vmax.f32 %v4991_v25, 0.0  ;;  %v4967_v49 = vpop.f32.mrb[20].mxu1  ;;  %v4999_v45 = vrot.slane %v4993_v62, 2 }
 0x42d   :  { %v4969_v34 = vpop.f32.mrb[21].mxu1 }
 0x42e   :  { %v5000_v16 = vrot.slane %v4994_v60, 2  ;;  %v4982_v53 = vmax.f32 %v4967_v49, %v4969_v34  ;;  %v4971_v9 = vpop.f32.mrb[22].mxu1 }
 0x42f   :  { %v4972_v11 = vpop.f32.mrb[23].mxu1 }
 0x430   :  { %v5001_v15 = vsel %vm1208_vm1, %v4999_v45, %v5000_v16  ;;  %v4992_v43 = vadd.f32 %v12513_v21, %v4982_v53 }
 0x431   :  { %v5007_v5 = vmax.f32 %v4993_v62, %v5001_v15 }
 0x432   :  { %v4995_v7 = vmax.f32 %v4992_v43, 0.0 }
 0x433   :  { %5010 = vst [vmem:[#allocation2 + $0x2] sm:$0x1] %v5007_v5  ;;  %v5012_v29 = vrot.slane %v5007_v5, 4 }
 0x434   :  { %v5002_v36 = vrot.slane %v4995_v7, 2 }
 0x435   :  { %5014 = vst [vmem:[#allocation2 + $0xa] sm:$0x1] %v5012_v29 }
 0x436   :  { %v5003_v22 = vsel %vm1208_vm1, %v5000_v16, %v5002_v36  ;;  %v5009_v40 = vmax.f32 %v4995_v7, %v5002_v36 }
 0x437   :  { %v5008_v13 = vmax.f32 %v4994_v60, %v5003_v22 }
 0x438   :  { %5020 = vst [vmem:[#allocation2 + $0x22] sm:$0x1] %v5009_v40 }
 0x439   :  { %5015 = vst [vmem:[#allocation2 + $0x12] sm:$0x1] %v5008_v13  ;;  %v5017_v23 = vrot.slane %v5008_v13, 4  ;;  %v9786_v13 = vld [vmem:[%s12731_s5 + $0x108] sm:$0xff]  }
 0x43b   :  { %5019 = vst [vmem:[#allocation2 + $0x1a] sm:$0x1] %v5017_v23 }
 0x4c4   :  { %v6612_v61 = vpop.f32.mrb[24].mxu1 }
 0x4c5   :  { %v6614_v32 = vpop.f32.mrb[25].mxu1 }
 0x4c6   :  { %v6635_v35 = vmax.f32 %v6612_v61, %v6614_v32  ;;  %v6616_v1 = vpop.f32.mrb[26].mxu1  ;;  %v8584_v32 = vld [vmem:[%s12734_s6] ss:$0 sm:$0xff] }
 0x4c7   :  { %v6618_v57 = vpop.f32.mrb[27].mxu1 }
 0x4c8   :  { %v6645_v52 = vadd.f32 %v12513_v21, %v6635_v35  ;;  %v6636_v58 = vmax.f32 %v6616_v1, %v6618_v57 }
 0x4ca   :  { %v6648_v20 = vmax.f32 %v6645_v52, 0.0  ;;  %v6646_v27 = vadd.f32 %v12513_v21, %v6636_v58 }
 0x4cc   :  { %v6649_v51 = vmax.f32 %v6646_v27, 0.0  ;;  %v6622_v2 = vpop.f32.mrb[28].mxu1  ;;  %v6654_v12 = vrot.slane %v6648_v20, 2 }
 0x4cd   :  { %v6624_v6 = vpop.f32.mrb[29].mxu1 }
 0x4ce   :  { %v6655_v62 = vrot.slane %v6649_v51, 2  ;;  %v6637_v25 = vmax.f32 %v6622_v2, %v6624_v6  ;;  %v6626_v60 = vpop.f32.mrb[30].mxu1 }
 0x4cf   :  { %v6627_v49 = vpop.f32.mrb[31].mxu1 }
 0x4d0   :  { %v6656_v34 = vsel %vm1208_vm1, %v6654_v12, %v6655_v62  ;;  %v6647_v45 = vadd.f32 %v12513_v21, %v6637_v25  ;;  %v9783_v21 = vld [vmem:[%s12731_s5 + $0x100] sm:$0xff]   ;;  %v9807_v49 = vld [vmem:[%s12733_s9 + $0x30] sm:$0xff]  }
 0x4d1   :  { %v6662_v16 = vmax.f32 %v6648_v20, %v6656_v34  ;;  %v9808_v34 = vld [vmem:[%s12733_s9 + $0x38] sm:$0xff]  }
 0x4d2   :  { %v6650_v53 = vmax.f32 %v6647_v45, 0.0  ;;  %v8625_v45 = vld [vmem:[%s12735_s8] ss:$0 sm:$0xff] }
 0x4d3   :  { %6665 = vst [vmem:[#allocation2 + $0x3] sm:$0x1] %v6662_v16  ;;  %v6667_v9 = vrot.slane %v6662_v16, 4 }
 0x4d4   :  { %v6657_v11 = vrot.slane %v6650_v53, 2 }
 0x4d5   :  { %6669 = vst [vmem:[#allocation2 + $0xb] sm:$0x1] %v6667_v9 }
 0x4d6   :  { %v6658_v15 = vsel %vm1208_vm1, %v6655_v62, %v6657_v11  ;;  %v6664_v43 = vmax.f32 %v6650_v53, %v6657_v11 }
 0x4d7   :  { %v6663_v5 = vmax.f32 %v6649_v51, %v6658_v15 }
 0x4d8   :  { %6675 = vst [vmem:[#allocation2 + $0x23] sm:$0x1] %v6664_v43 }
 0x4d9   :  { %6670 = vst [vmem:[#allocation2 + $0x13] sm:$0x1] %v6663_v5  ;;  %v6672_v7 = vrot.slane %v6663_v5, 4 }
 0x4da   :  { %v6676_v29 = vld [vmem:[#allocation2] sm:$0xff] }
 0x4db   :  { %6674 = vst [vmem:[#allocation2 + $0x1b] sm:$0x1] %v6672_v7  ;;  %v6681_v40 = vpack.c.bf16 %v6676_v29, %v6676_v29 }
 0x4dc   :  { %v6677_v36 = vld [vmem:[#allocation2 + $0x8] sm:$0xff] }
 0x4dd   :  { %v6682_v22 = vpack.c.bf16 %v6677_v36, %v6677_v36 }
 0x4df   :  { %7045 = vmatprep.mubr.bf16.mxu0 %v6682_v22  ;;  %v6680_v18 = vld [vmem:[#allocation2 + $0x20] sm:$0xff] }
 0x4e0   :  { %7046 = vmatmul.mubr.bf16.vlgmr.msra.gmra.mrb[32].mxu0 %v6681_v40  ;;  %v6678_v23 = vld [vmem:[#allocation2 + $0x10] sm:$0xff]  ;;  %v6685_v59 = vpack.c.bf16 %v6680_v18, %v6680_v18 }
 0x4e1   :  { %8715 = vmatpush3.bf16.msra.mxu0 %v9783_v21  ;;  %8730 = vmatprep.mubr.msk.bf16.mxu0 %vm9811_vm3, %v12903_v14  ;;  %v6683_v17 = vpack.c.bf16 %v6678_v23, %v6678_v23 }
 0x4e2   :  { %8716 = vmatprep.subr.bf16.mxu0 %v12903_v14  ;;  %v6679_v33 = vld [vmem:[#allocation2 + $0x18] sm:$0xff] }
 0x4e3   :  { %v6684_v54 = vpack.c.bf16 %v6679_v33, %v6679_v33 }
 0x4e5   :  { %8717 = vmatpush3.bf16.msra.mxu0 %v9786_v13  ;;  %7085 = vmatprep.mubr.bf16.mxu1 %v6684_v54 }
 0x4e6   :  { %7086 = vmatmul.mubr.bf16.vlgmr.msra.gmra.mrb[32].mxu1 %v6683_v17  ;;  %8718 = vmatprep.subr.bf16.mxu0 %v12903_v14 }
 0x4e7   :  { %8750 = vmatprep.mubr.msk.bf16.mxu1 %vm9811_vm3, %v12903_v14  ;;  %8735 = vmatpush3.bf16.msra.mxu1 %v9793_v10 }
 0x4e8   :  { %8736 = vmatprep.subr.bf16.mxu1 %v12903_v14 }
 0x4e9   :  { %8719 = vmatpush3.bf16.msra.mxu0 %v9787_v24 }
 0x4ea   :  { %8720 = vmatprep.subr.bf16.mxu0 %v12903_v14 }
 0x4eb   :  { %8737 = vmatpush3.bf16.msra.mxu1 %v9794_v44 }
 0x4ec   :  { %8738 = vmatprep.subr.bf16.mxu1 %v12903_v14 }
 0x4ed   :  { %8721 = vmatpush3.bf16.msra.mxu0 %v9788_v19 }
 0x4ee   :  { %8722 = vmatprep.subr.bf16.mxu0 %v12903_v14 }
 0x4ef   :  { %8739 = vmatpush3.bf16.msra.mxu1 %v9795_v47 }
 0x4f0   :  { %8740 = vmatprep.subr.bf16.mxu1 %v12903_v14 }
 0x4f1   :  { %8723 = vmatpush3.bf16.msra.mxu0 %v9789_v26 }
 0x4f2   :  { %8724 = vmatprep.subr.bf16.mxu0 %v12903_v14 }
 0x4f3   :  { %8741 = vmatpush3.bf16.msra.mxu1 %v9796_v4 }
 0x4f4   :  { %8742 = vmatprep.subr.bf16.mxu1 %v12903_v14 }
 0x4f5   :  { %8725 = vmatpush3.bf16.msra.mxu0 %v9790_v30 }
 0x4f6   :  { %8726 = vmatprep.subr.bf16.mxu0 %v12903_v14 }
 0x4f7   :  { %8743 = vmatpush3.bf16.msra.mxu1 %v9797_v8 }
 0x4f8   :  { %8744 = vmatprep.subr.bf16.mxu1 %v12903_v14 }
 0x4f9   :  { %8727 = vmatpush3.bf16.msra.mxu0 %v9791_v0 }
 0x4fa   :  { %8728 = vmatprep.subr.bf16.mxu0 %v12903_v14 }
 0x4fb   :  { %8745 = vmatpush3.bf16.msra.mxu1 %v9798_v63 }
 0x4fc   :  { %8746 = vmatprep.subr.bf16.mxu1 %v12903_v14 }
 0x4fd   :  { %8729 = vmatpush3.bf16.msra.mxu0 %v9792_v41 }
 0x4fe   :  { %8754 = vmatprep.subr.bf16.mxu0 %v12903_v14 }
 0x4ff   :  { %8747 = vmatpush3.bf16.msra.mxu1 %v9799_v31 }
 0x500   :  { %8731 = vmatmul.mubr.bf16.vlgmr.msra.gmra.mrb[36].mxu0 %v6685_v59  ;;  %8748 = vmatprep.subr.bf16.mxu1 %v12903_v14 }
 0x501   :  { %8770 = vmatprep.mubr.msk.bf16.mxu0 %vm9811_vm3, %v12903_v14  ;;  %8755 = vmatpush3.bf16.msra.mxu0 %v9801_v37 }
 0x502   :  { %8756 = vmatprep.subr.bf16.mxu0 %v12903_v14 }
 0x503   :  { %8749 = vmatpush3.bf16.msra.mxu1 %v9800_v38 }
 0x505   :  { %8757 = vmatpush3.bf16.msra.mxu0 %v9802_v50 }
 0x506   :  { %8758 = vmatprep.subr.bf16.mxu0 %v12903_v14 }
 0x509   :  { %8759 = vmatpush3.bf16.msra.mxu0 %v9803_v56 }
 0x50a   :  { %8760 = vmatprep.subr.bf16.mxu0 %v12903_v14 }
 0x50d   :  { %8761 = vmatpush3.bf16.msra.mxu0 %v9804_v46 }
 0x50e   :  { %8762 = vmatprep.subr.bf16.mxu0 %v12903_v14 }
 0x511   :  { %8763 = vmatpush3.bf16.msra.mxu0 %v9805_v39 }
 0x512   :  { %8764 = vmatprep.subr.bf16.mxu0 %v12903_v14 }
 0x515   :  { %8765 = vmatpush3.bf16.msra.mxu0 %v9806_v55 }
 0x516   :  { %8766 = vmatprep.subr.bf16.mxu0 %v12903_v14 }
 0x519   :  { %8767 = vmatpush3.bf16.msra.mxu0 %v9807_v49 }
 0x51a   :  { %8768 = vmatprep.subr.bf16.mxu0 %v12903_v14  ;;  %v8634_v14 = vld [vmem:[%s12736_s10] ss:$0 sm:$0xff] }
 0x51d   :  { %8769 = vmatpush3.bf16.msra.mxu0 %v9808_v34 }
 0x5b3   :  { %v8659_v42 = vpop.f32.mrb[32].mxu0 }
 0x5b4   :  { %v8660_v48 = vpop.f32.mrb[33].mxu0 }
 0x5b5   :  { %v8661_v28 = vadd.f32 %v8660_v48, %v8659_v42  ;;  %v8662_v3 = vpop.f32.mrb[34].mxu0 }
 0x5b6   :  { %v8663_v61 = vpop.f32.mrb[35].mxu0 }
 0x5b7   :  { %v7048_v57 = vadd.f32 %v8661_v28, %v8584_v32 }
 0x5b9   :  { %v8681_v35 = vpop.f32.mrb[32].mxu1 }
 0x5ba   :  { %v8682_v1 = vpop.f32.mrb[33].mxu1 }
 0x5bb   :  { %v8683_v52 = vadd.f32 %v8682_v1, %v8681_v35  ;;  %v8684_v58 = vpop.f32.mrb[34].mxu1 }
 0x5bc   :  { %v8685_v20 = vpop.f32.mrb[35].mxu1 }
 0x5bd   :  { %v7088_v27 = vadd.f32 %v8683_v52, %v7048_v57 }
 0x5d3   :  { %v7127_v51 = vpop.f32.mrb[36].mxu0 }
 0x5d4   :  { %v7128_v2 = vadd.f32 %v7127_v51, %v7088_v27  ;;  %v8732_v6 = vpop.f32.mrb[37].mxu0 }
 0x5d5   :  { %v7130_v12 = vpop.f32.mrb[38].mxu0 }
 0x5d6   :  { %v7133_v62 = vmax.f32 %v7128_v2, 0.0  ;;  %v8733_v25 = vpop.f32.mrb[39].mxu0 }
 0x5d8   :  { %v7134_v60 = vpack.c.bf16 %v7133_v62, %v7133_v62 }
 0x5da   :  { %8751 = vmatmul.mubr.bf16.vlgmr.msra.gmra.mrb[36].mxu1 %v7134_v60 }
 0x6ad   :  { %v7240_v16 = vpop.f32.mrb[36].mxu1 }
 0x6ae   :  { %v7241_v53 = vadd.f32 %v8625_v45, %v7240_v16  ;;  %v8752_v9 = vpop.f32.mrb[37].mxu1 }
 0x6af   :  { %v7243_v11 = vpop.f32.mrb[38].mxu1 }
 0x6b0   :  { %v7246_v15 = vmax.f32 %v7241_v53, 0.0  ;;  %v8753_v43 = vpop.f32.mrb[39].mxu1 }
 0x6b2   :  { %v7247_v5 = vpack.c.bf16 %v7246_v15, %v7246_v15 }
 0x6b4   :  { %8771 = vmatmul.mubr.bf16.vlgmr.msra.gmra.mrb[40].mxu0 %v7247_v5 }
 0x787   :  { %v7353_v7 = vpop.f32.mrb[40].mxu0 }
 0x788   :  { %v7354_v29 = vadd.f32 %v8634_v14, %v7353_v7  ;;  %v8772_v36 = vpop.f32.mrb[41].mxu0 }
 0x789   :  { %v7356_v22 = vpop.f32.mrb[42].mxu0 }
 0x78a   :  { %7359 = vst [vmem:[%s12737_s11] sm:$0xff] %v7354_v29  ;;  %v8773_v21 = vpop.f32.mrb[43].mxu0 }

</bundles_post_ra>
